<compile_context>
chip_gen: v7x
topology: tpu7x:2x2x1
jax: 0.10.0
libtpu: 0.0.40
codegen_flags: <defaults>
</compile_context>

<pallas_src>
import functools

import jax
import jax.numpy as jnp
from jax.experimental import pallas as pl
from jax.experimental.pallas import tpu as pltpu

EPS = 1e-5  # nn.BatchNorm2d default eps


# ----------------------------- pallas plumbing ------------------------------

def _full_spec(shape):
    nd = len(shape)
    return pl.BlockSpec(shape, lambda i, nd=nd: (0,) * nd)


def _pallas_full(kernel, out_shapes, args):
    """Single-block pallas_call: grid=(1,), every array fully resident in VMEM."""
    in_specs = [_full_spec(a.shape) for a in args]
    out_specs = tuple(_full_spec(o.shape) for o in out_shapes)
    return pl.pallas_call(
        kernel,
        out_shape=tuple(out_shapes),
        grid=(1,),
        in_specs=in_specs,
        out_specs=out_specs,
        compiler_params=pltpu.CompilerParams(
            dimension_semantics=("arbitrary",)),
    )(*args)


# ------------------------------ kernel helpers ------------------------------

def _dot_taps(tap_refs, w_ref):
    """sum_t dot(tap_t, w[t]) with in-kernel bf16 cast of the LHS, f32 accum."""
    acc = jnp.dot(tap_refs[0][...].astype(jnp.bfloat16), w_ref[0],
                  preferred_element_type=jnp.float32)
    for t in range(1, len(tap_refs)):
        acc = acc + jnp.dot(tap_refs[t][...].astype(jnp.bfloat16), w_ref[t],
                            preferred_element_type=jnp.float32)
    return acc


def _bn_train(y, g_ref, b_ref, inv_m):
    """Training-mode BN with two-pass (mean then centered var) batch stats."""
    mean = jnp.sum(y, axis=0, keepdims=True) * inv_m
    d = y - mean
    var = jnp.sum(d * d, axis=0, keepdims=True) * inv_m
    scale = g_ref[...] * jax.lax.rsqrt(var + EPS)
    return d * scale + b_ref[...]


# -------------------------------- kernels -----------------------------------

def _conv1_bn_relu_kernel(p_ref, w_ref, bias_ref, g_ref, b_ref, o_ref, *, inv_m):
    """Stem: relu(BN(im2col @ w + bias)) fully fused."""
    y = jnp.dot(p_ref[...].astype(jnp.bfloat16), w_ref[...],
                preferred_element_type=jnp.float32) + bias_ref[...]
    o_ref[...] = jnp.maximum(_bn_train(y, g_ref, b_ref, inv_m), 0.0)


def _conv_bn_relu_kernel(*refs, n_taps, inv_m):
    """relu(BN(conv3x3)) via in-kernel tap-GEMM."""
    taps, (w_ref, g_ref, b_ref, o_ref) = refs[:n_taps], refs[n_taps:]
    y = _dot_taps(taps, w_ref)
    o_ref[...] = jnp.maximum(_bn_train(y, g_ref, b_ref, inv_m), 0.0)


def _conv_bn_split_relu_kernel(*refs, n_taps, inv_m, c_main):
    """Fused [conv1 | shortcut-1x1] GEMM (N = 2*Cout) + per-half BN.

    Output 0: relu(BN(conv1))   (main path, channels [:c_main])
    Output 1: BN(shortcut conv) (no ReLU,   channels [c_main:])
    """
    taps, (w_ref, g_ref, b_ref, om_ref, os_ref) = refs[:n_taps], refs[n_taps:]
    z = _bn_train(_dot_taps(taps, w_ref), g_ref, b_ref, inv_m)
    om_ref[...] = jnp.maximum(z[:, :c_main], 0.0)
    os_ref[...] = z[:, c_main:]


def _conv_bn_add_relu_kernel(*refs, n_taps, inv_m):
    """relu(BN(conv3x3) + residual) via in-kernel tap-GEMM."""
    taps, (w_ref, g_ref, b_ref, r_ref, o_ref) = refs[:n_taps], refs[n_taps:]
    z = _bn_train(_dot_taps(taps, w_ref), g_ref, b_ref, inv_m)
    o_ref[...] = jnp.maximum(z + r_ref[...], 0.0)


def _maxtree_kernel(*refs):
    """Elementwise max over all inputs (lane-dense rows)."""
    o_ref = refs[-1]
    acc = refs[0][...]
    for r in refs[1:-1]:
        acc = jnp.maximum(acc, r[...])
    o_ref[...] = acc


# ---------------------------- conv / pool wrappers ---------------------------

def _conv_taps(x_nhwc, kh, kw, stride, pad, pad_value=0.0):
    """Shifted strided NHWC views, each flattened to (N*OH*OW, C) rows."""
    N, H, W, C = x_nhwc.shape
    xp = jnp.pad(x_nhwc, ((0, 0), (pad, pad), (pad, pad), (0, 0)),
                 constant_values=pad_value)
    OH = (H + 2 * pad - kh) // stride + 1
    OW = (W + 2 * pad - kw) // stride + 1
    M = N * OH * OW
    taps = []
    for i in range(kh):
        for j in range(kw):
            t = xp[:, i:i + stride * (OH - 1) + 1:stride,
                   j:j + stride * (OW - 1) + 1:stride, :]
            taps.append(t.reshape(M, C))
    return taps, (N, OH, OW)


def _w_taps(w_oihw):
    """PyTorch OIHW weight -> (KH*KW, I, O) bf16, matching tap ordering."""
    O, I, KH, KW = w_oihw.shape
    return jnp.transpose(w_oihw, (2, 3, 1, 0)).reshape(KH * KW, I, O) \
              .astype(jnp.bfloat16)


def maxpool2d(x_nhwc, k=3, stride=2, pad=1):
    """3x3/s2/p1 max pool as one 9-tap max kernel with lane-dense (>=128) rows."""
    N, H, W, C = x_nhwc.shape
    taps, (n, oh, ow) = _conv_taps(x_nhwc, k, k, stride, pad,
                                   pad_value=-jnp.inf)
    M = n * oh * ow
    pack = 128 // C if (C < 128 and 128 % C == 0 and M % (128 // C) == 0) else 1
    rows, width = M // pack, C * pack
    taps = [t.reshape(rows, width) for t in taps]
    (out,) = _pallas_full(
        _maxtree_kernel,
        (jax.ShapeDtypeStruct((rows, width), jnp.float32),),
        taps)
    return out.reshape(n, oh, ow, C)


# ------------------------------ model forward -------------------------------

def basic_block(x_nhwc, p, stride):
    """ResNet BasicBlock: 3x3-BN-ReLU-3x3-BN + (identity | 1x1-BN) shortcut, ReLU."""
    N, H, W, cin = x_nhwc.shape
    cout = p["w1"].shape[0]
    has_sc = "ws" in p

    taps1, (n, oh, ow) = _conv_taps(x_nhwc, 3, 3, stride, 1)
    m = n * oh * ow
    inv_m = 1.0 / m

    if has_sc:
        # Zero-pad the 1x1 shortcut weight to a 3x3 center tap and concatenate
        # along output channels: one GEMM (N = 2*cout) yields both paths.
        ws3 = jnp.zeros((cout, cin, 3, 3), jnp.float32) \
                 .at[:, :, 1, 1].set(p["ws"][:, :, 0, 0])
        w_cat = jnp.concatenate([p["w1"], ws3], axis=0)          # (2*cout,cin,3,3)
        g_cat = jnp.concatenate([p["g1"], p["gs"]]).reshape(1, 2 * cout)
        b_cat = jnp.concatenate([p["b1"], p["bs"]]).reshape(1, 2 * cout)
        kern = functools.partial(_conv_bn_split_relu_kernel,
                                 n_taps=9, inv_m=inv_m, c_main=cout)
        h1, r = _pallas_full(
            kern,
            (jax.ShapeDtypeStruct((m, cout), jnp.float32),
             jax.ShapeDtypeStruct((m, cout), jnp.float32)),
            taps1 + [_w_taps(w_cat), g_cat, b_cat])
    else:
        kern = functools.partial(_conv_bn_relu_kernel, n_taps=9, inv_m=inv_m)
        (h1,) = _pallas_full(
            kern,
            (jax.ShapeDtypeStruct((m, cout), jnp.float32),),
            taps1 + [_w_taps(p["w1"]),
                     p["g1"].reshape(1, cout), p["b1"].reshape(1, cout)])
        r = x_nhwc.reshape(m, cin)           # identity shortcut (stride 1, cin==cout)

    taps2, _ = _conv_taps(h1.reshape(n, oh, ow, cout), 3, 3, 1, 1)
    kern2 = functools.partial(_conv_bn_add_relu_kernel, n_taps=9, inv_m=inv_m)
    (out,) = _pallas_full(
        kern2,
        (jax.ShapeDtypeStruct((m, cout), jnp.float32),),
        taps2 + [_w_taps(p["w2"]),
                 p["g2"].reshape(1, cout), p["b2"].reshape(1, cout), r])
    return out.reshape(n, oh, ow, cout)


def down_block(x_nhwc, block_params, downsample):
    for bi, bp in enumerate(block_params):
        stride = 2 if (downsample and bi == 0) else 1
        x_nhwc = basic_block(x_nhwc, bp, stride)
    return x_nhwc


def encoder_forward(x_nchw, params):
    x = jnp.transpose(x_nchw, (0, 2, 3, 1)).astype(jnp.float32)   # NCHW -> NHWC

    # Stem: 7x7/s2/p3 conv (+ bias) + BN + ReLU in one fused kernel.
    taps, (n, oh, ow) = _conv_taps(x, 7, 7, 2, 3)
    m = n * oh * ow
    patches = jnp.concatenate(taps, axis=-1)                      # (M, 49*Cin), tiny
    w2d = jnp.transpose(params["conv1_w"], (2, 3, 1, 0)) \
             .reshape(-1, 64).astype(jnp.bfloat16)
    kern = functools.partial(_conv1_bn_relu_kernel, inv_m=1.0 / m)
    (z,) = _pallas_full(
        kern,
        (jax.ShapeDtypeStruct((m, 64), jnp.float32),),
        [patches, w2d,
         params["conv1_b"].reshape(1, 64),
         params["bn1_g"].reshape(1, 64), params["bn1_b"].reshape(1, 64)])
    z = z.reshape(n, oh, ow, 64)

    z = maxpool2d(z, 3, 2, 1)
    z = down_block(z, params["down1"], downsample=False)
    z = down_block(z, params["down2"], downsample=True)
    # The PyTorch forward returns a single tensor despite the List annotation.
    return jnp.transpose(z, (0, 3, 1, 2))                         # NHWC -> NCHW


# ------------------------------ parameter init -------------------------------

def init_params(key, in_channels, layers):
    keys = iter(jax.random.split(key, 64))

    def conv_w(out_c, in_c, k):
        fan_in = in_c * k * k
        return (jax.random.normal(next(keys), (out_c, in_c, k, k), jnp.float32)
                / jnp.sqrt(fan_in))

    def bn(c):
        g = 1.0 + 0.1 * jax.random.normal(next(keys), (c,), jnp.float32)
        b = 0.1 * jax.random.normal(next(keys), (c,), jnp.float32)
        return g, b

    p = {}
    p["conv1_w"] = conv_w(64, in_channels, 7)
    p["conv1_b"] = 0.1 * jax.random.normal(next(keys), (64,), jnp.float32)
    p["bn1_g"], p["bn1_b"] = bn(64)

    def make_down(in_c, out_c, n_blocks, downsample):
        blocks = []
        for bi in range(n_blocks):
            stride = 2 if (downsample and bi == 0) else 1
            bin_c = in_c if bi == 0 else out_c
            bp = {}
            bp["w1"] = conv_w(out_c, bin_c, 3)
            bp["g1"], bp["b1"] = bn(out_c)
            bp["w2"] = conv_w(out_c, out_c, 3)
            bp["g2"], bp["b2"] = bn(out_c)
            if stride != 1 or bin_c != out_c:
                bp["ws"] = conv_w(out_c, bin_c, 1)
                bp["gs"], bp["bs"] = bn(out_c)
            blocks.append(bp)
        return blocks

    p["down1"] = make_down(64, 64, layers[0], downsample=False)
    p["down2"] = make_down(64, 128, layers[1], downsample=True)
    return p


# ----------------------------------- main ------------------------------------

if __name__ == "__main__":
    key = jax.random.PRNGKey(0)
    kx, kp = jax.random.split(key)
    # Encoder(in_channels=4, layers=[2, 2]); input NCHW like PyTorch.
    x = jax.random.normal(kx, (2, 4, 16, 16), jnp.float32)
    params = init_params(kp, in_channels=4, layers=[2, 2])

    fwd = jax.jit(encoder_forward)
    out = jax.block_until_ready(fwd(x, params))

    # 16 -> conv1(s2) 8 -> maxpool(s2) 4 -> down1 4 -> down2(s2) 2, channels 128
    assert out.shape == (2, 128, 2, 2), out.shape
    assert bool(jnp.all(jnp.isfinite(out)))
    print("KERNEL_OK")
</pallas_src>

<mosaic_0001>
module attributes {stable_mosaic.version = 11 : i64} {
  func.func @_conv1_bn_relu_kernel(%arg0: i32, %arg1: memref<128x196xf32, #tpu.memory_space<vmem>>, %arg2: memref<196x64xbf16, #tpu.memory_space<vmem>>, %arg3: memref<1x64xf32, #tpu.memory_space<vmem>>, %arg4: memref<1x64xf32, #tpu.memory_space<vmem>>, %arg5: memref<1x64xf32, #tpu.memory_space<vmem>>, %arg6: memref<128x64xf32, #tpu.memory_space<vmem>>) attributes {dimension_semantics = [#tpu.dimension_semantics<arbitrary>], iteration_bounds = array<i64: 1>, scalar_prefetch = 0 : i64, scratch_operands = 0 : i64, tpu.core_type = #tpu.core_type<tc>, window_params = [{pipeline_mode = #tpu.pipeline_mode<synchronous>, transform_indices = @transform_0, window_bounds = array<i64: 128, 196>}, {pipeline_mode = #tpu.pipeline_mode<synchronous>, transform_indices = @transform_1, window_bounds = array<i64: 196, 64>}, {pipeline_mode = #tpu.pipeline_mode<synchronous>, transform_indices = @transform_2, window_bounds = array<i64: 1, 64>}, {pipeline_mode = #tpu.pipeline_mode<synchronous>, transform_indices = @transform_3, window_bounds = array<i64: 1, 64>}, {pipeline_mode = #tpu.pipeline_mode<synchronous>, transform_indices = @transform_4, window_bounds = array<i64: 1, 64>}, {pipeline_mode = #tpu.pipeline_mode<synchronous>, transform_indices = @transform_5, window_bounds = array<i64: 128, 64>}]} {
    %c0 = arith.constant 0 : index
    %c0_0 = arith.constant 0 : index
    %0 = vector.load %arg1[%c0, %c0_0] : memref<128x196xf32, #tpu.memory_space<vmem>>, vector<128x196xf32>
    %1 = arith.truncf %0 : vector<128x196xf32> to vector<128x196xbf16>
    %c0_1 = arith.constant 0 : index
    %c0_2 = arith.constant 0 : index
    %2 = vector.load %arg2[%c0_1, %c0_2] : memref<196x64xbf16, #tpu.memory_space<vmem>>, vector<196x64xbf16>
    %cst = arith.constant dense<0.000000e+00> : vector<128x64xf32>
    %3 = tpu.matmul %1, %2, %cst {dimension_numbers = #tpu.dot_dimension_numbers<[1], [0], [0], [1], [0, 0, 1, 1], [], []>} : vector<128x196xbf16>, vector<196x64xbf16>, vector<128x64xf32> -> vector<128x64xf32>
    %c0_3 = arith.constant 0 : index
    %c0_4 = arith.constant 0 : index
    %4 = vector.load %arg3[%c0_3, %c0_4] : memref<1x64xf32, #tpu.memory_space<vmem>>, vector<1x64xf32>
    %5 = vector.broadcast %4 : vector<1x64xf32> to vector<128x64xf32>
    %6 = arith.addf %3, %5 : vector<128x64xf32>
    %cst_5 = arith.constant dense<0.000000e+00> : vector<64xf32>
    %7 = vector.multi_reduction <add>, %6, %cst_5 [0] : vector<128x64xf32> to vector<64xf32>
    %8 = vector.shape_cast %7 : vector<64xf32> to vector<1x64xf32>
    %cst_6 = arith.constant 7.812500e-03 : f32
    %9 = vector.broadcast %cst_6 : f32 to vector<1x64xf32>
    %10 = arith.mulf %8, %9 : vector<1x64xf32>
    %11 = vector.broadcast %10 : vector<1x64xf32> to vector<128x64xf32>
    %12 = arith.subf %6, %11 : vector<128x64xf32>
    %13 = arith.mulf %12, %12 : vector<128x64xf32>
    %cst_7 = arith.constant dense<0.000000e+00> : vector<64xf32>
    %14 = vector.multi_reduction <add>, %13, %cst_7 [0] : vector<128x64xf32> to vector<64xf32>
    %15 = vector.shape_cast %14 : vector<64xf32> to vector<1x64xf32>
    %cst_8 = arith.constant 7.812500e-03 : f32
    %16 = vector.broadcast %cst_8 : f32 to vector<1x64xf32>
    %17 = arith.mulf %15, %16 : vector<1x64xf32>
    %c0_9 = arith.constant 0 : index
    %c0_10 = arith.constant 0 : index
    %18 = vector.load %arg4[%c0_9, %c0_10] : memref<1x64xf32, #tpu.memory_space<vmem>>, vector<1x64xf32>
    %cst_11 = arith.constant 9.99999974E-6 : f32
    %19 = vector.broadcast %cst_11 : f32 to vector<1x64xf32>
    %20 = arith.addf %17, %19 : vector<1x64xf32>
    %21 = math.rsqrt %20 : vector<1x64xf32>
    %22 = arith.mulf %18, %21 : vector<1x64xf32>
    %23 = vector.broadcast %22 : vector<1x64xf32> to vector<128x64xf32>
    %24 = arith.mulf %12, %23 : vector<128x64xf32>
    %c0_12 = arith.constant 0 : index
    %c0_13 = arith.constant 0 : index
    %25 = vector.load %arg5[%c0_12, %c0_13] : memref<1x64xf32, #tpu.memory_space<vmem>>, vector<1x64xf32>
    %26 = vector.broadcast %25 : vector<1x64xf32> to vector<128x64xf32>
    %27 = arith.addf %24, %26 : vector<128x64xf32>
    %cst_14 = arith.constant 0.000000e+00 : f32
    %28 = vector.broadcast %cst_14 : f32 to vector<128x64xf32>
    %29 = arith.maximumf %27, %28 : vector<128x64xf32>
    %c0_15 = arith.constant 0 : index
    %c0_16 = arith.constant 0 : index
    %30 = vector.load %arg6[%c0_15, %c0_16] : memref<128x64xf32, #tpu.memory_space<vmem>>, vector<128x64xf32>
    tpu.vector_store %arg6[%c0_15, %c0_16], %29 {strides = array<i32>} : memref<128x64xf32, #tpu.memory_space<vmem>>, vector<128x64xf32>,
    return
  }
  func.func @transform_0(%arg0: i32) -> (i32, i32) {
    %c0_i32 = arith.constant 0 : i32
    %c0_i32_0 = arith.constant 0 : i32
    %c0_i32_1 = arith.constant 0 : i32
    return %c0_i32, %c0_i32_0 : i32, i32
  }
  func.func @transform_1(%arg0: i32) -> (i32, i32) {
    %c0_i32 = arith.constant 0 : i32
    %c0_i32_0 = arith.constant 0 : i32
    %c0_i32_1 = arith.constant 0 : i32
    return %c0_i32, %c0_i32_0 : i32, i32
  }
  func.func @transform_2(%arg0: i32) -> (i32, i32) {
    %c0_i32 = arith.constant 0 : i32
    %c0_i32_0 = arith.constant 0 : i32
    %c0_i32_1 = arith.constant 0 : i32
    return %c0_i32, %c0_i32_0 : i32, i32
  }
  func.func @transform_3(%arg0: i32) -> (i32, i32) {
    %c0_i32 = arith.constant 0 : i32
    %c0_i32_0 = arith.constant 0 : i32
    %c0_i32_1 = arith.constant 0 : i32
    return %c0_i32, %c0_i32_0 : i32, i32
  }
  func.func @transform_4(%arg0: i32) -> (i32, i32) {
    %c0_i32 = arith.constant 0 : i32
    %c0_i32_0 = arith.constant 0 : i32
    %c0_i32_1 = arith.constant 0 : i32
    return %c0_i32, %c0_i32_0 : i32, i32
  }
  func.func @transform_5(%arg0: i32) -> (i32, i32) {
    %c0_i32 = arith.constant 0 : i32
    %c0_i32_0 = arith.constant 0 : i32
    %c0_i32_1 = arith.constant 0 : i32
    return %c0_i32, %c0_i32_0 : i32, i32
  }
}

module attributes {stable_mosaic.version = 11 : i64} {
  func.func @_maxtree_kernel(%arg0: i32, %arg1: memref<16x128xf32, #tpu.memory_space<vmem>>, %arg2: memref<16x128xf32, #tpu.memory_space<vmem>>, %arg3: memref<16x128xf32, #tpu.memory_space<vmem>>, %arg4: memref<16x128xf32, #tpu.memory_space<vmem>>, %arg5: memref<16x128xf32, #tpu.memory_space<vmem>>, %arg6: memref<16x128xf32, #tpu.memory_space<vmem>>, %arg7: memref<16x128xf32, #tpu.memory_space<vmem>>, %arg8: memref<16x128xf32, #tpu.memory_space<vmem>>, %arg9: memref<16x128xf32, #tpu.memory_space<vmem>>, %arg10: memref<16x128xf32, #tpu.memory_space<vmem>>) attributes {dimension_semantics = [#tpu.dimension_semantics<arbitrary>], iteration_bounds = array<i64: 1>, scalar_prefetch = 0 : i64, scratch_operands = 0 : i64, tpu.core_type = #tpu.core_type<tc>, window_params = [{pipeline_mode = #tpu.pipeline_mode<synchronous>, transform_indices = @transform_0, window_bounds = array<i64: 16, 128>}, {pipeline_mode = #tpu.pipeline_mode<synchronous>, transform_indices = @transform_1, window_bounds = array<i64: 16, 128>}, {pipeline_mode = #tpu.pipeline_mode<synchronous>, transform_indices = @transform_2, window_bounds = array<i64: 16, 128>}, {pipeline_mode = #tpu.pipeline_mode<synchronous>, transform_indices = @transform_3, window_bounds = array<i64: 16, 128>}, {pipeline_mode = #tpu.pipeline_mode<synchronous>, transform_indices = @transform_4, window_bounds = array<i64: 16, 128>}, {pipeline_mode = #tpu.pipeline_mode<synchronous>, transform_indices = @transform_5, window_bounds = array<i64: 16, 128>}, {pipeline_mode = #tpu.pipeline_mode<synchronous>, transform_indices = @transform_6, window_bounds = array<i64: 16, 128>}, {pipeline_mode = #tpu.pipeline_mode<synchronous>, transform_indices = @transform_7, window_bounds = array<i64: 16, 128>}, {pipeline_mode = #tpu.pipeline_mode<synchronous>, transform_indices = @transform_8, window_bounds = array<i64: 16, 128>}, {pipeline_mode = #tpu.pipeline_mode<synchronous>, transform_indices = @transform_9, window_bounds = array<i64: 16, 128>}]} {
    %c0 = arith.constant 0 : index
    %c0_0 = arith.constant 0 : index
    %0 = vector.load %arg1[%c0, %c0_0] : memref<16x128xf32, #tpu.memory_space<vmem>>, vector<16x128xf32>
    %c0_1 = arith.constant 0 : index
    %c0_2 = arith.constant 0 : index
    %1 = vector.load %arg2[%c0_1, %c0_2] : memref<16x128xf32, #tpu.memory_space<vmem>>, vector<16x128xf32>
    %2 = arith.maximumf %0, %1 : vector<16x128xf32>
    %c0_3 = arith.constant 0 : index
    %c0_4 = arith.constant 0 : index
    %3 = vector.load %arg3[%c0_3, %c0_4] : memref<16x128xf32, #tpu.memory_space<vmem>>, vector<16x128xf32>
    %4 = arith.maximumf %2, %3 : vector<16x128xf32>
    %c0_5 = arith.constant 0 : index
    %c0_6 = arith.constant 0 : index
    %5 = vector.load %arg4[%c0_5, %c0_6] : memref<16x128xf32, #tpu.memory_space<vmem>>, vector<16x128xf32>
    %6 = arith.maximumf %4, %5 : vector<16x128xf32>
    %c0_7 = arith.constant 0 : index
    %c0_8 = arith.constant 0 : index
    %7 = vector.load %arg5[%c0_7, %c0_8] : memref<16x128xf32, #tpu.memory_space<vmem>>, vector<16x128xf32>
    %8 = arith.maximumf %6, %7 : vector<16x128xf32>
    %c0_9 = arith.constant 0 : index
    %c0_10 = arith.constant 0 : index
    %9 = vector.load %arg6[%c0_9, %c0_10] : memref<16x128xf32, #tpu.memory_space<vmem>>, vector<16x128xf32>
    %10 = arith.maximumf %8, %9 : vector<16x128xf32>
    %c0_11 = arith.constant 0 : index
    %c0_12 = arith.constant 0 : index
    %11 = vector.load %arg7[%c0_11, %c0_12] : memref<16x128xf32, #tpu.memory_space<vmem>>, vector<16x128xf32>
    %12 = arith.maximumf %10, %11 : vector<16x128xf32>
    %c0_13 = arith.constant 0 : index
    %c0_14 = arith.constant 0 : index
    %13 = vector.load %arg8[%c0_13, %c0_14] : memref<16x128xf32, #tpu.memory_space<vmem>>, vector<16x128xf32>
    %14 = arith.maximumf %12, %13 : vector<16x128xf32>
    %c0_15 = arith.constant 0 : index
    %c0_16 = arith.constant 0 : index
    %15 = vector.load %arg9[%c0_15, %c0_16] : memref<16x128xf32, #tpu.memory_space<vmem>>, vector<16x128xf32>
    %16 = arith.maximumf %14, %15 : vector<16x128xf32>
    %c0_17 = arith.constant 0 : index
    %c0_18 = arith.constant 0 : index
    %17 = vector.load %arg10[%c0_17, %c0_18] : memref<16x128xf32, #tpu.memory_space<vmem>>, vector<16x128xf32>
    tpu.vector_store %arg10[%c0_17, %c0_18], %16 {strides = array<i32>} : memref<16x128xf32, #tpu.memory_space<vmem>>, vector<16x128xf32>,
    return
  }
  func.func @transform_0(%arg0: i32) -> (i32, i32) {
    %c0_i32 = arith.constant 0 : i32
    %c0_i32_0 = arith.constant 0 : i32
    %c0_i32_1 = arith.constant 0 : i32
    return %c0_i32, %c0_i32_0 : i32, i32
  }
  func.func @transform_1(%arg0: i32) -> (i32, i32) {
    %c0_i32 = arith.constant 0 : i32
    %c0_i32_0 = arith.constant 0 : i32
    %c0_i32_1 = arith.constant 0 : i32
    return %c0_i32, %c0_i32_0 : i32, i32
  }
  func.func @transform_2(%arg0: i32) -> (i32, i32) {
    %c0_i32 = arith.constant 0 : i32
    %c0_i32_0 = arith.constant 0 : i32
    %c0_i32_1 = arith.constant 0 : i32
    return %c0_i32, %c0_i32_0 : i32, i32
  }
  func.func @transform_3(%arg0: i32) -> (i32, i32) {
    %c0_i32 = arith.constant 0 : i32
    %c0_i32_0 = arith.constant 0 : i32
    %c0_i32_1 = arith.constant 0 : i32
    return %c0_i32, %c0_i32_0 : i32, i32
  }
  func.func @transform_4(%arg0: i32) -> (i32, i32) {
    %c0_i32 = arith.constant 0 : i32
    %c0_i32_0 = arith.constant 0 : i32
    %c0_i32_1 = arith.constant 0 : i32
    return %c0_i32, %c0_i32_0 : i32, i32
  }
  func.func @transform_5(%arg0: i32) -> (i32, i32) {
    %c0_i32 = arith.constant 0 : i32
    %c0_i32_0 = arith.constant 0 : i32
    %c0_i32_1 = arith.constant 0 : i32
    return %c0_i32, %c0_i32_0 : i32, i32
  }
  func.func @transform_6(%arg0: i32) -> (i32, i32) {
    %c0_i32 = arith.constant 0 : i32
    %c0_i32_0 = arith.constant 0 : i32
    %c0_i32_1 = arith.constant 0 : i32
    return %c0_i32, %c0_i32_0 : i32, i32
  }
  func.func @transform_7(%arg0: i32) -> (i32, i32) {
    %c0_i32 = arith.constant 0 : i32
    %c0_i32_0 = arith.constant 0 : i32
    %c0_i32_1 = arith.constant 0 : i32
    return %c0_i32, %c0_i32_0 : i32, i32
  }
  func.func @transform_8(%arg0: i32) -> (i32, i32) {
    %c0_i32 = arith.constant 0 : i32
    %c0_i32_0 = arith.constant 0 : i32
    %c0_i32_1 = arith.constant 0 : i32
    return %c0_i32, %c0_i32_0 : i32, i32
  }
  func.func @transform_9(%arg0: i32) -> (i32, i32) {
    %c0_i32 = arith.constant 0 : i32
    %c0_i32_0 = arith.constant 0 : i32
    %c0_i32_1 = arith.constant 0 : i32
    return %c0_i32, %c0_i32_0 : i32, i32
  }
}

module attributes {stable_mosaic.version = 11 : i64} {
  func.func @_conv_bn_relu_kernel(%arg0: i32, %arg1: memref<32x64xf32, #tpu.memory_space<vmem>>, %arg2: memref<32x64xf32, #tpu.memory_space<vmem>>, %arg3: memref<32x64xf32, #tpu.memory_space<vmem>>, %arg4: memref<32x64xf32, #tpu.memory_space<vmem>>, %arg5: memref<32x64xf32, #tpu.memory_space<vmem>>, %arg6: memref<32x64xf32, #tpu.memory_space<vmem>>, %arg7: memref<32x64xf32, #tpu.memory_space<vmem>>, %arg8: memref<32x64xf32, #tpu.memory_space<vmem>>, %arg9: memref<32x64xf32, #tpu.memory_space<vmem>>, %arg10: memref<9x64x64xbf16, #tpu.memory_space<vmem>>, %arg11: memref<1x64xf32, #tpu.memory_space<vmem>>, %arg12: memref<1x64xf32, #tpu.memory_space<vmem>>, %arg13: memref<32x64xf32, #tpu.memory_space<vmem>>) attributes {dimension_semantics = [#tpu.dimension_semantics<arbitrary>], iteration_bounds = array<i64: 1>, scalar_prefetch = 0 : i64, scratch_operands = 0 : i64, tpu.core_type = #tpu.core_type<tc>, window_params = [{pipeline_mode = #tpu.pipeline_mode<synchronous>, transform_indices = @transform_0, window_bounds = array<i64: 32, 64>}, {pipeline_mode = #tpu.pipeline_mode<synchronous>, transform_indices = @transform_1, window_bounds = array<i64: 32, 64>}, {pipeline_mode = #tpu.pipeline_mode<synchronous>, transform_indices = @transform_2, window_bounds = array<i64: 32, 64>}, {pipeline_mode = #tpu.pipeline_mode<synchronous>, transform_indices = @transform_3, window_bounds = array<i64: 32, 64>}, {pipeline_mode = #tpu.pipeline_mode<synchronous>, transform_indices = @transform_4, window_bounds = array<i64: 32, 64>}, {pipeline_mode = #tpu.pipeline_mode<synchronous>, transform_indices = @transform_5, window_bounds = array<i64: 32, 64>}, {pipeline_mode = #tpu.pipeline_mode<synchronous>, transform_indices = @transform_6, window_bounds = array<i64: 32, 64>}, {pipeline_mode = #tpu.pipeline_mode<synchronous>, transform_indices = @transform_7, window_bounds = array<i64: 32, 64>}, {pipeline_mode = #tpu.pipeline_mode<synchronous>, transform_indices = @transform_8, window_bounds = array<i64: 32, 64>}, {pipeline_mode = #tpu.pipeline_mode<synchronous>, transform_indices = @transform_9, window_bounds = array<i64: 9, 64, 64>}, {pipeline_mode = #tpu.pipeline_mode<synchronous>, transform_indices = @transform_10, window_bounds = array<i64: 1, 64>}, {pipeline_mode = #tpu.pipeline_mode<synchronous>, transform_indices = @transform_11, window_bounds = array<i64: 1, 64>}, {pipeline_mode = #tpu.pipeline_mode<synchronous>, transform_indices = @transform_12, window_bounds = array<i64: 32, 64>}]} {
    %c0 = arith.constant 0 : index
    %c0_0 = arith.constant 0 : index
    %0 = vector.load %arg1[%c0, %c0_0] : memref<32x64xf32, #tpu.memory_space<vmem>>, vector<32x64xf32>
    %1 = arith.truncf %0 : vector<32x64xf32> to vector<32x64xbf16>
    %c0_1 = arith.constant 0 : index
    %c0_2 = arith.constant 0 : index
    %c0_3 = arith.constant 0 : index
    %2 = vector.load %arg10[%c0_1, %c0_2, %c0_3] : memref<9x64x64xbf16, #tpu.memory_space<vmem>>, vector<1x64x64xbf16>
    %3 = vector.shape_cast %2 : vector<1x64x64xbf16> to vector<64x64xbf16>
    %cst = arith.constant dense<0.000000e+00> : vector<32x64xf32>
    %4 = tpu.matmul %1, %3, %cst {dimension_numbers = #tpu.dot_dimension_numbers<[1], [0], [0], [1], [0, 0, 1, 1], [], []>} : vector<32x64xbf16>, vector<64x64xbf16>, vector<32x64xf32> -> vector<32x64xf32>
    %c0_4 = arith.constant 0 : index
    %c0_5 = arith.constant 0 : index
    %5 = vector.load %arg2[%c0_4, %c0_5] : memref<32x64xf32, #tpu.memory_space<vmem>>, vector<32x64xf32>
    %6 = arith.truncf %5 : vector<32x64xf32> to vector<32x64xbf16>
    %c1 = arith.constant 1 : index
    %c0_6 = arith.constant 0 : index
    %c0_7 = arith.constant 0 : index
    %7 = vector.load %arg10[%c1, %c0_6, %c0_7] : memref<9x64x64xbf16, #tpu.memory_space<vmem>>, vector<1x64x64xbf16>
    %8 = vector.shape_cast %7 : vector<1x64x64xbf16> to vector<64x64xbf16>
    %cst_8 = arith.constant dense<0.000000e+00> : vector<32x64xf32>
    %9 = tpu.matmul %6, %8, %cst_8 {dimension_numbers = #tpu.dot_dimension_numbers<[1], [0], [0], [1], [0, 0, 1, 1], [], []>} : vector<32x64xbf16>, vector<64x64xbf16>, vector<32x64xf32> -> vector<32x64xf32>
    %10 = arith.addf %4, %9 : vector<32x64xf32>
    %c0_9 = arith.constant 0 : index
    %c0_10 = arith.constant 0 : index
    %11 = vector.load %arg3[%c0_9, %c0_10] : memref<32x64xf32, #tpu.memory_space<vmem>>, vector<32x64xf32>
    %12 = arith.truncf %11 : vector<32x64xf32> to vector<32x64xbf16>
    %c2 = arith.constant 2 : index
    %c0_11 = arith.constant 0 : index
    %c0_12 = arith.constant 0 : index
    %13 = vector.load %arg10[%c2, %c0_11, %c0_12] : memref<9x64x64xbf16, #tpu.memory_space<vmem>>, vector<1x64x64xbf16>
    %14 = vector.shape_cast %13 : vector<1x64x64xbf16> to vector<64x64xbf16>
    %cst_13 = arith.constant dense<0.000000e+00> : vector<32x64xf32>
    %15 = tpu.matmul %12, %14, %cst_13 {dimension_numbers = #tpu.dot_dimension_numbers<[1], [0], [0], [1], [0, 0, 1, 1], [], []>} : vector<32x64xbf16>, vector<64x64xbf16>, vector<32x64xf32> -> vector<32x64xf32>
    %16 = arith.addf %10, %15 : vector<32x64xf32>
    %c0_14 = arith.constant 0 : index
    %c0_15 = arith.constant 0 : index
    %17 = vector.load %arg4[%c0_14, %c0_15] : memref<32x64xf32, #tpu.memory_space<vmem>>, vector<32x64xf32>
    %18 = arith.truncf %17 : vector<32x64xf32> to vector<32x64xbf16>
    %c3 = arith.constant 3 : index
    %c0_16 = arith.constant 0 : index
    %c0_17 = arith.constant 0 : index
    %19 = vector.load %arg10[%c3, %c0_16, %c0_17] : memref<9x64x64xbf16, #tpu.memory_space<vmem>>, vector<1x64x64xbf16>
    %20 = vector.shape_cast %19 : vector<1x64x64xbf16> to vector<64x64xbf16>
    %cst_18 = arith.constant dense<0.000000e+00> : vector<32x64xf32>
    %21 = tpu.matmul %18, %20, %cst_18 {dimension_numbers = #tpu.dot_dimension_numbers<[1], [0], [0], [1], [0, 0, 1, 1], [], []>} : vector<32x64xbf16>, vector<64x64xbf16>, vector<32x64xf32> -> vector<32x64xf32>
    %22 = arith.addf %16, %21 : vector<32x64xf32>
    %c0_19 = arith.constant 0 : index
    %c0_20 = arith.constant 0 : index
    %23 = vector.load %arg5[%c0_19, %c0_20] : memref<32x64xf32, #tpu.memory_space<vmem>>, vector<32x64xf32>
    %24 = arith.truncf %23 : vector<32x64xf32> to vector<32x64xbf16>
    %c4 = arith.constant 4 : index
    %c0_21 = arith.constant 0 : index
    %c0_22 = arith.constant 0 : index
    %25 = vector.load %arg10[%c4, %c0_21, %c0_22] : memref<9x64x64xbf16, #tpu.memory_space<vmem>>, vector<1x64x64xbf16>
    %26 = vector.shape_cast %25 : vector<1x64x64xbf16> to vector<64x64xbf16>
    %cst_23 = arith.constant dense<0.000000e+00> : vector<32x64xf32>
    %27 = tpu.matmul %24, %26, %cst_23 {dimension_numbers = #tpu.dot_dimension_numbers<[1], [0], [0], [1], [0, 0, 1, 1], [], []>} : vector<32x64xbf16>, vector<64x64xbf16>, vector<32x64xf32> -> vector<32x64xf32>
    %28 = arith.addf %22, %27 : vector<32x64xf32>
    %c0_24 = arith.constant 0 : index
    %c0_25 = arith.constant 0 : index
    %29 = vector.load %arg6[%c0_24, %c0_25] : memref<32x64xf32, #tpu.memory_space<vmem>>, vector<32x64xf32>
    %30 = arith.truncf %29 : vector<32x64xf32> to vector<32x64xbf16>
    %c5 = arith.constant 5 : index
    %c0_26 = arith.constant 0 : index
    %c0_27 = arith.constant 0 : index
    %31 = vector.load %arg10[%c5, %c0_26, %c0_27] : memref<9x64x64xbf16, #tpu.memory_space<vmem>>, vector<1x64x64xbf16>
    %32 = vector.shape_cast %31 : vector<1x64x64xbf16> to vector<64x64xbf16>
    %cst_28 = arith.constant dense<0.000000e+00> : vector<32x64xf32>
    %33 = tpu.matmul %30, %32, %cst_28 {dimension_numbers = #tpu.dot_dimension_numbers<[1], [0], [0], [1], [0, 0, 1, 1], [], []>} : vector<32x64xbf16>, vector<64x64xbf16>, vector<32x64xf32> -> vector<32x64xf32>
    %34 = arith.addf %28, %33 : vector<32x64xf32>
    %c0_29 = arith.constant 0 : index
    %c0_30 = arith.constant 0 : index
    %35 = vector.load %arg7[%c0_29, %c0_30] : memref<32x64xf32, #tpu.memory_space<vmem>>, vector<32x64xf32>
    %36 = arith.truncf %35 : vector<32x64xf32> to vector<32x64xbf16>
    %c6 = arith.constant 6 : index
    %c0_31 = arith.constant 0 : index
    %c0_32 = arith.constant 0 : index
    %37 = vector.load %arg10[%c6, %c0_31, %c0_32] : memref<9x64x64xbf16, #tpu.memory_space<vmem>>, vector<1x64x64xbf16>
    %38 = vector.shape_cast %37 : vector<1x64x64xbf16> to vector<64x64xbf16>
    %cst_33 = arith.constant dense<0.000000e+00> : vector<32x64xf32>
    %39 = tpu.matmul %36, %38, %cst_33 {dimension_numbers = #tpu.dot_dimension_numbers<[1], [0], [0], [1], [0, 0, 1, 1], [], []>} : vector<32x64xbf16>, vector<64x64xbf16>, vector<32x64xf32> -> vector<32x64xf32>
    %40 = arith.addf %34, %39 : vector<32x64xf32>
    %c0_34 = arith.constant 0 : index
    %c0_35 = arith.constant 0 : index
    %41 = vector.load %arg8[%c0_34, %c0_35] : memref<32x64xf32, #tpu.memory_space<vmem>>, vector<32x64xf32>
    %42 = arith.truncf %41 : vector<32x64xf32> to vector<32x64xbf16>
    %c7 = arith.constant 7 : index
    %c0_36 = arith.constant 0 : index
    %c0_37 = arith.constant 0 : index
    %43 = vector.load %arg10[%c7, %c0_36, %c0_37] : memref<9x64x64xbf16, #tpu.memory_space<vmem>>, vector<1x64x64xbf16>
    %44 = vector.shape_cast %43 : vector<1x64x64xbf16> to vector<64x64xbf16>
    %cst_38 = arith.constant dense<0.000000e+00> : vector<32x64xf32>
    %45 = tpu.matmul %42, %44, %cst_38 {dimension_numbers = #tpu.dot_dimension_numbers<[1], [0], [0], [1], [0, 0, 1, 1], [], []>} : vector<32x64xbf16>, vector<64x64xbf16>, vector<32x64xf32> -> vector<32x64xf32>
    %46 = arith.addf %40, %45 : vector<32x64xf32>
    %c0_39 = arith.constant 0 : index
    %c0_40 = arith.constant 0 : index
    %47 = vector.load %arg9[%c0_39, %c0_40] : memref<32x64xf32, #tpu.memory_space<vmem>>, vector<32x64xf32>
    %48 = arith.truncf %47 : vector<32x64xf32> to vector<32x64xbf16>
    %c8 = arith.constant 8 : index
    %c0_41 = arith.constant 0 : index
    %c0_42 = arith.constant 0 : index
    %49 = vector.load %arg10[%c8, %c0_41, %c0_42] : memref<9x64x64xbf16, #tpu.memory_space<vmem>>, vector<1x64x64xbf16>
    %50 = vector.shape_cast %49 : vector<1x64x64xbf16> to vector<64x64xbf16>
    %cst_43 = arith.constant dense<0.000000e+00> : vector<32x64xf32>
    %51 = tpu.matmul %48, %50, %cst_43 {dimension_numbers = #tpu.dot_dimension_numbers<[1], [0], [0], [1], [0, 0, 1, 1], [], []>} : vector<32x64xbf16>, vector<64x64xbf16>, vector<32x64xf32> -> vector<32x64xf32>
    %52 = arith.addf %46, %51 : vector<32x64xf32>
    %cst_44 = arith.constant dense<0.000000e+00> : vector<64xf32>
    %53 = vector.multi_reduction <add>, %52, %cst_44 [0] : vector<32x64xf32> to vector<64xf32>
    %54 = vector.shape_cast %53 : vector<64xf32> to vector<1x64xf32>
    %cst_45 = arith.constant 3.125000e-02 : f32
    %55 = vector.broadcast %cst_45 : f32 to vector<1x64xf32>
    %56 = arith.mulf %54, %55 : vector<1x64xf32>
    %57 = vector.broadcast %56 : vector<1x64xf32> to vector<32x64xf32>
    %58 = arith.subf %52, %57 : vector<32x64xf32>
    %59 = arith.mulf %58, %58 : vector<32x64xf32>
    %cst_46 = arith.constant dense<0.000000e+00> : vector<64xf32>
    %60 = vector.multi_reduction <add>, %59, %cst_46 [0] : vector<32x64xf32> to vector<64xf32>
    %61 = vector.shape_cast %60 : vector<64xf32> to vector<1x64xf32>
    %cst_47 = arith.constant 3.125000e-02 : f32
    %62 = vector.broadcast %cst_47 : f32 to vector<1x64xf32>
    %63 = arith.mulf %61, %62 : vector<1x64xf32>
    %c0_48 = arith.constant 0 : index
    %c0_49 = arith.constant 0 : index
    %64 = vector.load %arg11[%c0_48, %c0_49] : memref<1x64xf32, #tpu.memory_space<vmem>>, vector<1x64xf32>
    %cst_50 = arith.constant 9.99999974E-6 : f32
    %65 = vector.broadcast %cst_50 : f32 to vector<1x64xf32>
    %66 = arith.addf %63, %65 : vector<1x64xf32>
    %67 = math.rsqrt %66 : vector<1x64xf32>
    %68 = arith.mulf %64, %67 : vector<1x64xf32>
    %69 = vector.broadcast %68 : vector<1x64xf32> to vector<32x64xf32>
    %70 = arith.mulf %58, %69 : vector<32x64xf32>
    %c0_51 = arith.constant 0 : index
    %c0_52 = arith.constant 0 : index
    %71 = vector.load %arg12[%c0_51, %c0_52] : memref<1x64xf32, #tpu.memory_space<vmem>>, vector<1x64xf32>
    %72 = vector.broadcast %71 : vector<1x64xf32> to vector<32x64xf32>
    %73 = arith.addf %70, %72 : vector<32x64xf32>
    %cst_53 = arith.constant 0.000000e+00 : f32
    %74 = vector.broadcast %cst_53 : f32 to vector<32x64xf32>
    %75 = arith.maximumf %73, %74 : vector<32x64xf32>
    %c0_54 = arith.constant 0 : index
    %c0_55 = arith.constant 0 : index
    %76 = vector.load %arg13[%c0_54, %c0_55] : memref<32x64xf32, #tpu.memory_space<vmem>>, vector<32x64xf32>
    tpu.vector_store %arg13[%c0_54, %c0_55], %75 {strides = array<i32>} : memref<32x64xf32, #tpu.memory_space<vmem>>, vector<32x64xf32>,
    return
  }
  func.func @transform_0(%arg0: i32) -> (i32, i32) {
    %c0_i32 = arith.constant 0 : i32
    %c0_i32_0 = arith.constant 0 : i32
    %c0_i32_1 = arith.constant 0 : i32
    return %c0_i32, %c0_i32_0 : i32, i32
  }
  func.func @transform_1(%arg0: i32) -> (i32, i32) {
    %c0_i32 = arith.constant 0 : i32
    %c0_i32_0 = arith.constant 0 : i32
    %c0_i32_1 = arith.constant 0 : i32
    return %c0_i32, %c0_i32_0 : i32, i32
  }
  func.func @transform_2(%arg0: i32) -> (i32, i32) {
    %c0_i32 = arith.constant 0 : i32
    %c0_i32_0 = arith.constant 0 : i32
    %c0_i32_1 = arith.constant 0 : i32
    return %c0_i32, %c0_i32_0 : i32, i32
  }
  func.func @transform_3(%arg0: i32) -> (i32, i32) {
    %c0_i32 = arith.constant 0 : i32
    %c0_i32_0 = arith.constant 0 : i32
    %c0_i32_1 = arith.constant 0 : i32
    return %c0_i32, %c0_i32_0 : i32, i32
  }
  func.func @transform_4(%arg0: i32) -> (i32, i32) {
    %c0_i32 = arith.constant 0 : i32
    %c0_i32_0 = arith.constant 0 : i32
    %c0_i32_1 = arith.constant 0 : i32
    return %c0_i32, %c0_i32_0 : i32, i32
  }
  func.func @transform_5(%arg0: i32) -> (i32, i32) {
    %c0_i32 = arith.constant 0 : i32
    %c0_i32_0 = arith.constant 0 : i32
    %c0_i32_1 = arith.constant 0 : i32
    return %c0_i32, %c0_i32_0 : i32, i32
  }
  func.func @transform_6(%arg0: i32) -> (i32, i32) {
    %c0_i32 = arith.constant 0 : i32
    %c0_i32_0 = arith.constant 0 : i32
    %c0_i32_1 = arith.constant 0 : i32
    return %c0_i32, %c0_i32_0 : i32, i32
  }
  func.func @transform_7(%arg0: i32) -> (i32, i32) {
    %c0_i32 = arith.constant 0 : i32
    %c0_i32_0 = arith.constant 0 : i32
    %c0_i32_1 = arith.constant 0 : i32
    return %c0_i32, %c0_i32_0 : i32, i32
  }
  func.func @transform_8(%arg0: i32) -> (i32, i32) {
    %c0_i32 = arith.constant 0 : i32
    %c0_i32_0 = arith.constant 0 : i32
    %c0_i32_1 = arith.constant 0 : i32
    return %c0_i32, %c0_i32_0 : i32, i32
  }
  func.func @transform_9(%arg0: i32) -> (i32, i32, i32) {
    %c0_i32 = arith.constant 0 : i32
    %c0_i32_0 = arith.constant 0 : i32
    %c0_i32_1 = arith.constant 0 : i32
    %c0_i32_2 = arith.constant 0 : i32
    return %c0_i32, %c0_i32_0, %c0_i32_1 : i32, i32, i32
  }
  func.func @transform_10(%arg0: i32) -> (i32, i32) {
    %c0_i32 = arith.constant 0 : i32
    %c0_i32_0 = arith.constant 0 : i32
    %c0_i32_1 = arith.constant 0 : i32
    return %c0_i32, %c0_i32_0 : i32, i32
  }
  func.func @transform_11(%arg0: i32) -> (i32, i32) {
    %c0_i32 = arith.constant 0 : i32
    %c0_i32_0 = arith.constant 0 : i32
    %c0_i32_1 = arith.constant 0 : i32
    return %c0_i32, %c0_i32_0 : i32, i32
  }
  func.func @transform_12(%arg0: i32) -> (i32, i32) {
    %c0_i32 = arith.constant 0 : i32
    %c0_i32_0 = arith.constant 0 : i32
    %c0_i32_1 = arith.constant 0 : i32
    return %c0_i32, %c0_i32_0 : i32, i32
  }
}

module attributes {stable_mosaic.version = 11 : i64} {
  func.func @_conv_bn_add_relu_kernel(%arg0: i32, %arg1: memref<32x64xf32, #tpu.memory_space<vmem>>, %arg2: memref<32x64xf32, #tpu.memory_space<vmem>>, %arg3: memref<32x64xf32, #tpu.memory_space<vmem>>, %arg4: memref<32x64xf32, #tpu.memory_space<vmem>>, %arg5: memref<32x64xf32, #tpu.memory_space<vmem>>, %arg6: memref<32x64xf32, #tpu.memory_space<vmem>>, %arg7: memref<32x64xf32, #tpu.memory_space<vmem>>, %arg8: memref<32x64xf32, #tpu.memory_space<vmem>>, %arg9: memref<32x64xf32, #tpu.memory_space<vmem>>, %arg10: memref<9x64x64xbf16, #tpu.memory_space<vmem>>, %arg11: memref<1x64xf32, #tpu.memory_space<vmem>>, %arg12: memref<1x64xf32, #tpu.memory_space<vmem>>, %arg13: memref<32x64xf32, #tpu.memory_space<vmem>>, %arg14: memref<32x64xf32, #tpu.memory_space<vmem>>) attributes {dimension_semantics = [#tpu.dimension_semantics<arbitrary>], iteration_bounds = array<i64: 1>, scalar_prefetch = 0 : i64, scratch_operands = 0 : i64, tpu.core_type = #tpu.core_type<tc>, window_params = [{pipeline_mode = #tpu.pipeline_mode<synchronous>, transform_indices = @transform_0, window_bounds = array<i64: 32, 64>}, {pipeline_mode = #tpu.pipeline_mode<synchronous>, transform_indices = @transform_1, window_bounds = array<i64: 32, 64>}, {pipeline_mode = #tpu.pipeline_mode<synchronous>, transform_indices = @transform_2, window_bounds = array<i64: 32, 64>}, {pipeline_mode = #tpu.pipeline_mode<synchronous>, transform_indices = @transform_3, window_bounds = array<i64: 32, 64>}, {pipeline_mode = #tpu.pipeline_mode<synchronous>, transform_indices = @transform_4, window_bounds = array<i64: 32, 64>}, {pipeline_mode = #tpu.pipeline_mode<synchronous>, transform_indices = @transform_5, window_bounds = array<i64: 32, 64>}, {pipeline_mode = #tpu.pipeline_mode<synchronous>, transform_indices = @transform_6, window_bounds = array<i64: 32, 64>}, {pipeline_mode = #tpu.pipeline_mode<synchronous>, transform_indices = @transform_7, window_bounds = array<i64: 32, 64>}, {pipeline_mode = #tpu.pipeline_mode<synchronous>, transform_indices = @transform_8, window_bounds = array<i64: 32, 64>}, {pipeline_mode = #tpu.pipeline_mode<synchronous>, transform_indices = @transform_9, window_bounds = array<i64: 9, 64, 64>}, {pipeline_mode = #tpu.pipeline_mode<synchronous>, transform_indices = @transform_10, window_bounds = array<i64: 1, 64>}, {pipeline_mode = #tpu.pipeline_mode<synchronous>, transform_indices = @transform_11, window_bounds = array<i64: 1, 64>}, {pipeline_mode = #tpu.pipeline_mode<synchronous>, transform_indices = @transform_12, window_bounds = array<i64: 32, 64>}, {pipeline_mode = #tpu.pipeline_mode<synchronous>, transform_indices = @transform_13, window_bounds = array<i64: 32, 64>}]} {
    %c0 = arith.constant 0 : index
    %c0_0 = arith.constant 0 : index
    %0 = vector.load %arg1[%c0, %c0_0] : memref<32x64xf32, #tpu.memory_space<vmem>>, vector<32x64xf32>
    %1 = arith.truncf %0 : vector<32x64xf32> to vector<32x64xbf16>
    %c0_1 = arith.constant 0 : index
    %c0_2 = arith.constant 0 : index
    %c0_3 = arith.constant 0 : index
    %2 = vector.load %arg10[%c0_1, %c0_2, %c0_3] : memref<9x64x64xbf16, #tpu.memory_space<vmem>>, vector<1x64x64xbf16>
    %3 = vector.shape_cast %2 : vector<1x64x64xbf16> to vector<64x64xbf16>
    %cst = arith.constant dense<0.000000e+00> : vector<32x64xf32>
    %4 = tpu.matmul %1, %3, %cst {dimension_numbers = #tpu.dot_dimension_numbers<[1], [0], [0], [1], [0, 0, 1, 1], [], []>} : vector<32x64xbf16>, vector<64x64xbf16>, vector<32x64xf32> -> vector<32x64xf32>
    %c0_4 = arith.constant 0 : index
    %c0_5 = arith.constant 0 : index
    %5 = vector.load %arg2[%c0_4, %c0_5] : memref<32x64xf32, #tpu.memory_space<vmem>>, vector<32x64xf32>
    %6 = arith.truncf %5 : vector<32x64xf32> to vector<32x64xbf16>
    %c1 = arith.constant 1 : index
    %c0_6 = arith.constant 0 : index
    %c0_7 = arith.constant 0 : index
    %7 = vector.load %arg10[%c1, %c0_6, %c0_7] : memref<9x64x64xbf16, #tpu.memory_space<vmem>>, vector<1x64x64xbf16>
    %8 = vector.shape_cast %7 : vector<1x64x64xbf16> to vector<64x64xbf16>
    %cst_8 = arith.constant dense<0.000000e+00> : vector<32x64xf32>
    %9 = tpu.matmul %6, %8, %cst_8 {dimension_numbers = #tpu.dot_dimension_numbers<[1], [0], [0], [1], [0, 0, 1, 1], [], []>} : vector<32x64xbf16>, vector<64x64xbf16>, vector<32x64xf32> -> vector<32x64xf32>
    %10 = arith.addf %4, %9 : vector<32x64xf32>
    %c0_9 = arith.constant 0 : index
    %c0_10 = arith.constant 0 : index
    %11 = vector.load %arg3[%c0_9, %c0_10] : memref<32x64xf32, #tpu.memory_space<vmem>>, vector<32x64xf32>
    %12 = arith.truncf %11 : vector<32x64xf32> to vector<32x64xbf16>
    %c2 = arith.constant 2 : index
    %c0_11 = arith.constant 0 : index
    %c0_12 = arith.constant 0 : index
    %13 = vector.load %arg10[%c2, %c0_11, %c0_12] : memref<9x64x64xbf16, #tpu.memory_space<vmem>>, vector<1x64x64xbf16>
    %14 = vector.shape_cast %13 : vector<1x64x64xbf16> to vector<64x64xbf16>
    %cst_13 = arith.constant dense<0.000000e+00> : vector<32x64xf32>
    %15 = tpu.matmul %12, %14, %cst_13 {dimension_numbers = #tpu.dot_dimension_numbers<[1], [0], [0], [1], [0, 0, 1, 1], [], []>} : vector<32x64xbf16>, vector<64x64xbf16>, vector<32x64xf32> -> vector<32x64xf32>
    %16 = arith.addf %10, %15 : vector<32x64xf32>
    %c0_14 = arith.constant 0 : index
    %c0_15 = arith.constant 0 : index
    %17 = vector.load %arg4[%c0_14, %c0_15] : memref<32x64xf32, #tpu.memory_space<vmem>>, vector<32x64xf32>
    %18 = arith.truncf %17 : vector<32x64xf32> to vector<32x64xbf16>
    %c3 = arith.constant 3 : index
    %c0_16 = arith.constant 0 : index
    %c0_17 = arith.constant 0 : index
    %19 = vector.load %arg10[%c3, %c0_16, %c0_17] : memref<9x64x64xbf16, #tpu.memory_space<vmem>>, vector<1x64x64xbf16>
    %20 = vector.shape_cast %19 : vector<1x64x64xbf16> to vector<64x64xbf16>
    %cst_18 = arith.constant dense<0.000000e+00> : vector<32x64xf32>
    %21 = tpu.matmul %18, %20, %cst_18 {dimension_numbers = #tpu.dot_dimension_numbers<[1], [0], [0], [1], [0, 0, 1, 1], [], []>} : vector<32x64xbf16>, vector<64x64xbf16>, vector<32x64xf32> -> vector<32x64xf32>
    %22 = arith.addf %16, %21 : vector<32x64xf32>
    %c0_19 = arith.constant 0 : index
    %c0_20 = arith.constant 0 : index
    %23 = vector.load %arg5[%c0_19, %c0_20] : memref<32x64xf32, #tpu.memory_space<vmem>>, vector<32x64xf32>
    %24 = arith.truncf %23 : vector<32x64xf32> to vector<32x64xbf16>
    %c4 = arith.constant 4 : index
    %c0_21 = arith.constant 0 : index
    %c0_22 = arith.constant 0 : index
    %25 = vector.load %arg10[%c4, %c0_21, %c0_22] : memref<9x64x64xbf16, #tpu.memory_space<vmem>>, vector<1x64x64xbf16>
    %26 = vector.shape_cast %25 : vector<1x64x64xbf16> to vector<64x64xbf16>
    %cst_23 = arith.constant dense<0.000000e+00> : vector<32x64xf32>
    %27 = tpu.matmul %24, %26, %cst_23 {dimension_numbers = #tpu.dot_dimension_numbers<[1], [0], [0], [1], [0, 0, 1, 1], [], []>} : vector<32x64xbf16>, vector<64x64xbf16>, vector<32x64xf32> -> vector<32x64xf32>
    %28 = arith.addf %22, %27 : vector<32x64xf32>
    %c0_24 = arith.constant 0 : index
    %c0_25 = arith.constant 0 : index
    %29 = vector.load %arg6[%c0_24, %c0_25] : memref<32x64xf32, #tpu.memory_space<vmem>>, vector<32x64xf32>
    %30 = arith.truncf %29 : vector<32x64xf32> to vector<32x64xbf16>
    %c5 = arith.constant 5 : index
    %c0_26 = arith.constant 0 : index
    %c0_27 = arith.constant 0 : index
    %31 = vector.load %arg10[%c5, %c0_26, %c0_27] : memref<9x64x64xbf16, #tpu.memory_space<vmem>>, vector<1x64x64xbf16>
    %32 = vector.shape_cast %31 : vector<1x64x64xbf16> to vector<64x64xbf16>
    %cst_28 = arith.constant dense<0.000000e+00> : vector<32x64xf32>
    %33 = tpu.matmul %30, %32, %cst_28 {dimension_numbers = #tpu.dot_dimension_numbers<[1], [0], [0], [1], [0, 0, 1, 1], [], []>} : vector<32x64xbf16>, vector<64x64xbf16>, vector<32x64xf32> -> vector<32x64xf32>
    %34 = arith.addf %28, %33 : vector<32x64xf32>
    %c0_29 = arith.constant 0 : index
    %c0_30 = arith.constant 0 : index
    %35 = vector.load %arg7[%c0_29, %c0_30] : memref<32x64xf32, #tpu.memory_space<vmem>>, vector<32x64xf32>
    %36 = arith.truncf %35 : vector<32x64xf32> to vector<32x64xbf16>
    %c6 = arith.constant 6 : index
    %c0_31 = arith.constant 0 : index
    %c0_32 = arith.constant 0 : index
    %37 = vector.load %arg10[%c6, %c0_31, %c0_32] : memref<9x64x64xbf16, #tpu.memory_space<vmem>>, vector<1x64x64xbf16>
    %38 = vector.shape_cast %37 : vector<1x64x64xbf16> to vector<64x64xbf16>
    %cst_33 = arith.constant dense<0.000000e+00> : vector<32x64xf32>
    %39 = tpu.matmul %36, %38, %cst_33 {dimension_numbers = #tpu.dot_dimension_numbers<[1], [0], [0], [1], [0, 0, 1, 1], [], []>} : vector<32x64xbf16>, vector<64x64xbf16>, vector<32x64xf32> -> vector<32x64xf32>
    %40 = arith.addf %34, %39 : vector<32x64xf32>
    %c0_34 = arith.constant 0 : index
    %c0_35 = arith.constant 0 : index
    %41 = vector.load %arg8[%c0_34, %c0_35] : memref<32x64xf32, #tpu.memory_space<vmem>>, vector<32x64xf32>
    %42 = arith.truncf %41 : vector<32x64xf32> to vector<32x64xbf16>
    %c7 = arith.constant 7 : index
    %c0_36 = arith.constant 0 : index
    %c0_37 = arith.constant 0 : index
    %43 = vector.load %arg10[%c7, %c0_36, %c0_37] : memref<9x64x64xbf16, #tpu.memory_space<vmem>>, vector<1x64x64xbf16>
    %44 = vector.shape_cast %43 : vector<1x64x64xbf16> to vector<64x64xbf16>
    %cst_38 = arith.constant dense<0.000000e+00> : vector<32x64xf32>
    %45 = tpu.matmul %42, %44, %cst_38 {dimension_numbers = #tpu.dot_dimension_numbers<[1], [0], [0], [1], [0, 0, 1, 1], [], []>} : vector<32x64xbf16>, vector<64x64xbf16>, vector<32x64xf32> -> vector<32x64xf32>
    %46 = arith.addf %40, %45 : vector<32x64xf32>
    %c0_39 = arith.constant 0 : index
    %c0_40 = arith.constant 0 : index
    %47 = vector.load %arg9[%c0_39, %c0_40] : memref<32x64xf32, #tpu.memory_space<vmem>>, vector<32x64xf32>
    %48 = arith.truncf %47 : vector<32x64xf32> to vector<32x64xbf16>
    %c8 = arith.constant 8 : index
    %c0_41 = arith.constant 0 : index
    %c0_42 = arith.constant 0 : index
    %49 = vector.load %arg10[%c8, %c0_41, %c0_42] : memref<9x64x64xbf16, #tpu.memory_space<vmem>>, vector<1x64x64xbf16>
    %50 = vector.shape_cast %49 : vector<1x64x64xbf16> to vector<64x64xbf16>
    %cst_43 = arith.constant dense<0.000000e+00> : vector<32x64xf32>
    %51 = tpu.matmul %48, %50, %cst_43 {dimension_numbers = #tpu.dot_dimension_numbers<[1], [0], [0], [1], [0, 0, 1, 1], [], []>} : vector<32x64xbf16>, vector<64x64xbf16>, vector<32x64xf32> -> vector<32x64xf32>
    %52 = arith.addf %46, %51 : vector<32x64xf32>
    %cst_44 = arith.constant dense<0.000000e+00> : vector<64xf32>
    %53 = vector.multi_reduction <add>, %52, %cst_44 [0] : vector<32x64xf32> to vector<64xf32>
    %54 = vector.shape_cast %53 : vector<64xf32> to vector<1x64xf32>
    %cst_45 = arith.constant 3.125000e-02 : f32
    %55 = vector.broadcast %cst_45 : f32 to vector<1x64xf32>
    %56 = arith.mulf %54, %55 : vector<1x64xf32>
    %57 = vector.broadcast %56 : vector<1x64xf32> to vector<32x64xf32>
    %58 = arith.subf %52, %57 : vector<32x64xf32>
    %59 = arith.mulf %58, %58 : vector<32x64xf32>
    %cst_46 = arith.constant dense<0.000000e+00> : vector<64xf32>
    %60 = vector.multi_reduction <add>, %59, %cst_46 [0] : vector<32x64xf32> to vector<64xf32>
    %61 = vector.shape_cast %60 : vector<64xf32> to vector<1x64xf32>
    %cst_47 = arith.constant 3.125000e-02 : f32
    %62 = vector.broadcast %cst_47 : f32 to vector<1x64xf32>
    %63 = arith.mulf %61, %62 : vector<1x64xf32>
    %c0_48 = arith.constant 0 : index
    %c0_49 = arith.constant 0 : index
    %64 = vector.load %arg11[%c0_48, %c0_49] : memref<1x64xf32, #tpu.memory_space<vmem>>, vector<1x64xf32>
    %cst_50 = arith.constant 9.99999974E-6 : f32
    %65 = vector.broadcast %cst_50 : f32 to vector<1x64xf32>
    %66 = arith.addf %63, %65 : vector<1x64xf32>
    %67 = math.rsqrt %66 : vector<1x64xf32>
    %68 = arith.mulf %64, %67 : vector<1x64xf32>
    %69 = vector.broadcast %68 : vector<1x64xf32> to vector<32x64xf32>
    %70 = arith.mulf %58, %69 : vector<32x64xf32>
    %c0_51 = arith.constant 0 : index
    %c0_52 = arith.constant 0 : index
    %71 = vector.load %arg12[%c0_51, %c0_52] : memref<1x64xf32, #tpu.memory_space<vmem>>, vector<1x64xf32>
    %72 = vector.broadcast %71 : vector<1x64xf32> to vector<32x64xf32>
    %73 = arith.addf %70, %72 : vector<32x64xf32>
    %c0_53 = arith.constant 0 : index
    %c0_54 = arith.constant 0 : index
    %74 = vector.load %arg13[%c0_53, %c0_54] : memref<32x64xf32, #tpu.memory_space<vmem>>, vector<32x64xf32>
    %75 = arith.addf %73, %74 : vector<32x64xf32>
    %cst_55 = arith.constant 0.000000e+00 : f32
    %76 = vector.broadcast %cst_55 : f32 to vector<32x64xf32>
    %77 = arith.maximumf %75, %76 : vector<32x64xf32>
    %c0_56 = arith.constant 0 : index
    %c0_57 = arith.constant 0 : index
    %78 = vector.load %arg14[%c0_56, %c0_57] : memref<32x64xf32, #tpu.memory_space<vmem>>, vector<32x64xf32>
    tpu.vector_store %arg14[%c0_56, %c0_57], %77 {strides = array<i32>} : memref<32x64xf32, #tpu.memory_space<vmem>>, vector<32x64xf32>,
    return
  }
  func.func @transform_0(%arg0: i32) -> (i32, i32) {
    %c0_i32 = arith.constant 0 : i32
    %c0_i32_0 = arith.constant 0 : i32
    %c0_i32_1 = arith.constant 0 : i32
    return %c0_i32, %c0_i32_0 : i32, i32
  }
  func.func @transform_1(%arg0: i32) -> (i32, i32) {
    %c0_i32 = arith.constant 0 : i32
    %c0_i32_0 = arith.constant 0 : i32
    %c0_i32_1 = arith.constant 0 : i32
    return %c0_i32, %c0_i32_0 : i32, i32
  }
  func.func @transform_2(%arg0: i32) -> (i32, i32) {
    %c0_i32 = arith.constant 0 : i32
    %c0_i32_0 = arith.constant 0 : i32
    %c0_i32_1 = arith.constant 0 : i32
    return %c0_i32, %c0_i32_0 : i32, i32
  }
  func.func @transform_3(%arg0: i32) -> (i32, i32) {
    %c0_i32 = arith.constant 0 : i32
    %c0_i32_0 = arith.constant 0 : i32
    %c0_i32_1 = arith.constant 0 : i32
    return %c0_i32, %c0_i32_0 : i32, i32
  }
  func.func @transform_4(%arg0: i32) -> (i32, i32) {
    %c0_i32 = arith.constant 0 : i32
    %c0_i32_0 = arith.constant 0 : i32
    %c0_i32_1 = arith.constant 0 : i32
    return %c0_i32, %c0_i32_0 : i32, i32
  }
  func.func @transform_5(%arg0: i32) -> (i32, i32) {
    %c0_i32 = arith.constant 0 : i32
    %c0_i32_0 = arith.constant 0 : i32
    %c0_i32_1 = arith.constant 0 : i32
    return %c0_i32, %c0_i32_0 : i32, i32
  }
  func.func @transform_6(%arg0: i32) -> (i32, i32) {
    %c0_i32 = arith.constant 0 : i32
    %c0_i32_0 = arith.constant 0 : i32
    %c0_i32_1 = arith.constant 0 : i32
    return %c0_i32, %c0_i32_0 : i32, i32
  }
  func.func @transform_7(%arg0: i32) -> (i32, i32) {
    %c0_i32 = arith.constant 0 : i32
    %c0_i32_0 = arith.constant 0 : i32
    %c0_i32_1 = arith.constant 0 : i32
    return %c0_i32, %c0_i32_0 : i32, i32
  }
  func.func @transform_8(%arg0: i32) -> (i32, i32) {
    %c0_i32 = arith.constant 0 : i32
    %c0_i32_0 = arith.constant 0 : i32
    %c0_i32_1 = arith.constant 0 : i32
    return %c0_i32, %c0_i32_0 : i32, i32
  }
  func.func @transform_9(%arg0: i32) -> (i32, i32, i32) {
    %c0_i32 = arith.constant 0 : i32
    %c0_i32_0 = arith.constant 0 : i32
    %c0_i32_1 = arith.constant 0 : i32
    %c0_i32_2 = arith.constant 0 : i32
    return %c0_i32, %c0_i32_0, %c0_i32_1 : i32, i32, i32
  }
  func.func @transform_10(%arg0: i32) -> (i32, i32) {
    %c0_i32 = arith.constant 0 : i32
    %c0_i32_0 = arith.constant 0 : i32
    %c0_i32_1 = arith.constant 0 : i32
    return %c0_i32, %c0_i32_0 : i32, i32
  }
  func.func @transform_11(%arg0: i32) -> (i32, i32) {
    %c0_i32 = arith.constant 0 : i32
    %c0_i32_0 = arith.constant 0 : i32
    %c0_i32_1 = arith.constant 0 : i32
    return %c0_i32, %c0_i32_0 : i32, i32
  }
  func.func @transform_12(%arg0: i32) -> (i32, i32) {
    %c0_i32 = arith.constant 0 : i32
    %c0_i32_0 = arith.constant 0 : i32
    %c0_i32_1 = arith.constant 0 : i32
    return %c0_i32, %c0_i32_0 : i32, i32
  }
  func.func @transform_13(%arg0: i32) -> (i32, i32) {
    %c0_i32 = arith.constant 0 : i32
    %c0_i32_0 = arith.constant 0 : i32
    %c0_i32_1 = arith.constant 0 : i32
    return %c0_i32, %c0_i32_0 : i32, i32
  }
}

module attributes {stable_mosaic.version = 11 : i64} {
  func.func @_conv_bn_split_relu_kernel(%arg0: i32, %arg1: memref<8x64xf32, #tpu.memory_space<vmem>>, %arg2: memref<8x64xf32, #tpu.memory_space<vmem>>, %arg3: memref<8x64xf32, #tpu.memory_space<vmem>>, %arg4: memref<8x64xf32, #tpu.memory_space<vmem>>, %arg5: memref<8x64xf32, #tpu.memory_space<vmem>>, %arg6: memref<8x64xf32, #tpu.memory_space<vmem>>, %arg7: memref<8x64xf32, #tpu.memory_space<vmem>>, %arg8: memref<8x64xf32, #tpu.memory_space<vmem>>, %arg9: memref<8x64xf32, #tpu.memory_space<vmem>>, %arg10: memref<9x64x256xbf16, #tpu.memory_space<vmem>>, %arg11: memref<1x256xf32, #tpu.memory_space<vmem>>, %arg12: memref<1x256xf32, #tpu.memory_space<vmem>>, %arg13: memref<8x128xf32, #tpu.memory_space<vmem>>, %arg14: memref<8x128xf32, #tpu.memory_space<vmem>>) attributes {dimension_semantics = [#tpu.dimension_semantics<arbitrary>], iteration_bounds = array<i64: 1>, scalar_prefetch = 0 : i64, scratch_operands = 0 : i64, tpu.core_type = #tpu.core_type<tc>, window_params = [{pipeline_mode = #tpu.pipeline_mode<synchronous>, transform_indices = @transform_0, window_bounds = array<i64: 8, 64>}, {pipeline_mode = #tpu.pipeline_mode<synchronous>, transform_indices = @transform_1, window_bounds = array<i64: 8, 64>}, {pipeline_mode = #tpu.pipeline_mode<synchronous>, transform_indices = @transform_2, window_bounds = array<i64: 8, 64>}, {pipeline_mode = #tpu.pipeline_mode<synchronous>, transform_indices = @transform_3, window_bounds = array<i64: 8, 64>}, {pipeline_mode = #tpu.pipeline_mode<synchronous>, transform_indices = @transform_4, window_bounds = array<i64: 8, 64>}, {pipeline_mode = #tpu.pipeline_mode<synchronous>, transform_indices = @transform_5, window_bounds = array<i64: 8, 64>}, {pipeline_mode = #tpu.pipeline_mode<synchronous>, transform_indices = @transform_6, window_bounds = array<i64: 8, 64>}, {pipeline_mode = #tpu.pipeline_mode<synchronous>, transform_indices = @transform_7, window_bounds = array<i64: 8, 64>}, {pipeline_mode = #tpu.pipeline_mode<synchronous>, transform_indices = @transform_8, window_bounds = array<i64: 8, 64>}, {pipeline_mode = #tpu.pipeline_mode<synchronous>, transform_indices = @transform_9, window_bounds = array<i64: 9, 64, 256>}, {pipeline_mode = #tpu.pipeline_mode<synchronous>, transform_indices = @transform_10, window_bounds = array<i64: 1, 256>}, {pipeline_mode = #tpu.pipeline_mode<synchronous>, transform_indices = @transform_11, window_bounds = array<i64: 1, 256>}, {pipeline_mode = #tpu.pipeline_mode<synchronous>, transform_indices = @transform_12, window_bounds = array<i64: 8, 128>}, {pipeline_mode = #tpu.pipeline_mode<synchronous>, transform_indices = @transform_13, window_bounds = array<i64: 8, 128>}]} {
    %c0 = arith.constant 0 : index
    %c0_0 = arith.constant 0 : index
    %0 = vector.load %arg1[%c0, %c0_0] : memref<8x64xf32, #tpu.memory_space<vmem>>, vector<8x64xf32>
    %1 = arith.truncf %0 : vector<8x64xf32> to vector<8x64xbf16>
    %c0_1 = arith.constant 0 : index
    %c0_2 = arith.constant 0 : index
    %c0_3 = arith.constant 0 : index
    %2 = vector.load %arg10[%c0_1, %c0_2, %c0_3] : memref<9x64x256xbf16, #tpu.memory_space<vmem>>, vector<1x64x256xbf16>
    %3 = vector.shape_cast %2 : vector<1x64x256xbf16> to vector<64x256xbf16>
    %cst = arith.constant dense<0.000000e+00> : vector<8x256xf32>
    %4 = tpu.matmul %1, %3, %cst {dimension_numbers = #tpu.dot_dimension_numbers<[1], [0], [0], [1], [0, 0, 1, 1], [], []>} : vector<8x64xbf16>, vector<64x256xbf16>, vector<8x256xf32> -> vector<8x256xf32>
    %c0_4 = arith.constant 0 : index
    %c0_5 = arith.constant 0 : index
    %5 = vector.load %arg2[%c0_4, %c0_5] : memref<8x64xf32, #tpu.memory_space<vmem>>, vector<8x64xf32>
    %6 = arith.truncf %5 : vector<8x64xf32> to vector<8x64xbf16>
    %c1 = arith.constant 1 : index
    %c0_6 = arith.constant 0 : index
    %c0_7 = arith.constant 0 : index
    %7 = vector.load %arg10[%c1, %c0_6, %c0_7] : memref<9x64x256xbf16, #tpu.memory_space<vmem>>, vector<1x64x256xbf16>
    %8 = vector.shape_cast %7 : vector<1x64x256xbf16> to vector<64x256xbf16>
    %cst_8 = arith.constant dense<0.000000e+00> : vector<8x256xf32>
    %9 = tpu.matmul %6, %8, %cst_8 {dimension_numbers = #tpu.dot_dimension_numbers<[1], [0], [0], [1], [0, 0, 1, 1], [], []>} : vector<8x64xbf16>, vector<64x256xbf16>, vector<8x256xf32> -> vector<8x256xf32>
    %10 = arith.addf %4, %9 : vector<8x256xf32>
    %c0_9 = arith.constant 0 : index
    %c0_10 = arith.constant 0 : index
    %11 = vector.load %arg3[%c0_9, %c0_10] : memref<8x64xf32, #tpu.memory_space<vmem>>, vector<8x64xf32>
    %12 = arith.truncf %11 : vector<8x64xf32> to vector<8x64xbf16>
    %c2 = arith.constant 2 : index
    %c0_11 = arith.constant 0 : index
    %c0_12 = arith.constant 0 : index
    %13 = vector.load %arg10[%c2, %c0_11, %c0_12] : memref<9x64x256xbf16, #tpu.memory_space<vmem>>, vector<1x64x256xbf16>
    %14 = vector.shape_cast %13 : vector<1x64x256xbf16> to vector<64x256xbf16>
    %cst_13 = arith.constant dense<0.000000e+00> : vector<8x256xf32>
    %15 = tpu.matmul %12, %14, %cst_13 {dimension_numbers = #tpu.dot_dimension_numbers<[1], [0], [0], [1], [0, 0, 1, 1], [], []>} : vector<8x64xbf16>, vector<64x256xbf16>, vector<8x256xf32> -> vector<8x256xf32>
    %16 = arith.addf %10, %15 : vector<8x256xf32>
    %c0_14 = arith.constant 0 : index
    %c0_15 = arith.constant 0 : index
    %17 = vector.load %arg4[%c0_14, %c0_15] : memref<8x64xf32, #tpu.memory_space<vmem>>, vector<8x64xf32>
    %18 = arith.truncf %17 : vector<8x64xf32> to vector<8x64xbf16>
    %c3 = arith.constant 3 : index
    %c0_16 = arith.constant 0 : index
    %c0_17 = arith.constant 0 : index
    %19 = vector.load %arg10[%c3, %c0_16, %c0_17] : memref<9x64x256xbf16, #tpu.memory_space<vmem>>, vector<1x64x256xbf16>
    %20 = vector.shape_cast %19 : vector<1x64x256xbf16> to vector<64x256xbf16>
    %cst_18 = arith.constant dense<0.000000e+00> : vector<8x256xf32>
    %21 = tpu.matmul %18, %20, %cst_18 {dimension_numbers = #tpu.dot_dimension_numbers<[1], [0], [0], [1], [0, 0, 1, 1], [], []>} : vector<8x64xbf16>, vector<64x256xbf16>, vector<8x256xf32> -> vector<8x256xf32>
    %22 = arith.addf %16, %21 : vector<8x256xf32>
    %c0_19 = arith.constant 0 : index
    %c0_20 = arith.constant 0 : index
    %23 = vector.load %arg5[%c0_19, %c0_20] : memref<8x64xf32, #tpu.memory_space<vmem>>, vector<8x64xf32>
    %24 = arith.truncf %23 : vector<8x64xf32> to vector<8x64xbf16>
    %c4 = arith.constant 4 : index
    %c0_21 = arith.constant 0 : index
    %c0_22 = arith.constant 0 : index
    %25 = vector.load %arg10[%c4, %c0_21, %c0_22] : memref<9x64x256xbf16, #tpu.memory_space<vmem>>, vector<1x64x256xbf16>
    %26 = vector.shape_cast %25 : vector<1x64x256xbf16> to vector<64x256xbf16>
    %cst_23 = arith.constant dense<0.000000e+00> : vector<8x256xf32>
    %27 = tpu.matmul %24, %26, %cst_23 {dimension_numbers = #tpu.dot_dimension_numbers<[1], [0], [0], [1], [0, 0, 1, 1], [], []>} : vector<8x64xbf16>, vector<64x256xbf16>, vector<8x256xf32> -> vector<8x256xf32>
    %28 = arith.addf %22, %27 : vector<8x256xf32>
    %c0_24 = arith.constant 0 : index
    %c0_25 = arith.constant 0 : index
    %29 = vector.load %arg6[%c0_24, %c0_25] : memref<8x64xf32, #tpu.memory_space<vmem>>, vector<8x64xf32>
    %30 = arith.truncf %29 : vector<8x64xf32> to vector<8x64xbf16>
    %c5 = arith.constant 5 : index
    %c0_26 = arith.constant 0 : index
    %c0_27 = arith.constant 0 : index
    %31 = vector.load %arg10[%c5, %c0_26, %c0_27] : memref<9x64x256xbf16, #tpu.memory_space<vmem>>, vector<1x64x256xbf16>
    %32 = vector.shape_cast %31 : vector<1x64x256xbf16> to vector<64x256xbf16>
    %cst_28 = arith.constant dense<0.000000e+00> : vector<8x256xf32>
    %33 = tpu.matmul %30, %32, %cst_28 {dimension_numbers = #tpu.dot_dimension_numbers<[1], [0], [0], [1], [0, 0, 1, 1], [], []>} : vector<8x64xbf16>, vector<64x256xbf16>, vector<8x256xf32> -> vector<8x256xf32>
    %34 = arith.addf %28, %33 : vector<8x256xf32>
    %c0_29 = arith.constant 0 : index
    %c0_30 = arith.constant 0 : index
    %35 = vector.load %arg7[%c0_29, %c0_30] : memref<8x64xf32, #tpu.memory_space<vmem>>, vector<8x64xf32>
    %36 = arith.truncf %35 : vector<8x64xf32> to vector<8x64xbf16>
    %c6 = arith.constant 6 : index
    %c0_31 = arith.constant 0 : index
    %c0_32 = arith.constant 0 : index
    %37 = vector.load %arg10[%c6, %c0_31, %c0_32] : memref<9x64x256xbf16, #tpu.memory_space<vmem>>, vector<1x64x256xbf16>
    %38 = vector.shape_cast %37 : vector<1x64x256xbf16> to vector<64x256xbf16>
    %cst_33 = arith.constant dense<0.000000e+00> : vector<8x256xf32>
    %39 = tpu.matmul %36, %38, %cst_33 {dimension_numbers = #tpu.dot_dimension_numbers<[1], [0], [0], [1], [0, 0, 1, 1], [], []>} : vector<8x64xbf16>, vector<64x256xbf16>, vector<8x256xf32> -> vector<8x256xf32>
    %40 = arith.addf %34, %39 : vector<8x256xf32>
    %c0_34 = arith.constant 0 : index
    %c0_35 = arith.constant 0 : index
    %41 = vector.load %arg8[%c0_34, %c0_35] : memref<8x64xf32, #tpu.memory_space<vmem>>, vector<8x64xf32>
    %42 = arith.truncf %41 : vector<8x64xf32> to vector<8x64xbf16>
    %c7 = arith.constant 7 : index
    %c0_36 = arith.constant 0 : index
    %c0_37 = arith.constant 0 : index
    %43 = vector.load %arg10[%c7, %c0_36, %c0_37] : memref<9x64x256xbf16, #tpu.memory_space<vmem>>, vector<1x64x256xbf16>
    %44 = vector.shape_cast %43 : vector<1x64x256xbf16> to vector<64x256xbf16>
    %cst_38 = arith.constant dense<0.000000e+00> : vector<8x256xf32>
    %45 = tpu.matmul %42, %44, %cst_38 {dimension_numbers = #tpu.dot_dimension_numbers<[1], [0], [0], [1], [0, 0, 1, 1], [], []>} : vector<8x64xbf16>, vector<64x256xbf16>, vector<8x256xf32> -> vector<8x256xf32>
    %46 = arith.addf %40, %45 : vector<8x256xf32>
    %c0_39 = arith.constant 0 : index
    %c0_40 = arith.constant 0 : index
    %47 = vector.load %arg9[%c0_39, %c0_40] : memref<8x64xf32, #tpu.memory_space<vmem>>, vector<8x64xf32>
    %48 = arith.truncf %47 : vector<8x64xf32> to vector<8x64xbf16>
    %c8 = arith.constant 8 : index
    %c0_41 = arith.constant 0 : index
    %c0_42 = arith.constant 0 : index
    %49 = vector.load %arg10[%c8, %c0_41, %c0_42] : memref<9x64x256xbf16, #tpu.memory_space<vmem>>, vector<1x64x256xbf16>
    %50 = vector.shape_cast %49 : vector<1x64x256xbf16> to vector<64x256xbf16>
    %cst_43 = arith.constant dense<0.000000e+00> : vector<8x256xf32>
    %51 = tpu.matmul %48, %50, %cst_43 {dimension_numbers = #tpu.dot_dimension_numbers<[1], [0], [0], [1], [0, 0, 1, 1], [], []>} : vector<8x64xbf16>, vector<64x256xbf16>, vector<8x256xf32> -> vector<8x256xf32>
    %52 = arith.addf %46, %51 : vector<8x256xf32>
    %cst_44 = arith.constant dense<0.000000e+00> : vector<256xf32>
    %53 = vector.multi_reduction <add>, %52, %cst_44 [0] : vector<8x256xf32> to vector<256xf32>
    %54 = vector.shape_cast %53 : vector<256xf32> to vector<1x256xf32>
    %cst_45 = arith.constant 1.250000e-01 : f32
    %55 = vector.broadcast %cst_45 : f32 to vector<1x256xf32>
    %56 = arith.mulf %54, %55 : vector<1x256xf32>
    %57 = vector.broadcast %56 : vector<1x256xf32> to vector<8x256xf32>
    %58 = arith.subf %52, %57 : vector<8x256xf32>
    %59 = arith.mulf %58, %58 : vector<8x256xf32>
    %cst_46 = arith.constant dense<0.000000e+00> : vector<256xf32>
    %60 = vector.multi_reduction <add>, %59, %cst_46 [0] : vector<8x256xf32> to vector<256xf32>
    %61 = vector.shape_cast %60 : vector<256xf32> to vector<1x256xf32>
    %cst_47 = arith.constant 1.250000e-01 : f32
    %62 = vector.broadcast %cst_47 : f32 to vector<1x256xf32>
    %63 = arith.mulf %61, %62 : vector<1x256xf32>
    %c0_48 = arith.constant 0 : index
    %c0_49 = arith.constant 0 : index
    %64 = vector.load %arg11[%c0_48, %c0_49] : memref<1x256xf32, #tpu.memory_space<vmem>>, vector<1x256xf32>
    %cst_50 = arith.constant 9.99999974E-6 : f32
    %65 = vector.broadcast %cst_50 : f32 to vector<1x256xf32>
    %66 = arith.addf %63, %65 : vector<1x256xf32>
    %67 = math.rsqrt %66 : vector<1x256xf32>
    %68 = arith.mulf %64, %67 : vector<1x256xf32>
    %69 = vector.broadcast %68 : vector<1x256xf32> to vector<8x256xf32>
    %70 = arith.mulf %58, %69 : vector<8x256xf32>
    %c0_51 = arith.constant 0 : index
    %c0_52 = arith.constant 0 : index
    %71 = vector.load %arg12[%c0_51, %c0_52] : memref<1x256xf32, #tpu.memory_space<vmem>>, vector<1x256xf32>
    %72 = vector.broadcast %71 : vector<1x256xf32> to vector<8x256xf32>
    %73 = arith.addf %70, %72 : vector<8x256xf32>
    %74 = vector.extract_strided_slice %73 {offsets = [0, 0], sizes = [8, 128], strides = [1, 1]} : vector<8x256xf32> to vector<8x128xf32>
    %cst_53 = arith.constant 0.000000e+00 : f32
    %75 = vector.broadcast %cst_53 : f32 to vector<8x128xf32>
    %76 = arith.maximumf %74, %75 : vector<8x128xf32>
    %c0_54 = arith.constant 0 : index
    %c0_55 = arith.constant 0 : index
    %77 = vector.load %arg13[%c0_54, %c0_55] : memref<8x128xf32, #tpu.memory_space<vmem>>, vector<8x128xf32>
    tpu.vector_store %arg13[%c0_54, %c0_55], %76 {strides = array<i32>} : memref<8x128xf32, #tpu.memory_space<vmem>>, vector<8x128xf32>,
    %78 = vector.extract_strided_slice %73 {offsets = [0, 128], sizes = [8, 128], strides = [1, 1]} : vector<8x256xf32> to vector<8x128xf32>
    %c0_56 = arith.constant 0 : index
    %c0_57 = arith.constant 0 : index
    %79 = vector.load %arg14[%c0_56, %c0_57] : memref<8x128xf32, #tpu.memory_space<vmem>>, vector<8x128xf32>
    tpu.vector_store %arg14[%c0_56, %c0_57], %78 {strides = array<i32>} : memref<8x128xf32, #tpu.memory_space<vmem>>, vector<8x128xf32>,
    return
  }
  func.func @transform_0(%arg0: i32) -> (i32, i32) {
    %c0_i32 = arith.constant 0 : i32
    %c0_i32_0 = arith.constant 0 : i32
    %c0_i32_1 = arith.constant 0 : i32
    return %c0_i32, %c0_i32_0 : i32, i32
  }
  func.func @transform_1(%arg0: i32) -> (i32, i32) {
    %c0_i32 = arith.constant 0 : i32
    %c0_i32_0 = arith.constant 0 : i32
    %c0_i32_1 = arith.constant 0 : i32
    return %c0_i32, %c0_i32_0 : i32, i32
  }
  func.func @transform_2(%arg0: i32) -> (i32, i32) {
    %c0_i32 = arith.constant 0 : i32
    %c0_i32_0 = arith.constant 0 : i32
    %c0_i32_1 = arith.constant 0 : i32
    return %c0_i32, %c0_i32_0 : i32, i32
  }
  func.func @transform_3(%arg0: i32) -> (i32, i32) {
    %c0_i32 = arith.constant 0 : i32
    %c0_i32_0 = arith.constant 0 : i32
    %c0_i32_1 = arith.constant 0 : i32
    return %c0_i32, %c0_i32_0 : i32, i32
  }
  func.func @transform_4(%arg0: i32) -> (i32, i32) {
    %c0_i32 = arith.constant 0 : i32
    %c0_i32_0 = arith.constant 0 : i32
    %c0_i32_1 = arith.constant 0 : i32
    return %c0_i32, %c0_i32_0 : i32, i32
  }
  func.func @transform_5(%arg0: i32) -> (i32, i32) {
    %c0_i32 = arith.constant 0 : i32
    %c0_i32_0 = arith.constant 0 : i32
    %c0_i32_1 = arith.constant 0 : i32
    return %c0_i32, %c0_i32_0 : i32, i32
  }
  func.func @transform_6(%arg0: i32) -> (i32, i32) {
    %c0_i32 = arith.constant 0 : i32
    %c0_i32_0 = arith.constant 0 : i32
    %c0_i32_1 = arith.constant 0 : i32
    return %c0_i32, %c0_i32_0 : i32, i32
  }
  func.func @transform_7(%arg0: i32) -> (i32, i32) {
    %c0_i32 = arith.constant 0 : i32
    %c0_i32_0 = arith.constant 0 : i32
    %c0_i32_1 = arith.constant 0 : i32
    return %c0_i32, %c0_i32_0 : i32, i32
  }
  func.func @transform_8(%arg0: i32) -> (i32, i32) {
    %c0_i32 = arith.constant 0 : i32
    %c0_i32_0 = arith.constant 0 : i32
    %c0_i32_1 = arith.constant 0 : i32
    return %c0_i32, %c0_i32_0 : i32, i32
  }
  func.func @transform_9(%arg0: i32) -> (i32, i32, i32) {
    %c0_i32 = arith.constant 0 : i32
    %c0_i32_0 = arith.constant 0 : i32
    %c0_i32_1 = arith.constant 0 : i32
    %c0_i32_2 = arith.constant 0 : i32
    return %c0_i32, %c0_i32_0, %c0_i32_1 : i32, i32, i32
  }
  func.func @transform_10(%arg0: i32) -> (i32, i32) {
    %c0_i32 = arith.constant 0 : i32
    %c0_i32_0 = arith.constant 0 : i32
    %c0_i32_1 = arith.constant 0 : i32
    return %c0_i32, %c0_i32_0 : i32, i32
  }
  func.func @transform_11(%arg0: i32) -> (i32, i32) {
    %c0_i32 = arith.constant 0 : i32
    %c0_i32_0 = arith.constant 0 : i32
    %c0_i32_1 = arith.constant 0 : i32
    return %c0_i32, %c0_i32_0 : i32, i32
  }
  func.func @transform_12(%arg0: i32) -> (i32, i32) {
    %c0_i32 = arith.constant 0 : i32
    %c0_i32_0 = arith.constant 0 : i32
    %c0_i32_1 = arith.constant 0 : i32
    return %c0_i32, %c0_i32_0 : i32, i32
  }
  func.func @transform_13(%arg0: i32) -> (i32, i32) {
    %c0_i32 = arith.constant 0 : i32
    %c0_i32_0 = arith.constant 0 : i32
    %c0_i32_1 = arith.constant 0 : i32
    return %c0_i32, %c0_i32_0 : i32, i32
  }
}

module attributes {stable_mosaic.version = 11 : i64} {
  func.func @_conv_bn_relu_kernel(%arg0: i32, %arg1: memref<8x128xf32, #tpu.memory_space<vmem>>, %arg2: memref<8x128xf32, #tpu.memory_space<vmem>>, %arg3: memref<8x128xf32, #tpu.memory_space<vmem>>, %arg4: memref<8x128xf32, #tpu.memory_space<vmem>>, %arg5: memref<8x128xf32, #tpu.memory_space<vmem>>, %arg6: memref<8x128xf32, #tpu.memory_space<vmem>>, %arg7: memref<8x128xf32, #tpu.memory_space<vmem>>, %arg8: memref<8x128xf32, #tpu.memory_space<vmem>>, %arg9: memref<8x128xf32, #tpu.memory_space<vmem>>, %arg10: memref<9x128x128xbf16, #tpu.memory_space<vmem>>, %arg11: memref<1x128xf32, #tpu.memory_space<vmem>>, %arg12: memref<1x128xf32, #tpu.memory_space<vmem>>, %arg13: memref<8x128xf32, #tpu.memory_space<vmem>>) attributes {dimension_semantics = [#tpu.dimension_semantics<arbitrary>], iteration_bounds = array<i64: 1>, scalar_prefetch = 0 : i64, scratch_operands = 0 : i64, tpu.core_type = #tpu.core_type<tc>, window_params = [{pipeline_mode = #tpu.pipeline_mode<synchronous>, transform_indices = @transform_0, window_bounds = array<i64: 8, 128>}, {pipeline_mode = #tpu.pipeline_mode<synchronous>, transform_indices = @transform_1, window_bounds = array<i64: 8, 128>}, {pipeline_mode = #tpu.pipeline_mode<synchronous>, transform_indices = @transform_2, window_bounds = array<i64: 8, 128>}, {pipeline_mode = #tpu.pipeline_mode<synchronous>, transform_indices = @transform_3, window_bounds = array<i64: 8, 128>}, {pipeline_mode = #tpu.pipeline_mode<synchronous>, transform_indices = @transform_4, window_bounds = array<i64: 8, 128>}, {pipeline_mode = #tpu.pipeline_mode<synchronous>, transform_indices = @transform_5, window_bounds = array<i64: 8, 128>}, {pipeline_mode = #tpu.pipeline_mode<synchronous>, transform_indices = @transform_6, window_bounds = array<i64: 8, 128>}, {pipeline_mode = #tpu.pipeline_mode<synchronous>, transform_indices = @transform_7, window_bounds = array<i64: 8, 128>}, {pipeline_mode = #tpu.pipeline_mode<synchronous>, transform_indices = @transform_8, window_bounds = array<i64: 8, 128>}, {pipeline_mode = #tpu.pipeline_mode<synchronous>, transform_indices = @transform_9, window_bounds = array<i64: 9, 128, 128>}, {pipeline_mode = #tpu.pipeline_mode<synchronous>, transform_indices = @transform_10, window_bounds = array<i64: 1, 128>}, {pipeline_mode = #tpu.pipeline_mode<synchronous>, transform_indices = @transform_11, window_bounds = array<i64: 1, 128>}, {pipeline_mode = #tpu.pipeline_mode<synchronous>, transform_indices = @transform_12, window_bounds = array<i64: 8, 128>}]} {
    %c0 = arith.constant 0 : index
    %c0_0 = arith.constant 0 : index
    %0 = vector.load %arg1[%c0, %c0_0] : memref<8x128xf32, #tpu.memory_space<vmem>>, vector<8x128xf32>
    %1 = arith.truncf %0 : vector<8x128xf32> to vector<8x128xbf16>
    %c0_1 = arith.constant 0 : index
    %c0_2 = arith.constant 0 : index
    %c0_3 = arith.constant 0 : index
    %2 = vector.load %arg10[%c0_1, %c0_2, %c0_3] : memref<9x128x128xbf16, #tpu.memory_space<vmem>>, vector<1x128x128xbf16>
    %3 = vector.shape_cast %2 : vector<1x128x128xbf16> to vector<128x128xbf16>
    %cst = arith.constant dense<0.000000e+00> : vector<8x128xf32>
    %4 = tpu.matmul %1, %3, %cst {dimension_numbers = #tpu.dot_dimension_numbers<[1], [0], [0], [1], [0, 0, 1, 1], [], []>} : vector<8x128xbf16>, vector<128x128xbf16>, vector<8x128xf32> -> vector<8x128xf32>
    %c0_4 = arith.constant 0 : index
    %c0_5 = arith.constant 0 : index
    %5 = vector.load %arg2[%c0_4, %c0_5] : memref<8x128xf32, #tpu.memory_space<vmem>>, vector<8x128xf32>
    %6 = arith.truncf %5 : vector<8x128xf32> to vector<8x128xbf16>
    %c1 = arith.constant 1 : index
    %c0_6 = arith.constant 0 : index
    %c0_7 = arith.constant 0 : index
    %7 = vector.load %arg10[%c1, %c0_6, %c0_7] : memref<9x128x128xbf16, #tpu.memory_space<vmem>>, vector<1x128x128xbf16>
    %8 = vector.shape_cast %7 : vector<1x128x128xbf16> to vector<128x128xbf16>
    %cst_8 = arith.constant dense<0.000000e+00> : vector<8x128xf32>
    %9 = tpu.matmul %6, %8, %cst_8 {dimension_numbers = #tpu.dot_dimension_numbers<[1], [0], [0], [1], [0, 0, 1, 1], [], []>} : vector<8x128xbf16>, vector<128x128xbf16>, vector<8x128xf32> -> vector<8x128xf32>
    %10 = arith.addf %4, %9 : vector<8x128xf32>
    %c0_9 = arith.constant 0 : index
    %c0_10 = arith.constant 0 : index
    %11 = vector.load %arg3[%c0_9, %c0_10] : memref<8x128xf32, #tpu.memory_space<vmem>>, vector<8x128xf32>
    %12 = arith.truncf %11 : vector<8x128xf32> to vector<8x128xbf16>
    %c2 = arith.constant 2 : index
    %c0_11 = arith.constant 0 : index
    %c0_12 = arith.constant 0 : index
    %13 = vector.load %arg10[%c2, %c0_11, %c0_12] : memref<9x128x128xbf16, #tpu.memory_space<vmem>>, vector<1x128x128xbf16>
    %14 = vector.shape_cast %13 : vector<1x128x128xbf16> to vector<128x128xbf16>
    %cst_13 = arith.constant dense<0.000000e+00> : vector<8x128xf32>
    %15 = tpu.matmul %12, %14, %cst_13 {dimension_numbers = #tpu.dot_dimension_numbers<[1], [0], [0], [1], [0, 0, 1, 1], [], []>} : vector<8x128xbf16>, vector<128x128xbf16>, vector<8x128xf32> -> vector<8x128xf32>
    %16 = arith.addf %10, %15 : vector<8x128xf32>
    %c0_14 = arith.constant 0 : index
    %c0_15 = arith.constant 0 : index
    %17 = vector.load %arg4[%c0_14, %c0_15] : memref<8x128xf32, #tpu.memory_space<vmem>>, vector<8x128xf32>
    %18 = arith.truncf %17 : vector<8x128xf32> to vector<8x128xbf16>
    %c3 = arith.constant 3 : index
    %c0_16 = arith.constant 0 : index
    %c0_17 = arith.constant 0 : index
    %19 = vector.load %arg10[%c3, %c0_16, %c0_17] : memref<9x128x128xbf16, #tpu.memory_space<vmem>>, vector<1x128x128xbf16>
    %20 = vector.shape_cast %19 : vector<1x128x128xbf16> to vector<128x128xbf16>
    %cst_18 = arith.constant dense<0.000000e+00> : vector<8x128xf32>
    %21 = tpu.matmul %18, %20, %cst_18 {dimension_numbers = #tpu.dot_dimension_numbers<[1], [0], [0], [1], [0, 0, 1, 1], [], []>} : vector<8x128xbf16>, vector<128x128xbf16>, vector<8x128xf32> -> vector<8x128xf32>
    %22 = arith.addf %16, %21 : vector<8x128xf32>
    %c0_19 = arith.constant 0 : index
    %c0_20 = arith.constant 0 : index
    %23 = vector.load %arg5[%c0_19, %c0_20] : memref<8x128xf32, #tpu.memory_space<vmem>>, vector<8x128xf32>
    %24 = arith.truncf %23 : vector<8x128xf32> to vector<8x128xbf16>
    %c4 = arith.constant 4 : index
    %c0_21 = arith.constant 0 : index
    %c0_22 = arith.constant 0 : index
    %25 = vector.load %arg10[%c4, %c0_21, %c0_22] : memref<9x128x128xbf16, #tpu.memory_space<vmem>>, vector<1x128x128xbf16>
    %26 = vector.shape_cast %25 : vector<1x128x128xbf16> to vector<128x128xbf16>
    %cst_23 = arith.constant dense<0.000000e+00> : vector<8x128xf32>
    %27 = tpu.matmul %24, %26, %cst_23 {dimension_numbers = #tpu.dot_dimension_numbers<[1], [0], [0], [1], [0, 0, 1, 1], [], []>} : vector<8x128xbf16>, vector<128x128xbf16>, vector<8x128xf32> -> vector<8x128xf32>
    %28 = arith.addf %22, %27 : vector<8x128xf32>
    %c0_24 = arith.constant 0 : index
    %c0_25 = arith.constant 0 : index
    %29 = vector.load %arg6[%c0_24, %c0_25] : memref<8x128xf32, #tpu.memory_space<vmem>>, vector<8x128xf32>
    %30 = arith.truncf %29 : vector<8x128xf32> to vector<8x128xbf16>
    %c5 = arith.constant 5 : index
    %c0_26 = arith.constant 0 : index
    %c0_27 = arith.constant 0 : index
    %31 = vector.load %arg10[%c5, %c0_26, %c0_27] : memref<9x128x128xbf16, #tpu.memory_space<vmem>>, vector<1x128x128xbf16>
    %32 = vector.shape_cast %31 : vector<1x128x128xbf16> to vector<128x128xbf16>
    %cst_28 = arith.constant dense<0.000000e+00> : vector<8x128xf32>
    %33 = tpu.matmul %30, %32, %cst_28 {dimension_numbers = #tpu.dot_dimension_numbers<[1], [0], [0], [1], [0, 0, 1, 1], [], []>} : vector<8x128xbf16>, vector<128x128xbf16>, vector<8x128xf32> -> vector<8x128xf32>
    %34 = arith.addf %28, %33 : vector<8x128xf32>
    %c0_29 = arith.constant 0 : index
    %c0_30 = arith.constant 0 : index
    %35 = vector.load %arg7[%c0_29, %c0_30] : memref<8x128xf32, #tpu.memory_space<vmem>>, vector<8x128xf32>
    %36 = arith.truncf %35 : vector<8x128xf32> to vector<8x128xbf16>
    %c6 = arith.constant 6 : index
    %c0_31 = arith.constant 0 : index
    %c0_32 = arith.constant 0 : index
    %37 = vector.load %arg10[%c6, %c0_31, %c0_32] : memref<9x128x128xbf16, #tpu.memory_space<vmem>>, vector<1x128x128xbf16>
    %38 = vector.shape_cast %37 : vector<1x128x128xbf16> to vector<128x128xbf16>
    %cst_33 = arith.constant dense<0.000000e+00> : vector<8x128xf32>
    %39 = tpu.matmul %36, %38, %cst_33 {dimension_numbers = #tpu.dot_dimension_numbers<[1], [0], [0], [1], [0, 0, 1, 1], [], []>} : vector<8x128xbf16>, vector<128x128xbf16>, vector<8x128xf32> -> vector<8x128xf32>
    %40 = arith.addf %34, %39 : vector<8x128xf32>
    %c0_34 = arith.constant 0 : index
    %c0_35 = arith.constant 0 : index
    %41 = vector.load %arg8[%c0_34, %c0_35] : memref<8x128xf32, #tpu.memory_space<vmem>>, vector<8x128xf32>
    %42 = arith.truncf %41 : vector<8x128xf32> to vector<8x128xbf16>
    %c7 = arith.constant 7 : index
    %c0_36 = arith.constant 0 : index
    %c0_37 = arith.constant 0 : index
    %43 = vector.load %arg10[%c7, %c0_36, %c0_37] : memref<9x128x128xbf16, #tpu.memory_space<vmem>>, vector<1x128x128xbf16>
    %44 = vector.shape_cast %43 : vector<1x128x128xbf16> to vector<128x128xbf16>
    %cst_38 = arith.constant dense<0.000000e+00> : vector<8x128xf32>
    %45 = tpu.matmul %42, %44, %cst_38 {dimension_numbers = #tpu.dot_dimension_numbers<[1], [0], [0], [1], [0, 0, 1, 1], [], []>} : vector<8x128xbf16>, vector<128x128xbf16>, vector<8x128xf32> -> vector<8x128xf32>
    %46 = arith.addf %40, %45 : vector<8x128xf32>
    %c0_39 = arith.constant 0 : index
    %c0_40 = arith.constant 0 : index
    %47 = vector.load %arg9[%c0_39, %c0_40] : memref<8x128xf32, #tpu.memory_space<vmem>>, vector<8x128xf32>
    %48 = arith.truncf %47 : vector<8x128xf32> to vector<8x128xbf16>
    %c8 = arith.constant 8 : index
    %c0_41 = arith.constant 0 : index
    %c0_42 = arith.constant 0 : index
    %49 = vector.load %arg10[%c8, %c0_41, %c0_42] : memref<9x128x128xbf16, #tpu.memory_space<vmem>>, vector<1x128x128xbf16>
    %50 = vector.shape_cast %49 : vector<1x128x128xbf16> to vector<128x128xbf16>
    %cst_43 = arith.constant dense<0.000000e+00> : vector<8x128xf32>
    %51 = tpu.matmul %48, %50, %cst_43 {dimension_numbers = #tpu.dot_dimension_numbers<[1], [0], [0], [1], [0, 0, 1, 1], [], []>} : vector<8x128xbf16>, vector<128x128xbf16>, vector<8x128xf32> -> vector<8x128xf32>
    %52 = arith.addf %46, %51 : vector<8x128xf32>
    %cst_44 = arith.constant dense<0.000000e+00> : vector<128xf32>
    %53 = vector.multi_reduction <add>, %52, %cst_44 [0] : vector<8x128xf32> to vector<128xf32>
    %54 = vector.shape_cast %53 : vector<128xf32> to vector<1x128xf32>
    %cst_45 = arith.constant 1.250000e-01 : f32
    %55 = vector.broadcast %cst_45 : f32 to vector<1x128xf32>
    %56 = arith.mulf %54, %55 : vector<1x128xf32>
    %57 = vector.broadcast %56 : vector<1x128xf32> to vector<8x128xf32>
    %58 = arith.subf %52, %57 : vector<8x128xf32>
    %59 = arith.mulf %58, %58 : vector<8x128xf32>
    %cst_46 = arith.constant dense<0.000000e+00> : vector<128xf32>
    %60 = vector.multi_reduction <add>, %59, %cst_46 [0] : vector<8x128xf32> to vector<128xf32>
    %61 = vector.shape_cast %60 : vector<128xf32> to vector<1x128xf32>
    %cst_47 = arith.constant 1.250000e-01 : f32
    %62 = vector.broadcast %cst_47 : f32 to vector<1x128xf32>
    %63 = arith.mulf %61, %62 : vector<1x128xf32>
    %c0_48 = arith.constant 0 : index
    %c0_49 = arith.constant 0 : index
    %64 = vector.load %arg11[%c0_48, %c0_49] : memref<1x128xf32, #tpu.memory_space<vmem>>, vector<1x128xf32>
    %cst_50 = arith.constant 9.99999974E-6 : f32
    %65 = vector.broadcast %cst_50 : f32 to vector<1x128xf32>
    %66 = arith.addf %63, %65 : vector<1x128xf32>
    %67 = math.rsqrt %66 : vector<1x128xf32>
    %68 = arith.mulf %64, %67 : vector<1x128xf32>
    %69 = vector.broadcast %68 : vector<1x128xf32> to vector<8x128xf32>
    %70 = arith.mulf %58, %69 : vector<8x128xf32>
    %c0_51 = arith.constant 0 : index
    %c0_52 = arith.constant 0 : index
    %71 = vector.load %arg12[%c0_51, %c0_52] : memref<1x128xf32, #tpu.memory_space<vmem>>, vector<1x128xf32>
    %72 = vector.broadcast %71 : vector<1x128xf32> to vector<8x128xf32>
    %73 = arith.addf %70, %72 : vector<8x128xf32>
    %cst_53 = arith.constant 0.000000e+00 : f32
    %74 = vector.broadcast %cst_53 : f32 to vector<8x128xf32>
    %75 = arith.maximumf %73, %74 : vector<8x128xf32>
    %c0_54 = arith.constant 0 : index
    %c0_55 = arith.constant 0 : index
    %76 = vector.load %arg13[%c0_54, %c0_55] : memref<8x128xf32, #tpu.memory_space<vmem>>, vector<8x128xf32>
    tpu.vector_store %arg13[%c0_54, %c0_55], %75 {strides = array<i32>} : memref<8x128xf32, #tpu.memory_space<vmem>>, vector<8x128xf32>,
    return
  }
  func.func @transform_0(%arg0: i32) -> (i32, i32) {
    %c0_i32 = arith.constant 0 : i32
    %c0_i32_0 = arith.constant 0 : i32
    %c0_i32_1 = arith.constant 0 : i32
    return %c0_i32, %c0_i32_0 : i32, i32
  }
  func.func @transform_1(%arg0: i32) -> (i32, i32) {
    %c0_i32 = arith.constant 0 : i32
    %c0_i32_0 = arith.constant 0 : i32
    %c0_i32_1 = arith.constant 0 : i32
    return %c0_i32, %c0_i32_0 : i32, i32
  }
  func.func @transform_2(%arg0: i32) -> (i32, i32) {
    %c0_i32 = arith.constant 0 : i32
    %c0_i32_0 = arith.constant 0 : i32
    %c0_i32_1 = arith.constant 0 : i32
    return %c0_i32, %c0_i32_0 : i32, i32
  }
  func.func @transform_3(%arg0: i32) -> (i32, i32) {
    %c0_i32 = arith.constant 0 : i32
    %c0_i32_0 = arith.constant 0 : i32
    %c0_i32_1 = arith.constant 0 : i32
    return %c0_i32, %c0_i32_0 : i32, i32
  }
  func.func @transform_4(%arg0: i32) -> (i32, i32) {
    %c0_i32 = arith.constant 0 : i32
    %c0_i32_0 = arith.constant 0 : i32
    %c0_i32_1 = arith.constant 0 : i32
    return %c0_i32, %c0_i32_0 : i32, i32
  }
  func.func @transform_5(%arg0: i32) -> (i32, i32) {
    %c0_i32 = arith.constant 0 : i32
    %c0_i32_0 = arith.constant 0 : i32
    %c0_i32_1 = arith.constant 0 : i32
    return %c0_i32, %c0_i32_0 : i32, i32
  }
  func.func @transform_6(%arg0: i32) -> (i32, i32) {
    %c0_i32 = arith.constant 0 : i32
    %c0_i32_0 = arith.constant 0 : i32
    %c0_i32_1 = arith.constant 0 : i32
    return %c0_i32, %c0_i32_0 : i32, i32
  }
  func.func @transform_7(%arg0: i32) -> (i32, i32) {
    %c0_i32 = arith.constant 0 : i32
    %c0_i32_0 = arith.constant 0 : i32
    %c0_i32_1 = arith.constant 0 : i32
    return %c0_i32, %c0_i32_0 : i32, i32
  }
  func.func @transform_8(%arg0: i32) -> (i32, i32) {
    %c0_i32 = arith.constant 0 : i32
    %c0_i32_0 = arith.constant 0 : i32
    %c0_i32_1 = arith.constant 0 : i32
    return %c0_i32, %c0_i32_0 : i32, i32
  }
  func.func @transform_9(%arg0: i32) -> (i32, i32, i32) {
    %c0_i32 = arith.constant 0 : i32
    %c0_i32_0 = arith.constant 0 : i32
    %c0_i32_1 = arith.constant 0 : i32
    %c0_i32_2 = arith.constant 0 : i32
    return %c0_i32, %c0_i32_0, %c0_i32_1 : i32, i32, i32
  }
  func.func @transform_10(%arg0: i32) -> (i32, i32) {
    %c0_i32 = arith.constant 0 : i32
    %c0_i32_0 = arith.constant 0 : i32
    %c0_i32_1 = arith.constant 0 : i32
    return %c0_i32, %c0_i32_0 : i32, i32
  }
  func.func @transform_11(%arg0: i32) -> (i32, i32) {
    %c0_i32 = arith.constant 0 : i32
    %c0_i32_0 = arith.constant 0 : i32
    %c0_i32_1 = arith.constant 0 : i32
    return %c0_i32, %c0_i32_0 : i32, i32
  }
  func.func @transform_12(%arg0: i32) -> (i32, i32) {
    %c0_i32 = arith.constant 0 : i32
    %c0_i32_0 = arith.constant 0 : i32
    %c0_i32_1 = arith.constant 0 : i32
    return %c0_i32, %c0_i32_0 : i32, i32
  }
}

module attributes {stable_mosaic.version = 11 : i64} {
  func.func @_conv_bn_add_relu_kernel(%arg0: i32, %arg1: memref<8x128xf32, #tpu.memory_space<vmem>>, %arg2: memref<8x128xf32, #tpu.memory_space<vmem>>, %arg3: memref<8x128xf32, #tpu.memory_space<vmem>>, %arg4: memref<8x128xf32, #tpu.memory_space<vmem>>, %arg5: memref<8x128xf32, #tpu.memory_space<vmem>>, %arg6: memref<8x128xf32, #tpu.memory_space<vmem>>, %arg7: memref<8x128xf32, #tpu.memory_space<vmem>>, %arg8: memref<8x128xf32, #tpu.memory_space<vmem>>, %arg9: memref<8x128xf32, #tpu.memory_space<vmem>>, %arg10: memref<9x128x128xbf16, #tpu.memory_space<vmem>>, %arg11: memref<1x128xf32, #tpu.memory_space<vmem>>, %arg12: memref<1x128xf32, #tpu.memory_space<vmem>>, %arg13: memref<8x128xf32, #tpu.memory_space<vmem>>, %arg14: memref<8x128xf32, #tpu.memory_space<vmem>>) attributes {dimension_semantics = [#tpu.dimension_semantics<arbitrary>], iteration_bounds = array<i64: 1>, scalar_prefetch = 0 : i64, scratch_operands = 0 : i64, tpu.core_type = #tpu.core_type<tc>, window_params = [{pipeline_mode = #tpu.pipeline_mode<synchronous>, transform_indices = @transform_0, window_bounds = array<i64: 8, 128>}, {pipeline_mode = #tpu.pipeline_mode<synchronous>, transform_indices = @transform_1, window_bounds = array<i64: 8, 128>}, {pipeline_mode = #tpu.pipeline_mode<synchronous>, transform_indices = @transform_2, window_bounds = array<i64: 8, 128>}, {pipeline_mode = #tpu.pipeline_mode<synchronous>, transform_indices = @transform_3, window_bounds = array<i64: 8, 128>}, {pipeline_mode = #tpu.pipeline_mode<synchronous>, transform_indices = @transform_4, window_bounds = array<i64: 8, 128>}, {pipeline_mode = #tpu.pipeline_mode<synchronous>, transform_indices = @transform_5, window_bounds = array<i64: 8, 128>}, {pipeline_mode = #tpu.pipeline_mode<synchronous>, transform_indices = @transform_6, window_bounds = array<i64: 8, 128>}, {pipeline_mode = #tpu.pipeline_mode<synchronous>, transform_indices = @transform_7, window_bounds = array<i64: 8, 128>}, {pipeline_mode = #tpu.pipeline_mode<synchronous>, transform_indices = @transform_8, window_bounds = array<i64: 8, 128>}, {pipeline_mode = #tpu.pipeline_mode<synchronous>, transform_indices = @transform_9, window_bounds = array<i64: 9, 128, 128>}, {pipeline_mode = #tpu.pipeline_mode<synchronous>, transform_indices = @transform_10, window_bounds = array<i64: 1, 128>}, {pipeline_mode = #tpu.pipeline_mode<synchronous>, transform_indices = @transform_11, window_bounds = array<i64: 1, 128>}, {pipeline_mode = #tpu.pipeline_mode<synchronous>, transform_indices = @transform_12, window_bounds = array<i64: 8, 128>}, {pipeline_mode = #tpu.pipeline_mode<synchronous>, transform_indices = @transform_13, window_bounds = array<i64: 8, 128>}]} {
    %c0 = arith.constant 0 : index
    %c0_0 = arith.constant 0 : index
    %0 = vector.load %arg1[%c0, %c0_0] : memref<8x128xf32, #tpu.memory_space<vmem>>, vector<8x128xf32>
    %1 = arith.truncf %0 : vector<8x128xf32> to vector<8x128xbf16>
    %c0_1 = arith.constant 0 : index
    %c0_2 = arith.constant 0 : index
    %c0_3 = arith.constant 0 : index
    %2 = vector.load %arg10[%c0_1, %c0_2, %c0_3] : memref<9x128x128xbf16, #tpu.memory_space<vmem>>, vector<1x128x128xbf16>
    %3 = vector.shape_cast %2 : vector<1x128x128xbf16> to vector<128x128xbf16>
    %cst = arith.constant dense<0.000000e+00> : vector<8x128xf32>
    %4 = tpu.matmul %1, %3, %cst {dimension_numbers = #tpu.dot_dimension_numbers<[1], [0], [0], [1], [0, 0, 1, 1], [], []>} : vector<8x128xbf16>, vector<128x128xbf16>, vector<8x128xf32> -> vector<8x128xf32>
    %c0_4 = arith.constant 0 : index
    %c0_5 = arith.constant 0 : index
    %5 = vector.load %arg2[%c0_4, %c0_5] : memref<8x128xf32, #tpu.memory_space<vmem>>, vector<8x128xf32>
    %6 = arith.truncf %5 : vector<8x128xf32> to vector<8x128xbf16>
    %c1 = arith.constant 1 : index
    %c0_6 = arith.constant 0 : index
    %c0_7 = arith.constant 0 : index
    %7 = vector.load %arg10[%c1, %c0_6, %c0_7] : memref<9x128x128xbf16, #tpu.memory_space<vmem>>, vector<1x128x128xbf16>
    %8 = vector.shape_cast %7 : vector<1x128x128xbf16> to vector<128x128xbf16>
    %cst_8 = arith.constant dense<0.000000e+00> : vector<8x128xf32>
    %9 = tpu.matmul %6, %8, %cst_8 {dimension_numbers = #tpu.dot_dimension_numbers<[1], [0], [0], [1], [0, 0, 1, 1], [], []>} : vector<8x128xbf16>, vector<128x128xbf16>, vector<8x128xf32> -> vector<8x128xf32>
    %10 = arith.addf %4, %9 : vector<8x128xf32>
    %c0_9 = arith.constant 0 : index
    %c0_10 = arith.constant 0 : index
    %11 = vector.load %arg3[%c0_9, %c0_10] : memref<8x128xf32, #tpu.memory_space<vmem>>, vector<8x128xf32>
    %12 = arith.truncf %11 : vector<8x128xf32> to vector<8x128xbf16>
    %c2 = arith.constant 2 : index
    %c0_11 = arith.constant 0 : index
    %c0_12 = arith.constant 0 : index
    %13 = vector.load %arg10[%c2, %c0_11, %c0_12] : memref<9x128x128xbf16, #tpu.memory_space<vmem>>, vector<1x128x128xbf16>
    %14 = vector.shape_cast %13 : vector<1x128x128xbf16> to vector<128x128xbf16>
    %cst_13 = arith.constant dense<0.000000e+00> : vector<8x128xf32>
    %15 = tpu.matmul %12, %14, %cst_13 {dimension_numbers = #tpu.dot_dimension_numbers<[1], [0], [0], [1], [0, 0, 1, 1], [], []>} : vector<8x128xbf16>, vector<128x128xbf16>, vector<8x128xf32> -> vector<8x128xf32>
    %16 = arith.addf %10, %15 : vector<8x128xf32>
    %c0_14 = arith.constant 0 : index
    %c0_15 = arith.constant 0 : index
    %17 = vector.load %arg4[%c0_14, %c0_15] : memref<8x128xf32, #tpu.memory_space<vmem>>, vector<8x128xf32>
    %18 = arith.truncf %17 : vector<8x128xf32> to vector<8x128xbf16>
    %c3 = arith.constant 3 : index
    %c0_16 = arith.constant 0 : index
    %c0_17 = arith.constant 0 : index
    %19 = vector.load %arg10[%c3, %c0_16, %c0_17] : memref<9x128x128xbf16, #tpu.memory_space<vmem>>, vector<1x128x128xbf16>
    %20 = vector.shape_cast %19 : vector<1x128x128xbf16> to vector<128x128xbf16>
    %cst_18 = arith.constant dense<0.000000e+00> : vector<8x128xf32>
    %21 = tpu.matmul %18, %20, %cst_18 {dimension_numbers = #tpu.dot_dimension_numbers<[1], [0], [0], [1], [0, 0, 1, 1], [], []>} : vector<8x128xbf16>, vector<128x128xbf16>, vector<8x128xf32> -> vector<8x128xf32>
    %22 = arith.addf %16, %21 : vector<8x128xf32>
    %c0_19 = arith.constant 0 : index
    %c0_20 = arith.constant 0 : index
    %23 = vector.load %arg5[%c0_19, %c0_20] : memref<8x128xf32, #tpu.memory_space<vmem>>, vector<8x128xf32>
    %24 = arith.truncf %23 : vector<8x128xf32> to vector<8x128xbf16>
    %c4 = arith.constant 4 : index
    %c0_21 = arith.constant 0 : index
    %c0_22 = arith.constant 0 : index
    %25 = vector.load %arg10[%c4, %c0_21, %c0_22] : memref<9x128x128xbf16, #tpu.memory_space<vmem>>, vector<1x128x128xbf16>
    %26 = vector.shape_cast %25 : vector<1x128x128xbf16> to vector<128x128xbf16>
    %cst_23 = arith.constant dense<0.000000e+00> : vector<8x128xf32>
    %27 = tpu.matmul %24, %26, %cst_23 {dimension_numbers = #tpu.dot_dimension_numbers<[1], [0], [0], [1], [0, 0, 1, 1], [], []>} : vector<8x128xbf16>, vector<128x128xbf16>, vector<8x128xf32> -> vector<8x128xf32>
    %28 = arith.addf %22, %27 : vector<8x128xf32>
    %c0_24 = arith.constant 0 : index
    %c0_25 = arith.constant 0 : index
    %29 = vector.load %arg6[%c0_24, %c0_25] : memref<8x128xf32, #tpu.memory_space<vmem>>, vector<8x128xf32>
    %30 = arith.truncf %29 : vector<8x128xf32> to vector<8x128xbf16>
    %c5 = arith.constant 5 : index
    %c0_26 = arith.constant 0 : index
    %c0_27 = arith.constant 0 : index
    %31 = vector.load %arg10[%c5, %c0_26, %c0_27] : memref<9x128x128xbf16, #tpu.memory_space<vmem>>, vector<1x128x128xbf16>
    %32 = vector.shape_cast %31 : vector<1x128x128xbf16> to vector<128x128xbf16>
    %cst_28 = arith.constant dense<0.000000e+00> : vector<8x128xf32>
    %33 = tpu.matmul %30, %32, %cst_28 {dimension_numbers = #tpu.dot_dimension_numbers<[1], [0], [0], [1], [0, 0, 1, 1], [], []>} : vector<8x128xbf16>, vector<128x128xbf16>, vector<8x128xf32> -> vector<8x128xf32>
    %34 = arith.addf %28, %33 : vector<8x128xf32>
    %c0_29 = arith.constant 0 : index
    %c0_30 = arith.constant 0 : index
    %35 = vector.load %arg7[%c0_29, %c0_30] : memref<8x128xf32, #tpu.memory_space<vmem>>, vector<8x128xf32>
    %36 = arith.truncf %35 : vector<8x128xf32> to vector<8x128xbf16>
    %c6 = arith.constant 6 : index
    %c0_31 = arith.constant 0 : index
    %c0_32 = arith.constant 0 : index
    %37 = vector.load %arg10[%c6, %c0_31, %c0_32] : memref<9x128x128xbf16, #tpu.memory_space<vmem>>, vector<1x128x128xbf16>
    %38 = vector.shape_cast %37 : vector<1x128x128xbf16> to vector<128x128xbf16>
    %cst_33 = arith.constant dense<0.000000e+00> : vector<8x128xf32>
    %39 = tpu.matmul %36, %38, %cst_33 {dimension_numbers = #tpu.dot_dimension_numbers<[1], [0], [0], [1], [0, 0, 1, 1], [], []>} : vector<8x128xbf16>, vector<128x128xbf16>, vector<8x128xf32> -> vector<8x128xf32>
    %40 = arith.addf %34, %39 : vector<8x128xf32>
    %c0_34 = arith.constant 0 : index
    %c0_35 = arith.constant 0 : index
    %41 = vector.load %arg8[%c0_34, %c0_35] : memref<8x128xf32, #tpu.memory_space<vmem>>, vector<8x128xf32>
    %42 = arith.truncf %41 : vector<8x128xf32> to vector<8x128xbf16>
    %c7 = arith.constant 7 : index
    %c0_36 = arith.constant 0 : index
    %c0_37 = arith.constant 0 : index
    %43 = vector.load %arg10[%c7, %c0_36, %c0_37] : memref<9x128x128xbf16, #tpu.memory_space<vmem>>, vector<1x128x128xbf16>
    %44 = vector.shape_cast %43 : vector<1x128x128xbf16> to vector<128x128xbf16>
    %cst_38 = arith.constant dense<0.000000e+00> : vector<8x128xf32>
    %45 = tpu.matmul %42, %44, %cst_38 {dimension_numbers = #tpu.dot_dimension_numbers<[1], [0], [0], [1], [0, 0, 1, 1], [], []>} : vector<8x128xbf16>, vector<128x128xbf16>, vector<8x128xf32> -> vector<8x128xf32>
    %46 = arith.addf %40, %45 : vector<8x128xf32>
    %c0_39 = arith.constant 0 : index
    %c0_40 = arith.constant 0 : index
    %47 = vector.load %arg9[%c0_39, %c0_40] : memref<8x128xf32, #tpu.memory_space<vmem>>, vector<8x128xf32>
    %48 = arith.truncf %47 : vector<8x128xf32> to vector<8x128xbf16>
    %c8 = arith.constant 8 : index
    %c0_41 = arith.constant 0 : index
    %c0_42 = arith.constant 0 : index
    %49 = vector.load %arg10[%c8, %c0_41, %c0_42] : memref<9x128x128xbf16, #tpu.memory_space<vmem>>, vector<1x128x128xbf16>
    %50 = vector.shape_cast %49 : vector<1x128x128xbf16> to vector<128x128xbf16>
    %cst_43 = arith.constant dense<0.000000e+00> : vector<8x128xf32>
    %51 = tpu.matmul %48, %50, %cst_43 {dimension_numbers = #tpu.dot_dimension_numbers<[1], [0], [0], [1], [0, 0, 1, 1], [], []>} : vector<8x128xbf16>, vector<128x128xbf16>, vector<8x128xf32> -> vector<8x128xf32>
    %52 = arith.addf %46, %51 : vector<8x128xf32>
    %cst_44 = arith.constant dense<0.000000e+00> : vector<128xf32>
    %53 = vector.multi_reduction <add>, %52, %cst_44 [0] : vector<8x128xf32> to vector<128xf32>
    %54 = vector.shape_cast %53 : vector<128xf32> to vector<1x128xf32>
    %cst_45 = arith.constant 1.250000e-01 : f32
    %55 = vector.broadcast %cst_45 : f32 to vector<1x128xf32>
    %56 = arith.mulf %54, %55 : vector<1x128xf32>
    %57 = vector.broadcast %56 : vector<1x128xf32> to vector<8x128xf32>
    %58 = arith.subf %52, %57 : vector<8x128xf32>
    %59 = arith.mulf %58, %58 : vector<8x128xf32>
    %cst_46 = arith.constant dense<0.000000e+00> : vector<128xf32>
    %60 = vector.multi_reduction <add>, %59, %cst_46 [0] : vector<8x128xf32> to vector<128xf32>
    %61 = vector.shape_cast %60 : vector<128xf32> to vector<1x128xf32>
    %cst_47 = arith.constant 1.250000e-01 : f32
    %62 = vector.broadcast %cst_47 : f32 to vector<1x128xf32>
    %63 = arith.mulf %61, %62 : vector<1x128xf32>
    %c0_48 = arith.constant 0 : index
    %c0_49 = arith.constant 0 : index
    %64 = vector.load %arg11[%c0_48, %c0_49] : memref<1x128xf32, #tpu.memory_space<vmem>>, vector<1x128xf32>
    %cst_50 = arith.constant 9.99999974E-6 : f32
    %65 = vector.broadcast %cst_50 : f32 to vector<1x128xf32>
    %66 = arith.addf %63, %65 : vector<1x128xf32>
    %67 = math.rsqrt %66 : vector<1x128xf32>
    %68 = arith.mulf %64, %67 : vector<1x128xf32>
    %69 = vector.broadcast %68 : vector<1x128xf32> to vector<8x128xf32>
    %70 = arith.mulf %58, %69 : vector<8x128xf32>
    %c0_51 = arith.constant 0 : index
    %c0_52 = arith.constant 0 : index
    %71 = vector.load %arg12[%c0_51, %c0_52] : memref<1x128xf32, #tpu.memory_space<vmem>>, vector<1x128xf32>
    %72 = vector.broadcast %71 : vector<1x128xf32> to vector<8x128xf32>
    %73 = arith.addf %70, %72 : vector<8x128xf32>
    %c0_53 = arith.constant 0 : index
    %c0_54 = arith.constant 0 : index
    %74 = vector.load %arg13[%c0_53, %c0_54] : memref<8x128xf32, #tpu.memory_space<vmem>>, vector<8x128xf32>
    %75 = arith.addf %73, %74 : vector<8x128xf32>
    %cst_55 = arith.constant 0.000000e+00 : f32
    %76 = vector.broadcast %cst_55 : f32 to vector<8x128xf32>
    %77 = arith.maximumf %75, %76 : vector<8x128xf32>
    %c0_56 = arith.constant 0 : index
    %c0_57 = arith.constant 0 : index
    %78 = vector.load %arg14[%c0_56, %c0_57] : memref<8x128xf32, #tpu.memory_space<vmem>>, vector<8x128xf32>
    tpu.vector_store %arg14[%c0_56, %c0_57], %77 {strides = array<i32>} : memref<8x128xf32, #tpu.memory_space<vmem>>, vector<8x128xf32>,
    return
  }
  func.func @transform_0(%arg0: i32) -> (i32, i32) {
    %c0_i32 = arith.constant 0 : i32
    %c0_i32_0 = arith.constant 0 : i32
    %c0_i32_1 = arith.constant 0 : i32
    return %c0_i32, %c0_i32_0 : i32, i32
  }
  func.func @transform_1(%arg0: i32) -> (i32, i32) {
    %c0_i32 = arith.constant 0 : i32
    %c0_i32_0 = arith.constant 0 : i32
    %c0_i32_1 = arith.constant 0 : i32
    return %c0_i32, %c0_i32_0 : i32, i32
  }
  func.func @transform_2(%arg0: i32) -> (i32, i32) {
    %c0_i32 = arith.constant 0 : i32
    %c0_i32_0 = arith.constant 0 : i32
    %c0_i32_1 = arith.constant 0 : i32
    return %c0_i32, %c0_i32_0 : i32, i32
  }
  func.func @transform_3(%arg0: i32) -> (i32, i32) {
    %c0_i32 = arith.constant 0 : i32
    %c0_i32_0 = arith.constant 0 : i32
    %c0_i32_1 = arith.constant 0 : i32
    return %c0_i32, %c0_i32_0 : i32, i32
  }
  func.func @transform_4(%arg0: i32) -> (i32, i32) {
    %c0_i32 = arith.constant 0 : i32
    %c0_i32_0 = arith.constant 0 : i32
    %c0_i32_1 = arith.constant 0 : i32
    return %c0_i32, %c0_i32_0 : i32, i32
  }
  func.func @transform_5(%arg0: i32) -> (i32, i32) {
    %c0_i32 = arith.constant 0 : i32
    %c0_i32_0 = arith.constant 0 : i32
    %c0_i32_1 = arith.constant 0 : i32
    return %c0_i32, %c0_i32_0 : i32, i32
  }
  func.func @transform_6(%arg0: i32) -> (i32, i32) {
    %c0_i32 = arith.constant 0 : i32
    %c0_i32_0 = arith.constant 0 : i32
    %c0_i32_1 = arith.constant 0 : i32
    return %c0_i32, %c0_i32_0 : i32, i32
  }
  func.func @transform_7(%arg0: i32) -> (i32, i32) {
    %c0_i32 = arith.constant 0 : i32
    %c0_i32_0 = arith.constant 0 : i32
    %c0_i32_1 = arith.constant 0 : i32
    return %c0_i32, %c0_i32_0 : i32, i32
  }
  func.func @transform_8(%arg0: i32) -> (i32, i32) {
    %c0_i32 = arith.constant 0 : i32
    %c0_i32_0 = arith.constant 0 : i32
    %c0_i32_1 = arith.constant 0 : i32
    return %c0_i32, %c0_i32_0 : i32, i32
  }
  func.func @transform_9(%arg0: i32) -> (i32, i32, i32) {
    %c0_i32 = arith.constant 0 : i32
    %c0_i32_0 = arith.constant 0 : i32
    %c0_i32_1 = arith.constant 0 : i32
    %c0_i32_2 = arith.constant 0 : i32
    return %c0_i32, %c0_i32_0, %c0_i32_1 : i32, i32, i32
  }
  func.func @transform_10(%arg0: i32) -> (i32, i32) {
    %c0_i32 = arith.constant 0 : i32
    %c0_i32_0 = arith.constant 0 : i32
    %c0_i32_1 = arith.constant 0 : i32
    return %c0_i32, %c0_i32_0 : i32, i32
  }
  func.func @transform_11(%arg0: i32) -> (i32, i32) {
    %c0_i32 = arith.constant 0 : i32
    %c0_i32_0 = arith.constant 0 : i32
    %c0_i32_1 = arith.constant 0 : i32
    return %c0_i32, %c0_i32_0 : i32, i32
  }
  func.func @transform_12(%arg0: i32) -> (i32, i32) {
    %c0_i32 = arith.constant 0 : i32
    %c0_i32_0 = arith.constant 0 : i32
    %c0_i32_1 = arith.constant 0 : i32
    return %c0_i32, %c0_i32_0 : i32, i32
  }
  func.func @transform_13(%arg0: i32) -> (i32, i32) {
    %c0_i32 = arith.constant 0 : i32
    %c0_i32_0 = arith.constant 0 : i32
    %c0_i32_1 = arith.constant 0 : i32
    return %c0_i32, %c0_i32_0 : i32, i32
  }
}

module attributes {stable_mosaic.version = 11 : i64} {
  func.func @_conv_bn_add_relu_kernel(%arg0: i32, %arg1: memref<8x128xf32, #tpu.memory_space<vmem>>, %arg2: memref<8x128xf32, #tpu.memory_space<vmem>>, %arg3: memref<8x128xf32, #tpu.memory_space<vmem>>, %arg4: memref<8x128xf32, #tpu.memory_space<vmem>>, %arg5: memref<8x128xf32, #tpu.memory_space<vmem>>, %arg6: memref<8x128xf32, #tpu.memory_space<vmem>>, %arg7: memref<8x128xf32, #tpu.memory_space<vmem>>, %arg8: memref<8x128xf32, #tpu.memory_space<vmem>>, %arg9: memref<8x128xf32, #tpu.memory_space<vmem>>, %arg10: memref<9x128x128xbf16, #tpu.memory_space<vmem>>, %arg11: memref<1x128xf32, #tpu.memory_space<vmem>>, %arg12: memref<1x128xf32, #tpu.memory_space<vmem>>, %arg13: memref<8x128xf32, #tpu.memory_space<vmem>>, %arg14: memref<8x128xf32, #tpu.memory_space<vmem>>) attributes {dimension_semantics = [#tpu.dimension_semantics<arbitrary>], iteration_bounds = array<i64: 1>, scalar_prefetch = 0 : i64, scratch_operands = 0 : i64, tpu.core_type = #tpu.core_type<tc>, window_params = [{pipeline_mode = #tpu.pipeline_mode<synchronous>, transform_indices = @transform_0, window_bounds = array<i64: 8, 128>}, {pipeline_mode = #tpu.pipeline_mode<synchronous>, transform_indices = @transform_1, window_bounds = array<i64: 8, 128>}, {pipeline_mode = #tpu.pipeline_mode<synchronous>, transform_indices = @transform_2, window_bounds = array<i64: 8, 128>}, {pipeline_mode = #tpu.pipeline_mode<synchronous>, transform_indices = @transform_3, window_bounds = array<i64: 8, 128>}, {pipeline_mode = #tpu.pipeline_mode<synchronous>, transform_indices = @transform_4, window_bounds = array<i64: 8, 128>}, {pipeline_mode = #tpu.pipeline_mode<synchronous>, transform_indices = @transform_5, window_bounds = array<i64: 8, 128>}, {pipeline_mode = #tpu.pipeline_mode<synchronous>, transform_indices = @transform_6, window_bounds = array<i64: 8, 128>}, {pipeline_mode = #tpu.pipeline_mode<synchronous>, transform_indices = @transform_7, window_bounds = array<i64: 8, 128>}, {pipeline_mode = #tpu.pipeline_mode<synchronous>, transform_indices = @transform_8, window_bounds = array<i64: 8, 128>}, {pipeline_mode = #tpu.pipeline_mode<synchronous>, transform_indices = @transform_9, window_bounds = array<i64: 9, 128, 128>}, {pipeline_mode = #tpu.pipeline_mode<synchronous>, transform_indices = @transform_10, window_bounds = array<i64: 1, 128>}, {pipeline_mode = #tpu.pipeline_mode<synchronous>, transform_indices = @transform_11, window_bounds = array<i64: 1, 128>}, {pipeline_mode = #tpu.pipeline_mode<synchronous>, transform_indices = @transform_12, window_bounds = array<i64: 8, 128>}, {pipeline_mode = #tpu.pipeline_mode<synchronous>, transform_indices = @transform_13, window_bounds = array<i64: 8, 128>}]} {
    %c0 = arith.constant 0 : index
    %c0_0 = arith.constant 0 : index
    %0 = vector.load %arg1[%c0, %c0_0] : memref<8x128xf32, #tpu.memory_space<vmem>>, vector<8x128xf32>
    %1 = arith.truncf %0 : vector<8x128xf32> to vector<8x128xbf16>
    %c0_1 = arith.constant 0 : index
    %c0_2 = arith.constant 0 : index
    %c0_3 = arith.constant 0 : index
    %2 = vector.load %arg10[%c0_1, %c0_2, %c0_3] : memref<9x128x128xbf16, #tpu.memory_space<vmem>>, vector<1x128x128xbf16>
    %3 = vector.shape_cast %2 : vector<1x128x128xbf16> to vector<128x128xbf16>
    %cst = arith.constant dense<0.000000e+00> : vector<8x128xf32>
    %4 = tpu.matmul %1, %3, %cst {dimension_numbers = #tpu.dot_dimension_numbers<[1], [0], [0], [1], [0, 0, 1, 1], [], []>} : vector<8x128xbf16>, vector<128x128xbf16>, vector<8x128xf32> -> vector<8x128xf32>
    %c0_4 = arith.constant 0 : index
    %c0_5 = arith.constant 0 : index
    %5 = vector.load %arg2[%c0_4, %c0_5] : memref<8x128xf32, #tpu.memory_space<vmem>>, vector<8x128xf32>
    %6 = arith.truncf %5 : vector<8x128xf32> to vector<8x128xbf16>
    %c1 = arith.constant 1 : index
    %c0_6 = arith.constant 0 : index
    %c0_7 = arith.constant 0 : index
    %7 = vector.load %arg10[%c1, %c0_6, %c0_7] : memref<9x128x128xbf16, #tpu.memory_space<vmem>>, vector<1x128x128xbf16>
    %8 = vector.shape_cast %7 : vector<1x128x128xbf16> to vector<128x128xbf16>
    %cst_8 = arith.constant dense<0.000000e+00> : vector<8x128xf32>
    %9 = tpu.matmul %6, %8, %cst_8 {dimension_numbers = #tpu.dot_dimension_numbers<[1], [0], [0], [1], [0, 0, 1, 1], [], []>} : vector<8x128xbf16>, vector<128x128xbf16>, vector<8x128xf32> -> vector<8x128xf32>
    %10 = arith.addf %4, %9 : vector<8x128xf32>
    %c0_9 = arith.constant 0 : index
    %c0_10 = arith.constant 0 : index
    %11 = vector.load %arg3[%c0_9, %c0_10] : memref<8x128xf32, #tpu.memory_space<vmem>>, vector<8x128xf32>
    %12 = arith.truncf %11 : vector<8x128xf32> to vector<8x128xbf16>
    %c2 = arith.constant 2 : index
    %c0_11 = arith.constant 0 : index
    %c0_12 = arith.constant 0 : index
    %13 = vector.load %arg10[%c2, %c0_11, %c0_12] : memref<9x128x128xbf16, #tpu.memory_space<vmem>>, vector<1x128x128xbf16>
    %14 = vector.shape_cast %13 : vector<1x128x128xbf16> to vector<128x128xbf16>
    %cst_13 = arith.constant dense<0.000000e+00> : vector<8x128xf32>
    %15 = tpu.matmul %12, %14, %cst_13 {dimension_numbers = #tpu.dot_dimension_numbers<[1], [0], [0], [1], [0, 0, 1, 1], [], []>} : vector<8x128xbf16>, vector<128x128xbf16>, vector<8x128xf32> -> vector<8x128xf32>
    %16 = arith.addf %10, %15 : vector<8x128xf32>
    %c0_14 = arith.constant 0 : index
    %c0_15 = arith.constant 0 : index
    %17 = vector.load %arg4[%c0_14, %c0_15] : memref<8x128xf32, #tpu.memory_space<vmem>>, vector<8x128xf32>
    %18 = arith.truncf %17 : vector<8x128xf32> to vector<8x128xbf16>
    %c3 = arith.constant 3 : index
    %c0_16 = arith.constant 0 : index
    %c0_17 = arith.constant 0 : index
    %19 = vector.load %arg10[%c3, %c0_16, %c0_17] : memref<9x128x128xbf16, #tpu.memory_space<vmem>>, vector<1x128x128xbf16>
    %20 = vector.shape_cast %19 : vector<1x128x128xbf16> to vector<128x128xbf16>
    %cst_18 = arith.constant dense<0.000000e+00> : vector<8x128xf32>
    %21 = tpu.matmul %18, %20, %cst_18 {dimension_numbers = #tpu.dot_dimension_numbers<[1], [0], [0], [1], [0, 0, 1, 1], [], []>} : vector<8x128xbf16>, vector<128x128xbf16>, vector<8x128xf32> -> vector<8x128xf32>
    %22 = arith.addf %16, %21 : vector<8x128xf32>
    %c0_19 = arith.constant 0 : index
    %c0_20 = arith.constant 0 : index
    %23 = vector.load %arg5[%c0_19, %c0_20] : memref<8x128xf32, #tpu.memory_space<vmem>>, vector<8x128xf32>
    %24 = arith.truncf %23 : vector<8x128xf32> to vector<8x128xbf16>
    %c4 = arith.constant 4 : index
    %c0_21 = arith.constant 0 : index
    %c0_22 = arith.constant 0 : index
    %25 = vector.load %arg10[%c4, %c0_21, %c0_22] : memref<9x128x128xbf16, #tpu.memory_space<vmem>>, vector<1x128x128xbf16>
    %26 = vector.shape_cast %25 : vector<1x128x128xbf16> to vector<128x128xbf16>
    %cst_23 = arith.constant dense<0.000000e+00> : vector<8x128xf32>
    %27 = tpu.matmul %24, %26, %cst_23 {dimension_numbers = #tpu.dot_dimension_numbers<[1], [0], [0], [1], [0, 0, 1, 1], [], []>} : vector<8x128xbf16>, vector<128x128xbf16>, vector<8x128xf32> -> vector<8x128xf32>
    %28 = arith.addf %22, %27 : vector<8x128xf32>
    %c0_24 = arith.constant 0 : index
    %c0_25 = arith.constant 0 : index
    %29 = vector.load %arg6[%c0_24, %c0_25] : memref<8x128xf32, #tpu.memory_space<vmem>>, vector<8x128xf32>
    %30 = arith.truncf %29 : vector<8x128xf32> to vector<8x128xbf16>
    %c5 = arith.constant 5 : index
    %c0_26 = arith.constant 0 : index
    %c0_27 = arith.constant 0 : index
    %31 = vector.load %arg10[%c5, %c0_26, %c0_27] : memref<9x128x128xbf16, #tpu.memory_space<vmem>>, vector<1x128x128xbf16>
    %32 = vector.shape_cast %31 : vector<1x128x128xbf16> to vector<128x128xbf16>
    %cst_28 = arith.constant dense<0.000000e+00> : vector<8x128xf32>
    %33 = tpu.matmul %30, %32, %cst_28 {dimension_numbers = #tpu.dot_dimension_numbers<[1], [0], [0], [1], [0, 0, 1, 1], [], []>} : vector<8x128xbf16>, vector<128x128xbf16>, vector<8x128xf32> -> vector<8x128xf32>
    %34 = arith.addf %28, %33 : vector<8x128xf32>
    %c0_29 = arith.constant 0 : index
    %c0_30 = arith.constant 0 : index
    %35 = vector.load %arg7[%c0_29, %c0_30] : memref<8x128xf32, #tpu.memory_space<vmem>>, vector<8x128xf32>
    %36 = arith.truncf %35 : vector<8x128xf32> to vector<8x128xbf16>
    %c6 = arith.constant 6 : index
    %c0_31 = arith.constant 0 : index
    %c0_32 = arith.constant 0 : index
    %37 = vector.load %arg10[%c6, %c0_31, %c0_32] : memref<9x128x128xbf16, #tpu.memory_space<vmem>>, vector<1x128x128xbf16>
    %38 = vector.shape_cast %37 : vector<1x128x128xbf16> to vector<128x128xbf16>
    %cst_33 = arith.constant dense<0.000000e+00> : vector<8x128xf32>
    %39 = tpu.matmul %36, %38, %cst_33 {dimension_numbers = #tpu.dot_dimension_numbers<[1], [0], [0], [1], [0, 0, 1, 1], [], []>} : vector<8x128xbf16>, vector<128x128xbf16>, vector<8x128xf32> -> vector<8x128xf32>
    %40 = arith.addf %34, %39 : vector<8x128xf32>
    %c0_34 = arith.constant 0 : index
    %c0_35 = arith.constant 0 : index
    %41 = vector.load %arg8[%c0_34, %c0_35] : memref<8x128xf32, #tpu.memory_space<vmem>>, vector<8x128xf32>
    %42 = arith.truncf %41 : vector<8x128xf32> to vector<8x128xbf16>
    %c7 = arith.constant 7 : index
    %c0_36 = arith.constant 0 : index
    %c0_37 = arith.constant 0 : index
    %43 = vector.load %arg10[%c7, %c0_36, %c0_37] : memref<9x128x128xbf16, #tpu.memory_space<vmem>>, vector<1x128x128xbf16>
    %44 = vector.shape_cast %43 : vector<1x128x128xbf16> to vector<128x128xbf16>
    %cst_38 = arith.constant dense<0.000000e+00> : vector<8x128xf32>
    %45 = tpu.matmul %42, %44, %cst_38 {dimension_numbers = #tpu.dot_dimension_numbers<[1], [0], [0], [1], [0, 0, 1, 1], [], []>} : vector<8x128xbf16>, vector<128x128xbf16>, vector<8x128xf32> -> vector<8x128xf32>
    %46 = arith.addf %40, %45 : vector<8x128xf32>
    %c0_39 = arith.constant 0 : index
    %c0_40 = arith.constant 0 : index
    %47 = vector.load %arg9[%c0_39, %c0_40] : memref<8x128xf32, #tpu.memory_space<vmem>>, vector<8x128xf32>
    %48 = arith.truncf %47 : vector<8x128xf32> to vector<8x128xbf16>
    %c8 = arith.constant 8 : index
    %c0_41 = arith.constant 0 : index
    %c0_42 = arith.constant 0 : index
    %49 = vector.load %arg10[%c8, %c0_41, %c0_42] : memref<9x128x128xbf16, #tpu.memory_space<vmem>>, vector<1x128x128xbf16>
    %50 = vector.shape_cast %49 : vector<1x128x128xbf16> to vector<128x128xbf16>
    %cst_43 = arith.constant dense<0.000000e+00> : vector<8x128xf32>
    %51 = tpu.matmul %48, %50, %cst_43 {dimension_numbers = #tpu.dot_dimension_numbers<[1], [0], [0], [1], [0, 0, 1, 1], [], []>} : vector<8x128xbf16>, vector<128x128xbf16>, vector<8x128xf32> -> vector<8x128xf32>
    %52 = arith.addf %46, %51 : vector<8x128xf32>
    %cst_44 = arith.constant dense<0.000000e+00> : vector<128xf32>
    %53 = vector.multi_reduction <add>, %52, %cst_44 [0] : vector<8x128xf32> to vector<128xf32>
    %54 = vector.shape_cast %53 : vector<128xf32> to vector<1x128xf32>
    %cst_45 = arith.constant 1.250000e-01 : f32
    %55 = vector.broadcast %cst_45 : f32 to vector<1x128xf32>
    %56 = arith.mulf %54, %55 : vector<1x128xf32>
    %57 = vector.broadcast %56 : vector<1x128xf32> to vector<8x128xf32>
    %58 = arith.subf %52, %57 : vector<8x128xf32>
    %59 = arith.mulf %58, %58 : vector<8x128xf32>
    %cst_46 = arith.constant dense<0.000000e+00> : vector<128xf32>
    %60 = vector.multi_reduction <add>, %59, %cst_46 [0] : vector<8x128xf32> to vector<128xf32>
    %61 = vector.shape_cast %60 : vector<128xf32> to vector<1x128xf32>
    %cst_47 = arith.constant 1.250000e-01 : f32
    %62 = vector.broadcast %cst_47 : f32 to vector<1x128xf32>
    %63 = arith.mulf %61, %62 : vector<1x128xf32>
    %c0_48 = arith.constant 0 : index
    %c0_49 = arith.constant 0 : index
    %64 = vector.load %arg11[%c0_48, %c0_49] : memref<1x128xf32, #tpu.memory_space<vmem>>, vector<1x128xf32>
    %cst_50 = arith.constant 9.99999974E-6 : f32
    %65 = vector.broadcast %cst_50 : f32 to vector<1x128xf32>
    %66 = arith.addf %63, %65 : vector<1x128xf32>
    %67 = math.rsqrt %66 : vector<1x128xf32>
    %68 = arith.mulf %64, %67 : vector<1x128xf32>
    %69 = vector.broadcast %68 : vector<1x128xf32> to vector<8x128xf32>
    %70 = arith.mulf %58, %69 : vector<8x128xf32>
    %c0_51 = arith.constant 0 : index
    %c0_52 = arith.constant 0 : index
    %71 = vector.load %arg12[%c0_51, %c0_52] : memref<1x128xf32, #tpu.memory_space<vmem>>, vector<1x128xf32>
    %72 = vector.broadcast %71 : vector<1x128xf32> to vector<8x128xf32>
    %73 = arith.addf %70, %72 : vector<8x128xf32>
    %c0_53 = arith.constant 0 : index
    %c0_54 = arith.constant 0 : index
    %74 = vector.load %arg13[%c0_53, %c0_54] : memref<8x128xf32, #tpu.memory_space<vmem>>, vector<8x128xf32>
    %75 = arith.addf %73, %74 : vector<8x128xf32>
    %cst_55 = arith.constant 0.000000e+00 : f32
    %76 = vector.broadcast %cst_55 : f32 to vector<8x128xf32>
    %77 = arith.maximumf %75, %76 : vector<8x128xf32>
    %c0_56 = arith.constant 0 : index
    %c0_57 = arith.constant 0 : index
    %78 = vector.load %arg14[%c0_56, %c0_57] : memref<8x128xf32, #tpu.memory_space<vmem>>, vector<8x128xf32>
    tpu.vector_store %arg14[%c0_56, %c0_57], %77 {strides = array<i32>} : memref<8x128xf32, #tpu.memory_space<vmem>>, vector<8x128xf32>,
    return
  }
  func.func @transform_0(%arg0: i32) -> (i32, i32) {
    %c0_i32 = arith.constant 0 : i32
    %c0_i32_0 = arith.constant 0 : i32
    %c0_i32_1 = arith.constant 0 : i32
    return %c0_i32, %c0_i32_0 : i32, i32
  }
  func.func @transform_1(%arg0: i32) -> (i32, i32) {
    %c0_i32 = arith.constant 0 : i32
    %c0_i32_0 = arith.constant 0 : i32
    %c0_i32_1 = arith.constant 0 : i32
    return %c0_i32, %c0_i32_0 : i32, i32
  }
  func.func @transform_2(%arg0: i32) -> (i32, i32) {
    %c0_i32 = arith.constant 0 : i32
    %c0_i32_0 = arith.constant 0 : i32
    %c0_i32_1 = arith.constant 0 : i32
    return %c0_i32, %c0_i32_0 : i32, i32
  }
  func.func @transform_3(%arg0: i32) -> (i32, i32) {
    %c0_i32 = arith.constant 0 : i32
    %c0_i32_0 = arith.constant 0 : i32
    %c0_i32_1 = arith.constant 0 : i32
    return %c0_i32, %c0_i32_0 : i32, i32
  }
  func.func @transform_4(%arg0: i32) -> (i32, i32) {
    %c0_i32 = arith.constant 0 : i32
    %c0_i32_0 = arith.constant 0 : i32
    %c0_i32_1 = arith.constant 0 : i32
    return %c0_i32, %c0_i32_0 : i32, i32
  }
  func.func @transform_5(%arg0: i32) -> (i32, i32) {
    %c0_i32 = arith.constant 0 : i32
    %c0_i32_0 = arith.constant 0 : i32
    %c0_i32_1 = arith.constant 0 : i32
    return %c0_i32, %c0_i32_0 : i32, i32
  }
  func.func @transform_6(%arg0: i32) -> (i32, i32) {
    %c0_i32 = arith.constant 0 : i32
    %c0_i32_0 = arith.constant 0 : i32
    %c0_i32_1 = arith.constant 0 : i32
    return %c0_i32, %c0_i32_0 : i32, i32
  }
  func.func @transform_7(%arg0: i32) -> (i32, i32) {
    %c0_i32 = arith.constant 0 : i32
    %c0_i32_0 = arith.constant 0 : i32
    %c0_i32_1 = arith.constant 0 : i32
    return %c0_i32, %c0_i32_0 : i32, i32
  }
  func.func @transform_8(%arg0: i32) -> (i32, i32) {
    %c0_i32 = arith.constant 0 : i32
    %c0_i32_0 = arith.constant 0 : i32
    %c0_i32_1 = arith.constant 0 : i32
    return %c0_i32, %c0_i32_0 : i32, i32
  }
  func.func @transform_9(%arg0: i32) -> (i32, i32, i32) {
    %c0_i32 = arith.constant 0 : i32
    %c0_i32_0 = arith.constant 0 : i32
    %c0_i32_1 = arith.constant 0 : i32
    %c0_i32_2 = arith.constant 0 : i32
    return %c0_i32, %c0_i32_0, %c0_i32_1 : i32, i32, i32
  }
  func.func @transform_10(%arg0: i32) -> (i32, i32) {
    %c0_i32 = arith.constant 0 : i32
    %c0_i32_0 = arith.constant 0 : i32
    %c0_i32_1 = arith.constant 0 : i32
    return %c0_i32, %c0_i32_0 : i32, i32
  }
  func.func @transform_11(%arg0: i32) -> (i32, i32) {
    %c0_i32 = arith.constant 0 : i32
    %c0_i32_0 = arith.constant 0 : i32
    %c0_i32_1 = arith.constant 0 : i32
    return %c0_i32, %c0_i32_0 : i32, i32
  }
  func.func @transform_12(%arg0: i32) -> (i32, i32) {
    %c0_i32 = arith.constant 0 : i32
    %c0_i32_0 = arith.constant 0 : i32
    %c0_i32_1 = arith.constant 0 : i32
    return %c0_i32, %c0_i32_0 : i32, i32
  }
  func.func @transform_13(%arg0: i32) -> (i32, i32) {
    %c0_i32 = arith.constant 0 : i32
    %c0_i32_0 = arith.constant 0 : i32
    %c0_i32_1 = arith.constant 0 : i32
    return %c0_i32, %c0_i32_0 : i32, i32
  }
}

</mosaic_0001>

<bundles_post_ra>
// kernel: encoder_forward.11
= control target key start
LH: loop header
LB: loop body
LE: loop exit
PB: predicated region body
PF: predicated region fallthrough
CT: control target
= control target key end

     0   :  { %s182_s0 = inlined_call_operand.vmem [shape: f32[16,128], index: 0, kind: input, shape index: {}]   ;;  %s183_s1 = inlined_call_operand.vmem [shape: f32[16,128], index: 1, kind: input, shape index: {}]   ;;  %s184_s2 = inlined_call_operand.vmem [shape: f32[16,128], index: 2, kind: input, shape index: {}]   ;;  %s185_s3 = inlined_call_operand.vmem [shape: f32[16,128], index: 3, kind: input, shape index: {}]   ;;  %s186_s4 = inlined_call_operand.vmem [shape: f32[16,128], index: 4, kind: input, shape index: {}]   ;;  %s187_s5 = inlined_call_operand.vmem [shape: f32[16,128], index: 5, kind: input, shape index: {}]   ;;  %s188_s6 = inlined_call_operand.vmem [shape: f32[16,128], index: 6, kind: input, shape index: {}]   ;;  %s189_s7 = inlined_call_operand.vmem [shape: f32[16,128], index: 7, kind: input, shape index: {}]   ;;  %s190_s8 = inlined_call_operand.vmem [shape: f32[16,128], index: 8, kind: input, shape index: {}]   ;;  %s191_s9 = inlined_call_operand.vmem [shape: f32[16,128], index: 9, kind: output, shape index: {}]  }
   0x1   :  { %v32_v0 = vld [vmem:[%s182_s0] sm:$0xff]  ;;  %v33_v6 = vld [vmem:[%s182_s0 + $0x8] sm:$0xff] }
   0x2   :  { %v34_v1 = vld [vmem:[%s183_s1] sm:$0xff]  ;;  %v35_v7 = vld [vmem:[%s183_s1 + $0x8] sm:$0xff] }
   0x3   :  { %v38_v2 = vld [vmem:[%s184_s2] sm:$0xff]  ;;  %v36_v3 = vmax.f32 %v32_v0, %v34_v1  ;;  %v39_v8 = vld [vmem:[%s184_s2 + $0x8] sm:$0xff]  ;;  %v37_v10 = vmax.f32 %v33_v6, %v35_v7 }
   0x4   :  { %v42_v4 = vld [vmem:[%s185_s3] sm:$0xff]  ;;  %v43_v12 = vld [vmem:[%s185_s3 + $0x8] sm:$0xff] }
   0x5   :  { %v40_v5 = vmax.f32 %v36_v3, %v38_v2  ;;  %v46_v9 = vld [vmem:[%s186_s4] sm:$0xff]  ;;  %v41_v14 = vmax.f32 %v37_v10, %v39_v8  ;;  %v47_v16 = vld [vmem:[%s186_s4 + $0x8] sm:$0xff] }
   0x6   :  { %v50_v13 = vld [vmem:[%s187_s5] sm:$0xff]  ;;  %v51_v20 = vld [vmem:[%s187_s5 + $0x8] sm:$0xff] }
   0x7   :  { %v44_v11 = vmax.f32 %v40_v5, %v42_v4  ;;  %v54_v17 = vld [vmem:[%s188_s6] sm:$0xff]  ;;  %v45_v18 = vmax.f32 %v41_v14, %v43_v12  ;;  %v55_v24 = vld [vmem:[%s188_s6 + $0x8] sm:$0xff] }
   0x8   :  { %v58_v21 = vld [vmem:[%s189_s7] sm:$0xff]  ;;  %v59_v28 = vld [vmem:[%s189_s7 + $0x8] sm:$0xff] }
   0x9   :  { %v48_v15 = vmax.f32 %v44_v11, %v46_v9  ;;  %v49_v22 = vmax.f32 %v45_v18, %v47_v16  ;;  %v62_v25 = vld [vmem:[%s190_s8] sm:$0xff]  ;;  %v63_v31 = vld [vmem:[%s190_s8 + $0x8] sm:$0xff] }
   0xb   :  { %v52_v19 = vmax.f32 %v48_v15, %v50_v13  ;;  %v53_v26 = vmax.f32 %v49_v22, %v51_v20 }
   0xd   :  { %v56_v23 = vmax.f32 %v52_v19, %v54_v17  ;;  %v57_v29 = vmax.f32 %v53_v26, %v55_v24 }
   0xf   :  { %v60_v27 = vmax.f32 %v56_v23, %v58_v21  ;;  %v61_v32 = vmax.f32 %v57_v29, %v59_v28 }
  0x11   :  { %v64_v30 = vmax.f32 %v60_v27, %v62_v25  ;;  %v65_v33 = vmax.f32 %v61_v32, %v63_v31 }
  0x13   :  { %66 = vst [vmem:[%s191_s9] sm:$0xff] %v64_v30  ;;  %67 = vst [vmem:[%s191_s9 + $0x8] sm:$0xff] %v65_v33 }

// kernel: encoder_forward.10
= control target key start
LH: loop header
LB: loop body
LE: loop exit
PB: predicated region body
PF: predicated region fallthrough
CT: control target
= control target key end

     0   :  { %v561_v0 = vmov 0   ;;  %vm176_vm0 = vcmask 556032   ;;  %vm201_vm1 = vcmask 1041408   ;;  %vm302_vm2 = vcmask 523264   ;;  %s980_s1 = inlined_call_operand.vmem [shape: bf16[196,64], index: 1, kind: input, shape index: {}]   ;;  %s981_s0 = inlined_call_operand.vmem [shape: f32[128,196], index: 0, kind: input, shape index: {}]   ;;  %s982_s2 = inlined_call_operand.vmem [shape: f32[1,64], index: 2, kind: input, shape index: {}]   ;;  %s983_s3 = inlined_call_operand.vmem [shape: f32[1,64], index: 3, kind: input, shape index: {}]   ;;  %s984_s4 = inlined_call_operand.vmem [shape: f32[1,64], index: 4, kind: input, shape index: {}]   ;;  %s985_s5 = inlined_call_operand.vmem [shape: f32[128,64], index: 5, kind: output, shape index: {}]  }
   0x1   :  { %205 = vmatprep.subr.bf16.mxu0 %v561_v0  ;;  %v546_v1 = vld [vmem:[%s980_s1] sm:$0xff]   ;;  %519 = vmatprep.subr.bf16.mxu1 %v561_v0  ;;  %v547_v2 = vld [vmem:[%s980_s1 + $0x8] sm:$0xff]   ;;  %v548_v3 = vld [vmem:[%s980_s1 + $0x10] sm:$0xff]  }
   0x2   :  { %206 = vmatpush1.bf16.msra.mxu0 %v546_v1  ;;  %532 = vmatpush1.bf16.msra.mxu1 %v546_v1  ;;  %v549_v4 = vld [vmem:[%s980_s1 + $0x18] sm:$0xff]   ;;  %v22_v5 = vld [vmem:[%s981_s0 + $0x8] sm:$0xff]  ;;  %v550_v7 = vld [vmem:[%s980_s1 + $0x20] sm:$0xff]  }
   0x3   :  { %207 = vmatprep.subr.bf16.mxu0 %v561_v0  ;;  %520 = vmatprep.subr.bf16.mxu1 %v561_v0  ;;  %v24_v6 = vld [vmem:[%s981_s0 + $0x18] sm:$0xff]  ;;  %v38_v9 = vld [vmem:[%s981_s0 + $0x88] sm:$0xff]  ;;  %v552_v13 = vld [vmem:[%s980_s1 + $0x30] sm:$0xff]  }
   0x4   :  { %v54_v8 = vpack.c.bf16 %v24_v6, %v22_v5  ;;  %v40_v10 = vld [vmem:[%s981_s0 + $0x98] sm:$0xff]  ;;  %v551_v12 = vld [vmem:[%s980_s1 + $0x28] sm:$0xff]   ;;  %v554_v15 = vld [vmem:[%s980_s1 + $0x40] sm:$0xff]  }
   0x5   :  { %v62_v11 = vpack.c.bf16 %v40_v10, %v38_v9  ;;  %v553_v14 = vld [vmem:[%s980_s1 + $0x38] sm:$0xff]   ;;  %v555_v16 = vld [vmem:[%s980_s1 + $0x48] sm:$0xff]   ;;  %v556_v17 = vld [vmem:[%s980_s1 + $0x50] sm:$0xff]  }
   0x6   :  { %208 = vmatpush1.bf16.msra.mxu0 %v547_v2  ;;  %533 = vmatpush1.bf16.msra.mxu1 %v547_v2  ;;  %v557_v18 = vld [vmem:[%s980_s1 + $0x58] sm:$0xff]   ;;  %v558_v19 = vld [vmem:[%s980_s1 + $0x60] ss:$0 sps:$4 sm:$0x33]   ;;  %v23_v21 = vld [vmem:[%s981_s0 + $0x10] sm:$0xff] }
   0x7   :  { %209 = vmatprep.subr.bf16.mxu0 %v561_v0  ;;  %521 = vmatprep.subr.bf16.mxu1 %v561_v0  ;;  %v21_v20 = vld [vmem:[%s981_s0] sm:$0xff]  ;;  %v26_v22 = vld [vmem:[%s981_s0 + $0x28] sm:$0xff]  ;;  %v39_v24 = vld [vmem:[%s981_s0 + $0x90] sm:$0xff]  ;;  %v203_v25 = vsel %vm201_vm1, %v558_v19, 0 }
   0x8   :  { %510 = vmatprep.mubr.msk.bf16.mxu0 %vm176_vm0, %v54_v8  ;;  %514 = vmatprep.mubr.msk.bf16.mxu1 %vm176_vm0, %v62_v11  ;;  %v37_v23 = vld [vmem:[%s981_s0 + $0x80] sm:$0xff]  ;;  %v28_v26 = vld [vmem:[%s981_s0 + $0x38] sm:$0xff]  ;;  %v42_v27 = vld [vmem:[%s981_s0 + $0xa8] sm:$0xff]  ;;  %v53_v29 = vpack.c.bf16 %v23_v21, %v21_v20 }
   0x9   :  { %v44_v28 = vld [vmem:[%s981_s0 + $0xb8] sm:$0xff]  ;;  %v61_v30 = vpack.c.bf16 %v39_v24, %v37_v23  ;;  %v56_v31 = vpack.c.bf16 %v28_v26, %v26_v22  ;;  %v25_v33 = vld [vmem:[%s981_s0 + $0x20] sm:$0xff]  ;;  %v27_v34 = vld [vmem:[%s981_s0 + $0x30] sm:$0xff] }
   0xa   :  { %210 = vmatpush1.bf16.msra.mxu0 %v548_v3  ;;  %534 = vmatpush1.bf16.msra.mxu1 %v548_v3  ;;  %v64_v32 = vpack.c.bf16 %v44_v28, %v42_v27  ;;  %v30_v35 = vld [vmem:[%s981_s0 + $0x48] sm:$0xff]  ;;  %v41_v36 = vld [vmem:[%s981_s0 + $0xa0] sm:$0xff]  ;;  %v43_v37 = vld [vmem:[%s981_s0 + $0xb0] sm:$0xff]  ;;  %v55_v41 = vpack.c.bf16 %v27_v34, %v25_v33 }
   0xb   :  { %211 = vmatprep.subr.bf16.mxu0 %v561_v0  ;;  %522 = vmatprep.subr.bf16.mxu1 %v561_v0  ;;  %v32_v38 = vld [vmem:[%s981_s0 + $0x58] sm:$0xff]  ;;  %v46_v39 = vld [vmem:[%s981_s0 + $0xc8] sm:$0xff]  ;;  %v63_v42 = vpack.c.bf16 %v43_v37, %v41_v36  ;;  %v29_v45 = vld [vmem:[%s981_s0 + $0x40] sm:$0xff] }
   0xc   :  { %v48_v40 = vld [vmem:[%s981_s0 + $0xd8] sm:$0xff]  ;;  %v58_v43 = vpack.c.bf16 %v32_v38, %v30_v35  ;;  %v31_v46 = vld [vmem:[%s981_s0 + $0x50] sm:$0xff]  ;;  %v34_v47 = vld [vmem:[%s981_s0 + $0x68] sm:$0xff] }
   0xd   :  { %v66_v44 = vpack.c.bf16 %v48_v40, %v46_v39  ;;  %v45_v48 = vld [vmem:[%s981_s0 + $0xc0] sm:$0xff]  ;;  %v47_v49 = vld [vmem:[%s981_s0 + $0xd0] sm:$0xff]  ;;  %v36_v50 = vld [vmem:[%s981_s0 + $0x78] sm:$0xff]  ;;  %v57_v53 = vpack.c.bf16 %v31_v46, %v29_v45 }
   0xe   :  { %212 = vmatpush1.bf16.msra.mxu0 %v549_v4  ;;  %535 = vmatpush1.bf16.msra.mxu1 %v549_v4  ;;  %v50_v51 = vld [vmem:[%s981_s0 + $0xe8] sm:$0xff]  ;;  %v52_v52 = vld [vmem:[%s981_s0 + $0xf8] sm:$0xff]  ;;  %v65_v54 = vpack.c.bf16 %v47_v49, %v45_v48  ;;  %v60_v55 = vpack.c.bf16 %v36_v50, %v34_v47  ;;  %v33_v57 = vld [vmem:[%s981_s0 + $0x60] sm:$0xff] }
   0xf   :  { %213 = vmatprep.subr.bf16.mxu0 %v561_v0  ;;  %523 = vmatprep.subr.bf16.mxu1 %v561_v0  ;;  %v68_v56 = vpack.c.bf16 %v52_v52, %v50_v51  ;;  %v35_v58 = vld [vmem:[%s981_s0 + $0x70] sm:$0xff]  ;;  %v49_v59 = vld [vmem:[%s981_s0 + $0xe0] sm:$0xff] }
  0x10   :  { %v51_v60 = vld [vmem:[%s981_s0 + $0xf0] sm:$0xff]  ;;  %v59_v61 = vpack.c.bf16 %v35_v58, %v33_v57  ;;  %v764_v63 = vld [vmem:[%s982_s2] ss:$0 sm:$0xff] }
  0x11   :  { %v67_v62 = vpack.c.bf16 %v51_v60, %v49_v59 }
  0x12   :  { %214 = vmatpush1.bf16.msra.mxu0 %v550_v7  ;;  %536 = vmatpush1.bf16.msra.mxu1 %v550_v7 }
  0x13   :  { %215 = vmatprep.subr.bf16.mxu0 %v561_v0  ;;  %524 = vmatprep.subr.bf16.mxu1 %v561_v0 }
  0x16   :  { %216 = vmatpush1.bf16.msra.mxu0 %v551_v12  ;;  %537 = vmatpush1.bf16.msra.mxu1 %v551_v12 }
  0x17   :  { %217 = vmatprep.subr.bf16.mxu0 %v561_v0  ;;  %525 = vmatprep.subr.bf16.mxu1 %v561_v0 }
  0x1a   :  { %218 = vmatpush1.bf16.msra.mxu0 %v552_v13  ;;  %538 = vmatpush1.bf16.msra.mxu1 %v552_v13 }
  0x1b   :  { %219 = vmatprep.subr.bf16.mxu0 %v561_v0  ;;  %526 = vmatprep.subr.bf16.mxu1 %v561_v0 }
  0x1e   :  { %220 = vmatpush1.bf16.msra.mxu0 %v553_v14  ;;  %539 = vmatpush1.bf16.msra.mxu1 %v553_v14 }
  0x1f   :  { %221 = vmatprep.subr.bf16.mxu0 %v561_v0  ;;  %527 = vmatprep.subr.bf16.mxu1 %v561_v0 }
  0x22   :  { %222 = vmatpush1.bf16.msra.mxu0 %v554_v15  ;;  %540 = vmatpush1.bf16.msra.mxu1 %v554_v15 }
  0x23   :  { %223 = vmatprep.subr.bf16.mxu0 %v561_v0  ;;  %528 = vmatprep.subr.bf16.mxu1 %v561_v0 }
  0x26   :  { %224 = vmatpush1.bf16.msra.mxu0 %v555_v16  ;;  %541 = vmatpush1.bf16.msra.mxu1 %v555_v16 }
  0x27   :  { %225 = vmatprep.subr.bf16.mxu0 %v561_v0  ;;  %529 = vmatprep.subr.bf16.mxu1 %v561_v0 }
  0x2a   :  { %226 = vmatpush1.bf16.msra.mxu0 %v556_v17  ;;  %542 = vmatpush1.bf16.msra.mxu1 %v556_v17 }
  0x2b   :  { %227 = vmatprep.subr.bf16.mxu0 %v561_v0  ;;  %530 = vmatprep.subr.bf16.mxu1 %v561_v0 }
  0x2e   :  { %228 = vmatpush1.bf16.msra.mxu0 %v557_v18  ;;  %543 = vmatpush1.bf16.msra.mxu1 %v557_v18 }
  0x2f   :  { %229 = vmatprep.subr.bf16.mxu0 %v561_v0  ;;  %531 = vmatprep.subr.bf16.mxu1 %v561_v0 }
  0x32   :  { %230 = vmatpush1.bf16.msra.mxu0 %v203_v25  ;;  %544 = vmatpush1.bf16.msra.mxu1 %v203_v25 }
  0x35   :  { %238 = vmatmul.mubr.bf16.vlgmr.msra.gmra.mrb[0].mxu0 %v53_v29  ;;  %270 = vmatmul.mubr.bf16.vlgmr.msra.gmra.mrb[0].mxu1 %v61_v30 }
  0x36   :  { %511 = vmatprep.mubr.msk.bf16.mxu0 %vm176_vm0, %v56_v31  ;;  %515 = vmatprep.mubr.msk.bf16.mxu1 %vm176_vm0, %v64_v32 }
  0x3d   :  { %246 = vmatmul.mubr.bf16.gmra.mrb[4].mxu0 %v55_v41  ;;  %278 = vmatmul.mubr.bf16.gmra.mrb[4].mxu1 %v63_v42 }
  0x3e   :  { %512 = vmatprep.mubr.msk.bf16.mxu0 %vm176_vm0, %v58_v43  ;;  %516 = vmatprep.mubr.msk.bf16.mxu1 %vm176_vm0, %v66_v44 }
  0x45   :  { %254 = vmatmul.mubr.bf16.gmra.mrb[8].mxu0 %v57_v53  ;;  %286 = vmatmul.mubr.bf16.gmra.mrb[8].mxu1 %v65_v54 }
  0x46   :  { %513 = vmatprep.mubr.msk.bf16.mxu0 %vm176_vm0, %v60_v55  ;;  %517 = vmatprep.mubr.msk.bf16.mxu1 %vm176_vm0, %v68_v56 }
  0x4d   :  { %262 = vmatmul.mubr.bf16.gmra.mrb[12].mxu0 %v59_v61  ;;  %294 = vmatmul.mubr.bf16.gmra.mrb[12].mxu1 %v67_v62 }
 0x108   :  { %v239_v0 = vpop.f32.mrb[0].mxu0  ;;  %v271_v1 = vpop.f32.mrb[0].mxu1 }
 0x109   :  { %v767_v2 = vadd.f32 %v764_v63, %v239_v0  ;;  %v241_v3 = vpop.f32.mrb[1].mxu0  ;;  %v273_v4 = vpop.f32.mrb[1].mxu1  ;;  %v272_v48 = vadd.f32 %v764_v63, %v271_v1 }
 0x10a   :  { %v242_v5 = vpop.f32.mrb[2].mxu0  ;;  %v274_v6 = vpop.f32.mrb[2].mxu1 }
 0x10b   :  { %v770_v7 = vadd.f32 %v764_v63, %v242_v5  ;;  %v244_v8 = vpop.f32.mrb[3].mxu0  ;;  %v276_v9 = vpop.f32.mrb[3].mxu1  ;;  %v303_v10 = vsel %vm302_vm2, %v767_v2, 0.0  ;;  %v275_v54 = vadd.f32 %v764_v63, %v274_v6  ;;  %v318_v57 = vsel %vm302_vm2, %v272_v48, 0.0 }
 0x10d   :  { %v304_v11 = vsel %vm302_vm2, %v770_v7, 0.0  ;;  %v320_v60 = vsel %vm302_vm2, %v275_v54, 0.0 }
 0x10e   :  { %v305_v12 = vadd.f32 %v304_v11, %v303_v10 }
 0x110   :  { %v247_v13 = vpop.f32.mrb[4].mxu0  ;;  %v279_v14 = vpop.f32.mrb[4].mxu1 }
 0x111   :  { %v777_v15 = vadd.f32 %v764_v63, %v247_v13  ;;  %v249_v16 = vpop.f32.mrb[5].mxu0  ;;  %v281_v17 = vpop.f32.mrb[5].mxu1  ;;  %v280_v58 = vadd.f32 %v764_v63, %v279_v14 }
 0x112   :  { %v250_v18 = vpop.f32.mrb[6].mxu0  ;;  %v282_v19 = vpop.f32.mrb[6].mxu1 }
 0x113   :  { %v306_v20 = vsel %vm302_vm2, %v777_v15, 0.0  ;;  %v782_v21 = vadd.f32 %v764_v63, %v250_v18  ;;  %v252_v22 = vpop.f32.mrb[7].mxu0  ;;  %v284_v23 = vpop.f32.mrb[7].mxu1  ;;  %v283_v61 = vadd.f32 %v764_v63, %v282_v19  ;;  %v322_v0 = vsel %vm302_vm2, %v280_v58, 0.0 }
 0x114   :  { %v307_v24 = vadd.f32 %v306_v20, %v305_v12 }
 0x115   :  { %v308_v25 = vsel %vm302_vm2, %v782_v21, 0.0  ;;  %v324_v4 = vsel %vm302_vm2, %v283_v61, 0.0 }
 0x116   :  { %v309_v26 = vadd.f32 %v308_v25, %v307_v24 }
 0x118   :  { %v255_v27 = vpop.f32.mrb[8].mxu0  ;;  %v287_v28 = vpop.f32.mrb[8].mxu1 }
 0x119   :  { %v256_v29 = vadd.f32 %v764_v63, %v255_v27  ;;  %v257_v30 = vpop.f32.mrb[9].mxu0  ;;  %v289_v31 = vpop.f32.mrb[9].mxu1  ;;  %v288_v1 = vadd.f32 %v764_v63, %v287_v28 }
 0x11a   :  { %v258_v32 = vpop.f32.mrb[10].mxu0  ;;  %v290_v33 = vpop.f32.mrb[10].mxu1 }
 0x11b   :  { %v310_v34 = vsel %vm302_vm2, %v256_v29, 0.0  ;;  %v259_v35 = vadd.f32 %v764_v63, %v258_v32  ;;  %v260_v36 = vpop.f32.mrb[11].mxu0  ;;  %v292_v37 = vpop.f32.mrb[11].mxu1  ;;  %v291_v5 = vadd.f32 %v764_v63, %v290_v33  ;;  %v326_v9 = vsel %vm302_vm2, %v288_v1, 0.0 }
 0x11c   :  { %v311_v38 = vadd.f32 %v310_v34, %v309_v26 }
 0x11d   :  { %v312_v39 = vsel %vm302_vm2, %v259_v35, 0.0  ;;  %v328_v11 = vsel %vm302_vm2, %v291_v5, 0.0 }
 0x11e   :  { %v313_v40 = vadd.f32 %v312_v39, %v311_v38 }
 0x120   :  { %v263_v41 = vpop.f32.mrb[12].mxu0  ;;  %v295_v42 = vpop.f32.mrb[12].mxu1 }
 0x121   :  { %v264_v43 = vadd.f32 %v764_v63, %v263_v41  ;;  %v265_v44 = vpop.f32.mrb[13].mxu0  ;;  %v297_v45 = vpop.f32.mrb[13].mxu1  ;;  %v296_v6 = vadd.f32 %v764_v63, %v295_v42 }
 0x122   :  { %v266_v46 = vpop.f32.mrb[14].mxu0  ;;  %v298_v47 = vpop.f32.mrb[14].mxu1 }
 0x123   :  { %v314_v49 = vsel %vm302_vm2, %v264_v43, 0.0  ;;  %v267_v50 = vadd.f32 %v764_v63, %v266_v46  ;;  %v268_v51 = vpop.f32.mrb[15].mxu0  ;;  %v300_v52 = vpop.f32.mrb[15].mxu1  ;;  %v330_v12 = vsel %vm302_vm2, %v296_v6, 0.0  ;;  %v299_v13 = vadd.f32 %v764_v63, %v298_v47 }
 0x124   :  { %v315_v53 = vadd.f32 %v314_v49, %v313_v40 }
 0x125   :  { %v316_v55 = vsel %vm302_vm2, %v267_v50, 0.0  ;;  %v332_v17 = vsel %vm302_vm2, %v299_v13, 0.0 }
 0x126   :  { %v317_v56 = vadd.f32 %v316_v55, %v315_v53 }
 0x128   :  { %v319_v59 = vadd.f32 %v318_v57, %v317_v56 }
 0x12a   :  { %v321_v62 = vadd.f32 %v320_v60, %v319_v59 }
 0x12c   :  { %v323_v3 = vadd.f32 %v322_v0, %v321_v62 }
 0x12e   :  { %v325_v8 = vadd.f32 %v324_v4, %v323_v3 }
 0x130   :  { %v327_v10 = vadd.f32 %v326_v9, %v325_v8 }
 0x132   :  { %v329_v14 = vadd.f32 %v328_v11, %v327_v10 }
 0x134   :  { %v331_v16 = vadd.f32 %v330_v12, %v329_v14 }
 0x136   :  { %v333_v18 = vadd.f32 %v332_v17, %v331_v16 }
 0x138   :  { %v334_v19 = vrot.slane %v333_v18, 4 }
 0x13a   :  { %v335_v20 = vadd.f32 %v334_v19, %v333_v18 }
 0x13c   :  { %v336_v22 = vrot.slane %v335_v20, 2 }
 0x13e   :  { %v337_v23 = vadd.f32 %v336_v22, %v335_v20 }
 0x140   :  { %v338_v24 = vrot.slane %v337_v23, 1 }
 0x142   :  { %v339_v25 = vadd.f32 %v338_v24, %v337_v23 }
 0x144   :  { %v340_v26 = vmul.f32 0.0078125, %v339_v25 }
 0x146   :  { %v811_v27 = vsub.f32 %v767_v2, %v340_v26  ;;  %v814_v28 = vsub.f32 %v770_v7, %v340_v26  ;;  %v817_v63 = vsub.f32 %v777_v15, %v340_v26  ;;  %v820_v30 = vsub.f32 %v782_v21, %v340_v26 }
 0x147   :  { %v822_v31 = vsub.f32 %v256_v29, %v340_v26  ;;  %v824_v32 = vsub.f32 %v259_v35, %v340_v26  ;;  %v826_v33 = vsub.f32 %v264_v43, %v340_v26  ;;  %v828_v34 = vsub.f32 %v267_v50, %v340_v26 }
 0x148   :  { %v830_v36 = vsub.f32 %v272_v48, %v340_v26  ;;  %v832_v2 = vsub.f32 %v275_v54, %v340_v26  ;;  %v834_v7 = vsub.f32 %v280_v58, %v340_v26  ;;  %v836_v37 = vsub.f32 %v283_v61, %v340_v26 }
 0x149   :  { %v838_v15 = vsub.f32 %v288_v1, %v340_v26  ;;  %v840_v21 = vsub.f32 %v291_v5, %v340_v26  ;;  %v842_v29 = vsub.f32 %v296_v6, %v340_v26  ;;  %v844_v35 = vsub.f32 %v299_v13, %v340_v26 }
 0x14a   :  { %v357_v38 = vmul.f32 %v811_v27, %v811_v27  ;;  %v358_v39 = vmul.f32 %v814_v28, %v814_v28  ;;  %v359_v40 = vmul.f32 %v817_v63, %v817_v63  ;;  %v360_v41 = vmul.f32 %v820_v30, %v820_v30 }
 0x14b   :  { %v361_v45 = vmul.f32 %v822_v31, %v822_v31  ;;  %v362_v48 = vmul.f32 %v824_v32, %v824_v32  ;;  %v363_v51 = vmul.f32 %v826_v33, %v826_v33  ;;  %v364_v54 = vmul.f32 %v828_v34, %v828_v34 }
 0x14c   :  { %v373_v42 = vsel %vm302_vm2, %v357_v38, 0.0  ;;  %v374_v43 = vsel %vm302_vm2, %v358_v39, 0.0  ;;  %v376_v46 = vsel %vm302_vm2, %v359_v40, 0.0  ;;  %v378_v49 = vsel %vm302_vm2, %v360_v41, 0.0 }
 0x14d   :  { %v375_v44 = vadd.f32 %v374_v43, %v373_v42  ;;  %v380_v52 = vsel %vm302_vm2, %v361_v45, 0.0  ;;  %v382_v55 = vsel %vm302_vm2, %v362_v48, 0.0  ;;  %v365_v57 = vmul.f32 %v830_v36, %v830_v36 }
 0x14e   :  { %v384_v58 = vsel %vm302_vm2, %v363_v51, 0.0  ;;  %v366_v60 = vmul.f32 %v832_v2, %v832_v2  ;;  %v386_v61 = vsel %vm302_vm2, %v364_v54, 0.0  ;;  %v367_v0 = vmul.f32 %v834_v7, %v834_v7 }
 0x14f   :  { %v377_v47 = vadd.f32 %v376_v46, %v375_v44  ;;  %v388_v1 = vsel %vm302_vm2, %v365_v57, 0.0  ;;  %v368_v4 = vmul.f32 %v836_v37, %v836_v37  ;;  %v369_v8 = vmul.f32 %v838_v15, %v838_v15 }
 0x150   :  { %v390_v5 = vsel %vm302_vm2, %v366_v60, 0.0  ;;  %v392_v9 = vsel %vm302_vm2, %v367_v0, 0.0  ;;  %v370_v11 = vmul.f32 %v840_v21, %v840_v21  ;;  %v371_v14 = vmul.f32 %v842_v29, %v842_v29  ;;  %v518_v60 = vld [vmem:[%s984_s4] ss:$0 sm:$0xff] }
 0x151   :  { %v379_v50 = vadd.f32 %v378_v49, %v377_v47  ;;  %v394_v12 = vsel %vm302_vm2, %v368_v4, 0.0  ;;  %v396_v16 = vsel %vm302_vm2, %v369_v8, 0.0  ;;  %v372_v18 = vmul.f32 %v844_v35, %v844_v35  ;;  %v411_v47 = vld [vmem:[%s983_s3] sm:$0x1] }
 0x152   :  { %v398_v19 = vsel %vm302_vm2, %v370_v11, 0.0  ;;  %v400_v22 = vsel %vm302_vm2, %v371_v14, 0.0  ;;  %v416_v45 = vlaneseq }
 0x153   :  { %v381_v53 = vadd.f32 %v380_v52, %v379_v50  ;;  %v402_v24 = vsel %vm302_vm2, %v372_v18, 0.0 }
 0x154   :  { %v417_v46 = vshrl.u32 %v416_v45, 7 }
 0x155   :  { %v383_v56 = vadd.f32 %v382_v55, %v381_v53 }
 0x156   :  { %v418_v48 = vsub.s32 0, %v417_v46 }
 0x157   :  { %v385_v59 = vadd.f32 %v384_v58, %v383_v56 }
 0x159   :  { %v387_v62 = vadd.f32 %v386_v61, %v385_v59 }
 0x15b   :  { %v389_v3 = vadd.f32 %v388_v1, %v387_v62 }
 0x15d   :  { %v391_v6 = vadd.f32 %v390_v5, %v389_v3 }
 0x15f   :  { %v393_v10 = vadd.f32 %v392_v9, %v391_v6 }
 0x161   :  { %v395_v13 = vadd.f32 %v394_v12, %v393_v10 }
 0x163   :  { %v397_v17 = vadd.f32 %v396_v16, %v395_v13 }
 0x165   :  { %v399_v20 = vadd.f32 %v398_v19, %v397_v17 }
 0x167   :  { %v401_v23 = vadd.f32 %v400_v22, %v399_v20 }
 0x169   :  { %v403_v25 = vadd.f32 %v402_v24, %v401_v23 }
 0x16b   :  { %v404_v26 = vrot.slane %v403_v25, 4 }
 0x16d   :  { %v405_v38 = vadd.f32 %v404_v26, %v403_v25 }
 0x16f   :  { %v406_v39 = vrot.slane %v405_v38, 2 }
 0x171   :  { %v407_v40 = vadd.f32 %v406_v39, %v405_v38 }
 0x173   :  { %v408_v41 = vrot.slane %v407_v40, 1 }
 0x175   :  { %v409_v42 = vadd.f32 %v408_v41, %v407_v40 }
 0x177   :  { %v410_v43 = vmul.f32 0.0078125, %v409_v42 }
 0x179   :  { %v412_v44 = vadd.f32 1e-05, %v410_v43 }
 0x17b   :  { %559 = vrsqrt.f32 %v412_v44 }
 0x185   :  { %v560_v49 = vpop.eup %559 }
 0x186   :  { %v414_v50 = vmul.f32 %v560_v49, %v411_v47 }
 0x188   :  { %v419_v51 = vrot.slane %v414_v50, %v418_v48 }
 0x18a   :  { %v421_v52 = vmul.f32 %v419_v51, %v811_v27  ;;  %v422_v53 = vmul.f32 %v419_v51, %v814_v28  ;;  %v423_v54 = vmul.f32 %v419_v51, %v817_v63  ;;  %v424_v55 = vmul.f32 %v419_v51, %v820_v30 }
 0x18b   :  { %v425_v56 = vmul.f32 %v419_v51, %v822_v31  ;;  %v426_v57 = vmul.f32 %v419_v51, %v824_v32  ;;  %v427_v58 = vmul.f32 %v419_v51, %v826_v33  ;;  %v428_v59 = vmul.f32 %v419_v51, %v828_v34 }
 0x18c   :  { %v429_v27 = vmul.f32 %v419_v51, %v830_v36  ;;  %v430_v28 = vmul.f32 %v419_v51, %v832_v2  ;;  %v431_v63 = vmul.f32 %v419_v51, %v834_v7  ;;  %v432_v30 = vmul.f32 %v419_v51, %v836_v37 }
 0x18d   :  { %v433_v31 = vmul.f32 %v419_v51, %v838_v15  ;;  %v434_v32 = vmul.f32 %v419_v51, %v840_v21  ;;  %v435_v33 = vmul.f32 %v419_v51, %v842_v29  ;;  %v436_v34 = vmul.f32 %v419_v51, %v844_v35 }
 0x18e   :  { %v444_v61 = vadd.f32 %v518_v60, %v421_v52  ;;  %v445_v62 = vadd.f32 %v518_v60, %v422_v53  ;;  %v446_v0 = vadd.f32 %v518_v60, %v423_v54  ;;  %v447_v1 = vadd.f32 %v518_v60, %v424_v55 }
 0x18f   :  { %v448_v3 = vadd.f32 %v518_v60, %v425_v56  ;;  %v449_v36 = vadd.f32 %v518_v60, %v426_v57  ;;  %v450_v4 = vadd.f32 %v518_v60, %v427_v58  ;;  %v451_v2 = vadd.f32 %v518_v60, %v428_v59 }
 0x190   :  { %v452_v5 = vadd.f32 %v518_v60, %v429_v27  ;;  %v453_v7 = vadd.f32 %v518_v60, %v430_v28  ;;  %v454_v6 = vadd.f32 %v518_v60, %v431_v63  ;;  %v455_v37 = vadd.f32 %v518_v60, %v432_v30 }
 0x191   :  { %v456_v8 = vadd.f32 %v518_v60, %v433_v31  ;;  %v457_v15 = vadd.f32 %v518_v60, %v434_v32  ;;  %v458_v9 = vadd.f32 %v518_v60, %v435_v33  ;;  %v459_v21 = vadd.f32 %v518_v60, %v436_v34 }
 0x192   :  { %v460_v10 = vmax.f32 %v444_v61, 0.0  ;;  %v461_v29 = vmax.f32 %v445_v62, 0.0  ;;  %v462_v11 = vmax.f32 %v446_v0, 0.0  ;;  %v463_v35 = vmax.f32 %v447_v1, 0.0 }
 0x193   :  { %v464_v12 = vmax.f32 %v448_v3, 0.0  ;;  %v465_v13 = vmax.f32 %v449_v36, 0.0  ;;  %v466_v14 = vmax.f32 %v450_v4, 0.0  ;;  %v467_v16 = vmax.f32 %v451_v2, 0.0 }
 0x194   :  { %v468_v17 = vmax.f32 %v452_v5, 0.0  ;;  %v469_v18 = vmax.f32 %v453_v7, 0.0  ;;  %v470_v19 = vmax.f32 %v454_v6, 0.0  ;;  %v471_v20 = vmax.f32 %v455_v37, 0.0  ;;  %476 = vst.msk [vmem:[%s985_s5] sm:$0xff] %vm302_vm2, %v460_v10  ;;  %477 = vst.msk [vmem:[%s985_s5 + $0x8] sm:$0xff] %vm302_vm2, %v461_v29 }
 0x195   :  { %478 = vst.msk [vmem:[%s985_s5 + $0x10] sm:$0xff] %vm302_vm2, %v462_v11  ;;  %479 = vst.msk [vmem:[%s985_s5 + $0x18] sm:$0xff] %vm302_vm2, %v463_v35  ;;  %v472_v22 = vmax.f32 %v456_v8, 0.0  ;;  %v473_v23 = vmax.f32 %v457_v15, 0.0  ;;  %v474_v24 = vmax.f32 %v458_v9, 0.0  ;;  %v475_v25 = vmax.f32 %v459_v21, 0.0 }
 0x196   :  { %480 = vst.msk [vmem:[%s985_s5 + $0x20] sm:$0xff] %vm302_vm2, %v464_v12  ;;  %481 = vst.msk [vmem:[%s985_s5 + $0x28] sm:$0xff] %vm302_vm2, %v465_v13 }
 0x197   :  { %482 = vst.msk [vmem:[%s985_s5 + $0x30] sm:$0xff] %vm302_vm2, %v466_v14  ;;  %483 = vst.msk [vmem:[%s985_s5 + $0x38] sm:$0xff] %vm302_vm2, %v467_v16 }
 0x198   :  { %484 = vst.msk [vmem:[%s985_s5 + $0x40] sm:$0xff] %vm302_vm2, %v468_v17  ;;  %485 = vst.msk [vmem:[%s985_s5 + $0x48] sm:$0xff] %vm302_vm2, %v469_v18 }
 0x199   :  { %486 = vst.msk [vmem:[%s985_s5 + $0x50] sm:$0xff] %vm302_vm2, %v470_v19  ;;  %487 = vst.msk [vmem:[%s985_s5 + $0x58] sm:$0xff] %vm302_vm2, %v471_v20 }
 0x19a   :  { %488 = vst.msk [vmem:[%s985_s5 + $0x60] sm:$0xff] %vm302_vm2, %v472_v22  ;;  %489 = vst.msk [vmem:[%s985_s5 + $0x68] sm:$0xff] %vm302_vm2, %v473_v23 }
 0x19b   :  { %490 = vst.msk [vmem:[%s985_s5 + $0x70] sm:$0xff] %vm302_vm2, %v474_v24  ;;  %491 = vst.msk [vmem:[%s985_s5 + $0x78] sm:$0xff] %vm302_vm2, %v475_v25 }

// kernel: encoder_forward.12
= control target key start
LH: loop header
LB: loop body
LE: loop exit
PB: predicated region body
PF: predicated region fallthrough
CT: control target
= control target key end

     0   :  { %vm95_vm0 = vcmask 523264   ;;  %s1669_s9 = inlined_call_operand.vmem [shape: bf16[9,64,64], index: 9, kind: input, shape index: {}]   ;;  %s1670_s1 = inlined_call_operand.vmem [shape: f32[32,64], index: 1, kind: input, shape index: {}]   ;;  %s1671_s4 = inlined_call_operand.vmem [shape: f32[32,64], index: 4, kind: input, shape index: {}]   ;;  %s1672_s0 = inlined_call_operand.vmem [shape: f32[32,64], index: 0, kind: input, shape index: {}]   ;;  %s1673_s5 = inlined_call_operand.vmem [shape: f32[32,64], index: 5, kind: input, shape index: {}]   ;;  %s1674_s2 = inlined_call_operand.vmem [shape: f32[32,64], index: 2, kind: input, shape index: {}]   ;;  %s1675_s6 = inlined_call_operand.vmem [shape: f32[32,64], index: 6, kind: input, shape index: {}]   ;;  %s1676_s3 = inlined_call_operand.vmem [shape: f32[32,64], index: 3, kind: input, shape index: {}]   ;;  %s1677_s7 = inlined_call_operand.vmem [shape: f32[32,64], index: 7, kind: input, shape index: {}]   ;;  %s1678_s8 = inlined_call_operand.vmem [shape: f32[32,64], index: 8, kind: input, shape index: {}]   ;;  %s1679_s10 = inlined_call_operand.vmem [shape: f32[1,64], index: 10, kind: input, shape index: {}]   ;;  %s1680_s11 = inlined_call_operand.vmem [shape: f32[1,64], index: 11, kind: input, shape index: {}]   ;;  %s1681_s12 = inlined_call_operand.vmem [shape: f32[32,64], index: 12, kind: output, shape index: {}]  }
   0x1   :  { %v1302_v0 = vld [vmem:[%s1669_s9 + $0x20] sm:$0xff]   ;;  %v1304_v2 = vld [vmem:[%s1669_s9 + $0x28] sm:$0xff]   ;;  %v1306_v4 = vld [vmem:[%s1669_s9 + $0x30] sm:$0xff]  }
   0x2   :  { %v1303_v1 = vld [vmem:[%s1669_s9 + $0x80] sm:$0xff]   ;;  %1162 = vmatprep.subr.bf16.mxu1 %v1302_v0  ;;  %v1305_v3 = vld [vmem:[%s1669_s9 + $0x88] sm:$0xff]   ;;  %v1307_v5 = vld [vmem:[%s1669_s9 + $0x90] sm:$0xff]  }
   0x3   :  { %1210 = vmatprep.subr.bf16.mxu0 %v1303_v1  ;;  %1163 = vmatpush3.bf16.msra.mxu1 %v1302_v0  ;;  %v1308_v6 = vld [vmem:[%s1669_s9 + $0x38] sm:$0xff]   ;;  %v56_v7 = vld [vmem:[%s1670_s1] sm:$0xff]  ;;  %v57_v8 = vld [vmem:[%s1670_s1 + $0x8] sm:$0xff] }
   0x4   :  { %1211 = vmatpush3.bf16.msra.mxu0 %v1303_v1  ;;  %1164 = vmatprep.subr.bf16.mxu1 %v1304_v2  ;;  %v1309_v9 = vld [vmem:[%s1669_s9 + $0x98] sm:$0xff]   ;;  %v60_v10 = vpack.c.bf16 %v57_v8, %v56_v7  ;;  %v426_v11 = vld [vmem:[%s1671_s4] sm:$0xff]  ;;  %v427_v12 = vld [vmem:[%s1671_s4 + $0x8] sm:$0xff] }
   0x5   :  { %1212 = vmatprep.subr.bf16.mxu0 %v1305_v3  ;;  %v1310_v13 = vld [vmem:[%s1669_s9] sm:$0xff]   ;;  %v430_v14 = vpack.c.bf16 %v427_v12, %v426_v11  ;;  %v58_v15 = vld [vmem:[%s1670_s1 + $0x10] sm:$0xff]  ;;  %v59_v16 = vld [vmem:[%s1670_s1 + $0x18] sm:$0xff] }
   0x6   :  { %1170 = vmatprep.mubr.msk.bf16.mxu1 %vm95_vm0, %v60_v10  ;;  %v428_v17 = vld [vmem:[%s1671_s4 + $0x10] sm:$0xff]  ;;  %v429_v18 = vld [vmem:[%s1671_s4 + $0x18] sm:$0xff]  ;;  %v1311_v19 = vld [vmem:[%s1669_s9 + $0xa0] sm:$0xff]   ;;  %v61_v20 = vpack.c.bf16 %v59_v16, %v58_v15 }
   0x7   :  { %1165 = vmatpush3.bf16.msra.mxu1 %v1304_v2  ;;  %1218 = vmatprep.mubr.msk.bf16.mxu0 %vm95_vm0, %v430_v14  ;;  %v431_v21 = vpack.c.bf16 %v429_v18, %v428_v17  ;;  %v1312_v22 = vld [vmem:[%s1669_s9 + $0x8] sm:$0xff]   ;;  %v42_v24 = vld [vmem:[%s1672_s0] sm:$0xff]  ;;  %v1314_v26 = vld [vmem:[%s1669_s9 + $0x10] sm:$0xff]  }
   0x8   :  { %1213 = vmatpush3.bf16.msra.mxu0 %v1305_v3  ;;  %1166 = vmatprep.subr.bf16.mxu1 %v1306_v4  ;;  %v1313_v23 = vld [vmem:[%s1669_s9 + $0xa8] sm:$0xff]   ;;  %v524_v28 = vld [vmem:[%s1673_s5] sm:$0xff]  ;;  %v1315_v30 = vld [vmem:[%s1669_s9 + $0xb0] sm:$0xff]  }
   0x9   :  { %1214 = vmatprep.subr.bf16.mxu0 %v1307_v5  ;;  %v43_v25 = vld [vmem:[%s1672_s0 + $0x8] sm:$0xff]  ;;  %v1316_v32 = vld [vmem:[%s1669_s9 + $0x18] sm:$0xff]   ;;  %v44_v34 = vld [vmem:[%s1672_s0 + $0x10] sm:$0xff] }
   0xa   :  { %v46_v27 = vpack.c.bf16 %v43_v25, %v42_v24  ;;  %v525_v29 = vld [vmem:[%s1673_s5 + $0x8] sm:$0xff]  ;;  %v1317_v33 = vld [vmem:[%s1669_s9 + $0xb8] sm:$0xff]   ;;  %v1318_v35 = vld [vmem:[%s1669_s9 + $0x40] sm:$0xff]  }
   0xb   :  { %1167 = vmatpush3.bf16.msra.mxu1 %v1306_v4  ;;  %v528_v31 = vpack.c.bf16 %v525_v29, %v524_v28  ;;  %v45_v36 = vld [vmem:[%s1672_s0 + $0x18] sm:$0xff]  ;;  %v526_v37 = vld [vmem:[%s1673_s5 + $0x10] sm:$0xff]  ;;  %v1319_v39 = vld [vmem:[%s1669_s9 + $0xc0] sm:$0xff]  }
   0xc   :  { %1215 = vmatpush3.bf16.msra.mxu0 %v1307_v5  ;;  %1168 = vmatprep.subr.bf16.mxu1 %v1308_v6  ;;  %v527_v38 = vld [vmem:[%s1673_s5 + $0x18] sm:$0xff]  ;;  %v230_v40 = vld [vmem:[%s1674_s2] sm:$0xff]  ;;  %v47_v41 = vpack.c.bf16 %v45_v36, %v44_v34  ;;  %v231_v42 = vld [vmem:[%s1674_s2 + $0x8] sm:$0xff] }
   0xd   :  { %1216 = vmatprep.subr.bf16.mxu0 %v1309_v9  ;;  %v529_v43 = vpack.c.bf16 %v527_v38, %v526_v37  ;;  %v622_v44 = vld [vmem:[%s1675_s6] sm:$0xff]  ;;  %v623_v45 = vld [vmem:[%s1675_s6 + $0x8] sm:$0xff]  ;;  %v234_v48 = vpack.c.bf16 %v231_v42, %v230_v40  ;;  %v1322_v50 = vld [vmem:[%s1669_s9 + $0x50] sm:$0xff]  }
   0xe   :  { %v1320_v46 = vld [vmem:[%s1669_s9 + $0x48] sm:$0xff]   ;;  %v626_v49 = vpack.c.bf16 %v623_v45, %v622_v44  ;;  %v1323_v51 = vld [vmem:[%s1669_s9 + $0xd0] sm:$0xff]   ;;  %v1324_v52 = vld [vmem:[%s1669_s9 + $0x58] sm:$0xff]  }
   0xf   :  { %1169 = vmatpush3.bf16.msra.mxu1 %v1308_v6  ;;  %v1321_v47 = vld [vmem:[%s1669_s9 + $0xc8] sm:$0xff]   ;;  %v1325_v53 = vld [vmem:[%s1669_s9 + $0xd8] sm:$0xff]   ;;  %v1326_v54 = vld [vmem:[%s1669_s9 + $0x60] sm:$0xff]  }
  0x10   :  { %1217 = vmatpush3.bf16.msra.mxu0 %v1309_v9  ;;  %1174 = vmatprep.subr.bf16.mxu1 %v1310_v13  ;;  %v232_v55 = vld [vmem:[%s1674_s2 + $0x10] sm:$0xff]  ;;  %v233_v56 = vld [vmem:[%s1674_s2 + $0x18] sm:$0xff]  ;;  %v1327_v59 = vld [vmem:[%s1669_s9 + $0xe0] sm:$0xff]  }
  0x11   :  { %1222 = vmatprep.subr.bf16.mxu0 %v1311_v19  ;;  %v624_v57 = vld [vmem:[%s1675_s6 + $0x10] sm:$0xff]  ;;  %v625_v58 = vld [vmem:[%s1675_s6 + $0x18] sm:$0xff]  ;;  %v235_v60 = vpack.c.bf16 %v233_v56, %v232_v55  ;;  %v328_v61 = vld [vmem:[%s1676_s3] sm:$0xff] }
  0x12   :  { %1171 = vmatmul.mubr.msk.bf16.vlgmr.msra.gmra.mrb[0].mxu1 %vm95_vm0, %v61_v20  ;;  %v329_v62 = vld [vmem:[%s1676_s3 + $0x8] sm:$0xff]  ;;  %v627_v63 = vpack.c.bf16 %v625_v58, %v624_v57  ;;  %v720_v0 = vld [vmem:[%s1677_s7] sm:$0xff]  ;;  %v1330_v6 = vld [vmem:[%s1669_s9 + $0x70] sm:$0xff]  }
  0x13   :  { %1175 = vmatpush3.bf16.msra.mxu1 %v1310_v13  ;;  %1219 = vmatmul.mubr.msk.bf16.vlgmr.msra.gmra.mrb[0].mxu0 %vm95_vm0, %v431_v21  ;;  %v721_v1 = vld [vmem:[%s1677_s7 + $0x8] sm:$0xff]  ;;  %v332_v4 = vpack.c.bf16 %v329_v62, %v328_v61  ;;  %v1331_v7 = vld [vmem:[%s1669_s9 + $0xf0] sm:$0xff]   ;;  %v1332_v8 = vld [vmem:[%s1669_s9 + $0x78] sm:$0xff]  }
  0x14   :  { %1223 = vmatpush3.bf16.msra.mxu0 %v1311_v19  ;;  %1176 = vmatprep.subr.bf16.mxu1 %v1312_v22  ;;  %v1328_v2 = vld [vmem:[%s1669_s9 + $0x68] sm:$0xff]   ;;  %v724_v5 = vpack.c.bf16 %v721_v1, %v720_v0  ;;  %v1333_v9 = vld [vmem:[%s1669_s9 + $0xf8] sm:$0xff]   ;;  %v330_v10 = vld [vmem:[%s1676_s3 + $0x10] sm:$0xff] }
  0x15   :  { %1224 = vmatprep.subr.bf16.mxu0 %v1313_v23  ;;  %1182 = vmatprep.mubr.msk.bf16.mxu1 %vm95_vm0, %v46_v27  ;;  %v1329_v3 = vld [vmem:[%s1669_s9 + $0xe8] sm:$0xff]   ;;  %v331_v11 = vld [vmem:[%s1676_s3 + $0x18] sm:$0xff]  ;;  %v722_v12 = vld [vmem:[%s1677_s7 + $0x10] sm:$0xff] }
  0x16   :  { %1230 = vmatprep.mubr.msk.bf16.mxu0 %vm95_vm0, %v528_v31  ;;  %v723_v13 = vld [vmem:[%s1677_s7 + $0x18] sm:$0xff]  ;;  %v1334_v14 = vld [vmem:[%s1669_s9 + $0x100] sm:$0xff]   ;;  %v819_v16 = vld [vmem:[%s1678_s8 + $0x8] sm:$0xff]  ;;  %v333_v17 = vpack.c.bf16 %v331_v11, %v330_v10  ;;  %v957_v11 = vlaneseq }
  0x17   :  { %1177 = vmatpush3.bf16.msra.mxu1 %v1312_v22  ;;  %v818_v15 = vld [vmem:[%s1678_s8] sm:$0xff]  ;;  %v725_v18 = vpack.c.bf16 %v723_v13, %v722_v12  ;;  %v1335_v20 = vld [vmem:[%s1669_s9 + $0x108] sm:$0xff]   ;;  %v1336_v21 = vld [vmem:[%s1669_s9 + $0x110] sm:$0xff]  }
  0x18   :  { %1225 = vmatpush3.bf16.msra.mxu0 %v1313_v23  ;;  %1178 = vmatprep.subr.bf16.mxu1 %v1314_v26  ;;  %v822_v19 = vpack.c.bf16 %v819_v16, %v818_v15  ;;  %v1337_v22 = vld [vmem:[%s1669_s9 + $0x118] sm:$0xff]   ;;  %v820_v23 = vld [vmem:[%s1678_s8 + $0x10] sm:$0xff]  ;;  %v958_v12 = vshrl.u32 %v957_v11, 7  ;;  %v952_v13 = vld [vmem:[%s1679_s10] sm:$0x1] }
  0x19   :  { %1226 = vmatprep.subr.bf16.mxu0 %v1315_v30  ;;  %v821_v24 = vld [vmem:[%s1678_s8 + $0x18] sm:$0xff] }
  0x1a   :  { %v823_v25 = vpack.c.bf16 %v821_v24, %v820_v23 }
  0x1b   :  { %1179 = vmatpush3.bf16.msra.mxu1 %v1314_v26 }
  0x1c   :  { %1227 = vmatpush3.bf16.msra.mxu0 %v1315_v30  ;;  %1180 = vmatprep.subr.bf16.mxu1 %v1316_v32 }
  0x1d   :  { %1228 = vmatprep.subr.bf16.mxu0 %v1317_v33 }
  0x1f   :  { %1181 = vmatpush3.bf16.msra.mxu1 %v1316_v32 }
  0x20   :  { %1229 = vmatpush3.bf16.msra.mxu0 %v1317_v33  ;;  %1186 = vmatprep.subr.bf16.mxu1 %v1318_v35 }
  0x21   :  { %1234 = vmatprep.subr.bf16.mxu0 %v1319_v39 }
  0x22   :  { %1183 = vmatmul.mubr.msk.bf16.vlgmr.msra.gmra.mrb[0].mxu1 %vm95_vm0, %v47_v41 }
  0x23   :  { %1187 = vmatpush3.bf16.msra.mxu1 %v1318_v35  ;;  %1231 = vmatmul.mubr.msk.bf16.vlgmr.msra.gmra.mrb[0].mxu0 %vm95_vm0, %v529_v43 }
  0x24   :  { %1235 = vmatpush3.bf16.msra.mxu0 %v1319_v39  ;;  %1188 = vmatprep.subr.bf16.mxu1 %v1320_v46 }
  0x25   :  { %1236 = vmatprep.subr.bf16.mxu0 %v1321_v47  ;;  %1194 = vmatprep.mubr.msk.bf16.mxu1 %vm95_vm0, %v234_v48 }
  0x26   :  { %1242 = vmatprep.mubr.msk.bf16.mxu0 %vm95_vm0, %v626_v49 }
  0x27   :  { %1189 = vmatpush3.bf16.msra.mxu1 %v1320_v46 }
  0x28   :  { %1237 = vmatpush3.bf16.msra.mxu0 %v1321_v47  ;;  %1190 = vmatprep.subr.bf16.mxu1 %v1322_v50 }
  0x29   :  { %1238 = vmatprep.subr.bf16.mxu0 %v1323_v51 }
  0x2b   :  { %1191 = vmatpush3.bf16.msra.mxu1 %v1322_v50 }
  0x2c   :  { %1239 = vmatpush3.bf16.msra.mxu0 %v1323_v51  ;;  %1192 = vmatprep.subr.bf16.mxu1 %v1324_v52 }
  0x2d   :  { %1240 = vmatprep.subr.bf16.mxu0 %v1325_v53 }
  0x2f   :  { %1193 = vmatpush3.bf16.msra.mxu1 %v1324_v52 }
  0x30   :  { %1241 = vmatpush3.bf16.msra.mxu0 %v1325_v53  ;;  %1198 = vmatprep.subr.bf16.mxu1 %v1326_v54 }
  0x31   :  { %1246 = vmatprep.subr.bf16.mxu0 %v1327_v59 }
  0x32   :  { %1195 = vmatmul.mubr.msk.bf16.vlgmr.msra.gmra.mrb[0].mxu1 %vm95_vm0, %v235_v60 }
  0x33   :  { %1199 = vmatpush3.bf16.msra.mxu1 %v1326_v54  ;;  %1243 = vmatmul.mubr.msk.bf16.vlgmr.msra.gmra.mrb[0].mxu0 %vm95_vm0, %v627_v63 }
  0x34   :  { %1247 = vmatpush3.bf16.msra.mxu0 %v1327_v59  ;;  %1200 = vmatprep.subr.bf16.mxu1 %v1328_v2 }
  0x35   :  { %1248 = vmatprep.subr.bf16.mxu0 %v1329_v3  ;;  %1206 = vmatprep.mubr.msk.bf16.mxu1 %vm95_vm0, %v332_v4 }
  0x36   :  { %1254 = vmatprep.mubr.msk.bf16.mxu0 %vm95_vm0, %v724_v5 }
  0x37   :  { %1201 = vmatpush3.bf16.msra.mxu1 %v1328_v2 }
  0x38   :  { %1249 = vmatpush3.bf16.msra.mxu0 %v1329_v3  ;;  %1202 = vmatprep.subr.bf16.mxu1 %v1330_v6 }
  0x39   :  { %1250 = vmatprep.subr.bf16.mxu0 %v1331_v7 }
  0x3b   :  { %1203 = vmatpush3.bf16.msra.mxu1 %v1330_v6 }
  0x3c   :  { %1251 = vmatpush3.bf16.msra.mxu0 %v1331_v7  ;;  %1204 = vmatprep.subr.bf16.mxu1 %v1332_v8 }
  0x3d   :  { %1252 = vmatprep.subr.bf16.mxu0 %v1333_v9 }
  0x3f   :  { %1205 = vmatpush3.bf16.msra.mxu1 %v1332_v8 }
  0x40   :  { %1253 = vmatpush3.bf16.msra.mxu0 %v1333_v9 }
  0x41   :  { %1258 = vmatprep.subr.bf16.mxu0 %v1334_v14 }
  0x42   :  { %1207 = vmatmul.mubr.msk.bf16.vlgmr.msra.gmra.mrb[0].mxu1 %vm95_vm0, %v333_v17 }
  0x43   :  { %1255 = vmatmul.mubr.msk.bf16.vlgmr.msra.gmra.mrb[0].mxu0 %vm95_vm0, %v725_v18  ;;  %v1107_v18 = vld [vmem:[%s1680_s11] ss:$0 sm:$0xff] }
  0x44   :  { %1259 = vmatpush3.bf16.msra.mxu0 %v1334_v14  ;;  %1266 = vmatprep.mubr.msk.bf16.mxu0 %vm95_vm0, %v822_v19  ;;  %v959_v14 = vsub.s32 0, %v958_v12 }
  0x45   :  { %1260 = vmatprep.subr.bf16.mxu0 %v1335_v20 }
  0x48   :  { %1261 = vmatpush3.bf16.msra.mxu0 %v1335_v20 }
  0x49   :  { %1262 = vmatprep.subr.bf16.mxu0 %v1336_v21 }
  0x4c   :  { %1263 = vmatpush3.bf16.msra.mxu0 %v1336_v21 }
  0x4d   :  { %1264 = vmatprep.subr.bf16.mxu0 %v1337_v22 }
  0x50   :  { %1265 = vmatpush3.bf16.msra.mxu0 %v1337_v22 }
  0x53   :  { %1267 = vmatmul.mubr.msk.bf16.vlgmr.msra.gmra.mrb[0].mxu0 %vm95_vm0, %v823_v25 }
 0x115   :  { %v1208_v26 = vpop.f32.mrb[0].mxu1 }
 0x116   :  { %v407_v27 = vpop.f32.mrb[1].mxu1 }
 0x117   :  { %v1209_v28 = vpop.f32.mrb[2].mxu1 }
 0x118   :  { %v410_v29 = vpop.f32.mrb[3].mxu1 }
 0x126   :  { %v1268_v30 = vpop.f32.mrb[0].mxu0 }
 0x127   :  { %v1270_v31 = vadd.f32 %v1268_v30, %v1208_v26  ;;  %v897_v32 = vpop.f32.mrb[1].mxu0 }
 0x128   :  { %v1271_v33 = vadd.f32 %v897_v32, %v407_v27  ;;  %v1269_v34 = vpop.f32.mrb[2].mxu0 }
 0x129   :  { %v1272_v35 = vadd.f32 %v1269_v34, %v1209_v28  ;;  %v900_v36 = vpop.f32.mrb[3].mxu0  ;;  %v919_v41 = vsel %vm95_vm0, %v1270_v31, 0.0 }
 0x12a   :  { %v1273_v37 = vadd.f32 %v900_v36, %v410_v29  ;;  %v916_v38 = vsel %vm95_vm0, %v1271_v33, 0.0 }
 0x12b   :  { %v921_v43 = vsel %vm95_vm0, %v1272_v35, 0.0 }
 0x12c   :  { %v917_v39 = vsel %vm95_vm0, %v1273_v37, 0.0 }
 0x12d   :  { %v918_v40 = vadd.f32 %v917_v39, %v916_v38 }
 0x12f   :  { %v920_v42 = vadd.f32 %v919_v41, %v918_v40 }
 0x131   :  { %v922_v44 = vadd.f32 %v921_v43, %v920_v42 }
 0x133   :  { %v923_v45 = vrot.slane %v922_v44, 4 }
 0x135   :  { %v924_v46 = vadd.f32 %v923_v45, %v922_v44 }
 0x137   :  { %v925_v47 = vrot.slane %v924_v46, 2 }
 0x139   :  { %v926_v48 = vadd.f32 %v925_v47, %v924_v46 }
 0x13b   :  { %v927_v49 = vrot.slane %v926_v48, 1 }
 0x13d   :  { %v928_v50 = vadd.f32 %v927_v49, %v926_v48 }
 0x13f   :  { %v929_v51 = vmul.f32 0.03125, %v928_v50 }
 0x141   :  { %v930_v52 = vsub.f32 %v1271_v33, %v929_v51  ;;  %v931_v53 = vsub.f32 %v1273_v37, %v929_v51  ;;  %v932_v54 = vsub.f32 %v1270_v31, %v929_v51  ;;  %v933_v55 = vsub.f32 %v1272_v35, %v929_v51 }
 0x143   :  { %v934_v56 = vmul.f32 %v930_v52, %v930_v52  ;;  %v935_v57 = vmul.f32 %v931_v53, %v931_v53  ;;  %v936_v58 = vmul.f32 %v932_v54, %v932_v54  ;;  %v937_v59 = vmul.f32 %v933_v55, %v933_v55 }
 0x145   :  { %v938_v60 = vsel %vm95_vm0, %v934_v56, 0.0  ;;  %v939_v61 = vsel %vm95_vm0, %v935_v57, 0.0  ;;  %v941_v63 = vsel %vm95_vm0, %v936_v58, 0.0  ;;  %v943_v1 = vsel %vm95_vm0, %v937_v59, 0.0 }
 0x146   :  { %v940_v62 = vadd.f32 %v939_v61, %v938_v60 }
 0x148   :  { %v942_v0 = vadd.f32 %v941_v63, %v940_v62 }
 0x14a   :  { %v944_v2 = vadd.f32 %v943_v1, %v942_v0 }
 0x14c   :  { %v945_v3 = vrot.slane %v944_v2, 4 }
 0x14e   :  { %v946_v4 = vadd.f32 %v945_v3, %v944_v2 }
 0x150   :  { %v947_v5 = vrot.slane %v946_v4, 2 }
 0x152   :  { %v948_v6 = vadd.f32 %v947_v5, %v946_v4 }
 0x154   :  { %v949_v7 = vrot.slane %v948_v6, 1 }
 0x156   :  { %v950_v8 = vadd.f32 %v949_v7, %v948_v6 }
 0x158   :  { %v951_v9 = vmul.f32 0.03125, %v950_v8 }
 0x15a   :  { %v953_v10 = vadd.f32 1e-05, %v951_v9 }
 0x15c   :  { %1338 = vrsqrt.f32 %v953_v10 }
 0x166   :  { %v1339_v15 = vpop.eup %1338 }
 0x167   :  { %v955_v16 = vmul.f32 %v1339_v15, %v952_v13 }
 0x169   :  { %v960_v17 = vrot.slane %v955_v16, %v959_v14 }
 0x16b   :  { %v962_v19 = vmul.f32 %v960_v17, %v930_v52  ;;  %v963_v20 = vmul.f32 %v960_v17, %v931_v53  ;;  %v964_v21 = vmul.f32 %v960_v17, %v932_v54  ;;  %v965_v22 = vmul.f32 %v960_v17, %v933_v55 }
 0x16d   :  { %v973_v23 = vadd.f32 %v1107_v18, %v962_v19  ;;  %v974_v24 = vadd.f32 %v1107_v18, %v963_v20  ;;  %v975_v25 = vadd.f32 %v1107_v18, %v964_v21  ;;  %v976_v26 = vadd.f32 %v1107_v18, %v965_v22 }
 0x16f   :  { %v977_v27 = vmax.f32 %v973_v23, 0.0  ;;  %v978_v28 = vmax.f32 %v974_v24, 0.0  ;;  %v979_v29 = vmax.f32 %v975_v25, 0.0  ;;  %v980_v30 = vmax.f32 %v976_v26, 0.0 }
 0x171   :  { %981 = vst.msk [vmem:[%s1681_s12] sm:$0xff] %vm95_vm0, %v977_v27  ;;  %982 = vst.msk [vmem:[%s1681_s12 + $0x8] sm:$0xff] %vm95_vm0, %v978_v28 }
 0x172   :  { %983 = vst.msk [vmem:[%s1681_s12 + $0x10] sm:$0xff] %vm95_vm0, %v979_v29  ;;  %984 = vst.msk [vmem:[%s1681_s12 + $0x18] sm:$0xff] %vm95_vm0, %v980_v30 }

// kernel: encoder_forward.13
= control target key start
LH: loop header
LB: loop body
LE: loop exit
PB: predicated region body
PF: predicated region fallthrough
CT: control target
= control target key end

     0   :  { %vm98_vm0 = vcmask 523264   ;;  %s1697_s9 = inlined_call_operand.vmem [shape: bf16[9,64,64], index: 9, kind: input, shape index: {}]   ;;  %s1698_s1 = inlined_call_operand.vmem [shape: f32[32,64], index: 1, kind: input, shape index: {}]   ;;  %s1699_s4 = inlined_call_operand.vmem [shape: f32[32,64], index: 4, kind: input, shape index: {}]   ;;  %s1700_s0 = inlined_call_operand.vmem [shape: f32[32,64], index: 0, kind: input, shape index: {}]   ;;  %s1701_s5 = inlined_call_operand.vmem [shape: f32[32,64], index: 5, kind: input, shape index: {}]   ;;  %s1702_s2 = inlined_call_operand.vmem [shape: f32[32,64], index: 2, kind: input, shape index: {}]   ;;  %s1703_s6 = inlined_call_operand.vmem [shape: f32[32,64], index: 6, kind: input, shape index: {}]   ;;  %s1704_s3 = inlined_call_operand.vmem [shape: f32[32,64], index: 3, kind: input, shape index: {}]   ;;  %s1705_s7 = inlined_call_operand.vmem [shape: f32[32,64], index: 7, kind: input, shape index: {}]   ;;  %s1706_s8 = inlined_call_operand.vmem [shape: f32[32,64], index: 8, kind: input, shape index: {}]   ;;  %s1707_s10 = inlined_call_operand.vmem [shape: f32[1,64], index: 10, kind: input, shape index: {}]   ;;  %s1708_s11 = inlined_call_operand.vmem [shape: f32[1,64], index: 11, kind: input, shape index: {}]   ;;  %s1709_s12 = inlined_call_operand.vmem [shape: f32[32,64], index: 12, kind: input, shape index: {}]   ;;  %s1710_s13 = inlined_call_operand.vmem [shape: f32[32,64], index: 13, kind: output, shape index: {}]  }
   0x1   :  { %v1313_v0 = vld [vmem:[%s1697_s9 + $0x20] sm:$0xff]   ;;  %v1315_v2 = vld [vmem:[%s1697_s9 + $0x28] sm:$0xff]   ;;  %v1317_v4 = vld [vmem:[%s1697_s9 + $0x30] sm:$0xff]  }
   0x2   :  { %v1314_v1 = vld [vmem:[%s1697_s9 + $0x80] sm:$0xff]   ;;  %1173 = vmatprep.subr.bf16.mxu1 %v1313_v0  ;;  %v1316_v3 = vld [vmem:[%s1697_s9 + $0x88] sm:$0xff]   ;;  %v1318_v5 = vld [vmem:[%s1697_s9 + $0x90] sm:$0xff]  }
   0x3   :  { %1221 = vmatprep.subr.bf16.mxu0 %v1314_v1  ;;  %1174 = vmatpush3.bf16.msra.mxu1 %v1313_v0  ;;  %v1319_v6 = vld [vmem:[%s1697_s9 + $0x38] sm:$0xff]   ;;  %v59_v7 = vld [vmem:[%s1698_s1] sm:$0xff]  ;;  %v60_v8 = vld [vmem:[%s1698_s1 + $0x8] sm:$0xff] }
   0x4   :  { %1222 = vmatpush3.bf16.msra.mxu0 %v1314_v1  ;;  %1175 = vmatprep.subr.bf16.mxu1 %v1315_v2  ;;  %v1320_v9 = vld [vmem:[%s1697_s9 + $0x98] sm:$0xff]   ;;  %v63_v10 = vpack.c.bf16 %v60_v8, %v59_v7  ;;  %v429_v11 = vld [vmem:[%s1699_s4] sm:$0xff]  ;;  %v430_v12 = vld [vmem:[%s1699_s4 + $0x8] sm:$0xff] }
   0x5   :  { %1223 = vmatprep.subr.bf16.mxu0 %v1316_v3  ;;  %v1321_v13 = vld [vmem:[%s1697_s9] sm:$0xff]   ;;  %v433_v14 = vpack.c.bf16 %v430_v12, %v429_v11  ;;  %v61_v15 = vld [vmem:[%s1698_s1 + $0x10] sm:$0xff]  ;;  %v62_v16 = vld [vmem:[%s1698_s1 + $0x18] sm:$0xff] }
   0x6   :  { %1181 = vmatprep.mubr.msk.bf16.mxu1 %vm98_vm0, %v63_v10  ;;  %v431_v17 = vld [vmem:[%s1699_s4 + $0x10] sm:$0xff]  ;;  %v432_v18 = vld [vmem:[%s1699_s4 + $0x18] sm:$0xff]  ;;  %v1322_v19 = vld [vmem:[%s1697_s9 + $0xa0] sm:$0xff]   ;;  %v64_v20 = vpack.c.bf16 %v62_v16, %v61_v15 }
   0x7   :  { %1176 = vmatpush3.bf16.msra.mxu1 %v1315_v2  ;;  %1229 = vmatprep.mubr.msk.bf16.mxu0 %vm98_vm0, %v433_v14  ;;  %v434_v21 = vpack.c.bf16 %v432_v18, %v431_v17  ;;  %v1323_v22 = vld [vmem:[%s1697_s9 + $0x8] sm:$0xff]   ;;  %v45_v24 = vld [vmem:[%s1700_s0] sm:$0xff]  ;;  %v1325_v26 = vld [vmem:[%s1697_s9 + $0x10] sm:$0xff]  }
   0x8   :  { %1224 = vmatpush3.bf16.msra.mxu0 %v1316_v3  ;;  %1177 = vmatprep.subr.bf16.mxu1 %v1317_v4  ;;  %v1324_v23 = vld [vmem:[%s1697_s9 + $0xa8] sm:$0xff]   ;;  %v527_v28 = vld [vmem:[%s1701_s5] sm:$0xff]  ;;  %v1326_v30 = vld [vmem:[%s1697_s9 + $0xb0] sm:$0xff]  }
   0x9   :  { %1225 = vmatprep.subr.bf16.mxu0 %v1318_v5  ;;  %v46_v25 = vld [vmem:[%s1700_s0 + $0x8] sm:$0xff]  ;;  %v1327_v32 = vld [vmem:[%s1697_s9 + $0x18] sm:$0xff]   ;;  %v47_v34 = vld [vmem:[%s1700_s0 + $0x10] sm:$0xff] }
   0xa   :  { %v49_v27 = vpack.c.bf16 %v46_v25, %v45_v24  ;;  %v528_v29 = vld [vmem:[%s1701_s5 + $0x8] sm:$0xff]  ;;  %v1328_v33 = vld [vmem:[%s1697_s9 + $0xb8] sm:$0xff]   ;;  %v1329_v35 = vld [vmem:[%s1697_s9 + $0x40] sm:$0xff]  }
   0xb   :  { %1178 = vmatpush3.bf16.msra.mxu1 %v1317_v4  ;;  %v531_v31 = vpack.c.bf16 %v528_v29, %v527_v28  ;;  %v48_v36 = vld [vmem:[%s1700_s0 + $0x18] sm:$0xff]  ;;  %v529_v37 = vld [vmem:[%s1701_s5 + $0x10] sm:$0xff]  ;;  %v1330_v39 = vld [vmem:[%s1697_s9 + $0xc0] sm:$0xff]  }
   0xc   :  { %1226 = vmatpush3.bf16.msra.mxu0 %v1318_v5  ;;  %1179 = vmatprep.subr.bf16.mxu1 %v1319_v6  ;;  %v530_v38 = vld [vmem:[%s1701_s5 + $0x18] sm:$0xff]  ;;  %v233_v40 = vld [vmem:[%s1702_s2] sm:$0xff]  ;;  %v50_v41 = vpack.c.bf16 %v48_v36, %v47_v34  ;;  %v234_v42 = vld [vmem:[%s1702_s2 + $0x8] sm:$0xff] }
   0xd   :  { %1227 = vmatprep.subr.bf16.mxu0 %v1320_v9  ;;  %v532_v43 = vpack.c.bf16 %v530_v38, %v529_v37  ;;  %v625_v44 = vld [vmem:[%s1703_s6] sm:$0xff]  ;;  %v626_v45 = vld [vmem:[%s1703_s6 + $0x8] sm:$0xff]  ;;  %v237_v48 = vpack.c.bf16 %v234_v42, %v233_v40  ;;  %v1333_v50 = vld [vmem:[%s1697_s9 + $0x50] sm:$0xff]  }
   0xe   :  { %v1331_v46 = vld [vmem:[%s1697_s9 + $0x48] sm:$0xff]   ;;  %v629_v49 = vpack.c.bf16 %v626_v45, %v625_v44  ;;  %v1334_v51 = vld [vmem:[%s1697_s9 + $0xd0] sm:$0xff]   ;;  %v1335_v52 = vld [vmem:[%s1697_s9 + $0x58] sm:$0xff]  }
   0xf   :  { %1180 = vmatpush3.bf16.msra.mxu1 %v1319_v6  ;;  %v1332_v47 = vld [vmem:[%s1697_s9 + $0xc8] sm:$0xff]   ;;  %v1336_v53 = vld [vmem:[%s1697_s9 + $0xd8] sm:$0xff]   ;;  %v1337_v54 = vld [vmem:[%s1697_s9 + $0x60] sm:$0xff]  }
  0x10   :  { %1228 = vmatpush3.bf16.msra.mxu0 %v1320_v9  ;;  %1185 = vmatprep.subr.bf16.mxu1 %v1321_v13  ;;  %v235_v55 = vld [vmem:[%s1702_s2 + $0x10] sm:$0xff]  ;;  %v236_v56 = vld [vmem:[%s1702_s2 + $0x18] sm:$0xff]  ;;  %v1338_v59 = vld [vmem:[%s1697_s9 + $0xe0] sm:$0xff]  }
  0x11   :  { %1233 = vmatprep.subr.bf16.mxu0 %v1322_v19  ;;  %v627_v57 = vld [vmem:[%s1703_s6 + $0x10] sm:$0xff]  ;;  %v628_v58 = vld [vmem:[%s1703_s6 + $0x18] sm:$0xff]  ;;  %v238_v60 = vpack.c.bf16 %v236_v56, %v235_v55  ;;  %v331_v61 = vld [vmem:[%s1704_s3] sm:$0xff] }
  0x12   :  { %1182 = vmatmul.mubr.msk.bf16.vlgmr.msra.gmra.mrb[0].mxu1 %vm98_vm0, %v64_v20  ;;  %v332_v62 = vld [vmem:[%s1704_s3 + $0x8] sm:$0xff]  ;;  %v630_v63 = vpack.c.bf16 %v628_v58, %v627_v57  ;;  %v723_v0 = vld [vmem:[%s1705_s7] sm:$0xff]  ;;  %v1341_v6 = vld [vmem:[%s1697_s9 + $0x70] sm:$0xff]  }
  0x13   :  { %1186 = vmatpush3.bf16.msra.mxu1 %v1321_v13  ;;  %1230 = vmatmul.mubr.msk.bf16.vlgmr.msra.gmra.mrb[0].mxu0 %vm98_vm0, %v434_v21  ;;  %v724_v1 = vld [vmem:[%s1705_s7 + $0x8] sm:$0xff]  ;;  %v335_v4 = vpack.c.bf16 %v332_v62, %v331_v61  ;;  %v1342_v7 = vld [vmem:[%s1697_s9 + $0xf0] sm:$0xff]   ;;  %v1343_v8 = vld [vmem:[%s1697_s9 + $0x78] sm:$0xff]  }
  0x14   :  { %1234 = vmatpush3.bf16.msra.mxu0 %v1322_v19  ;;  %1187 = vmatprep.subr.bf16.mxu1 %v1323_v22  ;;  %v1339_v2 = vld [vmem:[%s1697_s9 + $0x68] sm:$0xff]   ;;  %v727_v5 = vpack.c.bf16 %v724_v1, %v723_v0  ;;  %v1344_v9 = vld [vmem:[%s1697_s9 + $0xf8] sm:$0xff]   ;;  %v333_v10 = vld [vmem:[%s1704_s3 + $0x10] sm:$0xff] }
  0x15   :  { %1235 = vmatprep.subr.bf16.mxu0 %v1324_v23  ;;  %1193 = vmatprep.mubr.msk.bf16.mxu1 %vm98_vm0, %v49_v27  ;;  %v1340_v3 = vld [vmem:[%s1697_s9 + $0xe8] sm:$0xff]   ;;  %v334_v11 = vld [vmem:[%s1704_s3 + $0x18] sm:$0xff]  ;;  %v725_v12 = vld [vmem:[%s1705_s7 + $0x10] sm:$0xff] }
  0x16   :  { %1241 = vmatprep.mubr.msk.bf16.mxu0 %vm98_vm0, %v531_v31  ;;  %v726_v13 = vld [vmem:[%s1705_s7 + $0x18] sm:$0xff]  ;;  %v1345_v14 = vld [vmem:[%s1697_s9 + $0x100] sm:$0xff]   ;;  %v822_v16 = vld [vmem:[%s1706_s8 + $0x8] sm:$0xff]  ;;  %v336_v17 = vpack.c.bf16 %v334_v11, %v333_v10  ;;  %v960_v11 = vlaneseq }
  0x17   :  { %1188 = vmatpush3.bf16.msra.mxu1 %v1323_v22  ;;  %v821_v15 = vld [vmem:[%s1706_s8] sm:$0xff]  ;;  %v728_v18 = vpack.c.bf16 %v726_v13, %v725_v12  ;;  %v1346_v20 = vld [vmem:[%s1697_s9 + $0x108] sm:$0xff]   ;;  %v1347_v21 = vld [vmem:[%s1697_s9 + $0x110] sm:$0xff]  }
  0x18   :  { %1236 = vmatpush3.bf16.msra.mxu0 %v1324_v23  ;;  %1189 = vmatprep.subr.bf16.mxu1 %v1325_v26  ;;  %v825_v19 = vpack.c.bf16 %v822_v16, %v821_v15  ;;  %v1348_v22 = vld [vmem:[%s1697_s9 + $0x118] sm:$0xff]   ;;  %v823_v23 = vld [vmem:[%s1706_s8 + $0x10] sm:$0xff]  ;;  %v961_v12 = vshrl.u32 %v960_v11, 7  ;;  %v955_v13 = vld [vmem:[%s1707_s10] sm:$0x1] }
  0x19   :  { %1237 = vmatprep.subr.bf16.mxu0 %v1326_v30  ;;  %v824_v24 = vld [vmem:[%s1706_s8 + $0x18] sm:$0xff] }
  0x1a   :  { %v826_v25 = vpack.c.bf16 %v824_v24, %v823_v23  ;;  %v980_v23 = vld [vmem:[%s1709_s12] sm:$0xff]  ;;  %v981_v24 = vld [vmem:[%s1709_s12 + $0x8] sm:$0xff] }
  0x1b   :  { %1190 = vmatpush3.bf16.msra.mxu1 %v1325_v26 }
  0x1c   :  { %1238 = vmatpush3.bf16.msra.mxu0 %v1326_v30  ;;  %1191 = vmatprep.subr.bf16.mxu1 %v1327_v32 }
  0x1d   :  { %1239 = vmatprep.subr.bf16.mxu0 %v1328_v33 }
  0x1f   :  { %1192 = vmatpush3.bf16.msra.mxu1 %v1327_v32 }
  0x20   :  { %1240 = vmatpush3.bf16.msra.mxu0 %v1328_v33  ;;  %1197 = vmatprep.subr.bf16.mxu1 %v1329_v35 }
  0x21   :  { %1245 = vmatprep.subr.bf16.mxu0 %v1330_v39 }
  0x22   :  { %1194 = vmatmul.mubr.msk.bf16.vlgmr.msra.gmra.mrb[0].mxu1 %vm98_vm0, %v50_v41 }
  0x23   :  { %1198 = vmatpush3.bf16.msra.mxu1 %v1329_v35  ;;  %1242 = vmatmul.mubr.msk.bf16.vlgmr.msra.gmra.mrb[0].mxu0 %vm98_vm0, %v532_v43 }
  0x24   :  { %1246 = vmatpush3.bf16.msra.mxu0 %v1330_v39  ;;  %1199 = vmatprep.subr.bf16.mxu1 %v1331_v46 }
  0x25   :  { %1247 = vmatprep.subr.bf16.mxu0 %v1332_v47  ;;  %1205 = vmatprep.mubr.msk.bf16.mxu1 %vm98_vm0, %v237_v48 }
  0x26   :  { %1253 = vmatprep.mubr.msk.bf16.mxu0 %vm98_vm0, %v629_v49 }
  0x27   :  { %1200 = vmatpush3.bf16.msra.mxu1 %v1331_v46 }
  0x28   :  { %1248 = vmatpush3.bf16.msra.mxu0 %v1332_v47  ;;  %1201 = vmatprep.subr.bf16.mxu1 %v1333_v50 }
  0x29   :  { %1249 = vmatprep.subr.bf16.mxu0 %v1334_v51 }
  0x2b   :  { %1202 = vmatpush3.bf16.msra.mxu1 %v1333_v50 }
  0x2c   :  { %1250 = vmatpush3.bf16.msra.mxu0 %v1334_v51  ;;  %1203 = vmatprep.subr.bf16.mxu1 %v1335_v52 }
  0x2d   :  { %1251 = vmatprep.subr.bf16.mxu0 %v1336_v53 }
  0x2f   :  { %1204 = vmatpush3.bf16.msra.mxu1 %v1335_v52 }
  0x30   :  { %1252 = vmatpush3.bf16.msra.mxu0 %v1336_v53  ;;  %1209 = vmatprep.subr.bf16.mxu1 %v1337_v54 }
  0x31   :  { %1257 = vmatprep.subr.bf16.mxu0 %v1338_v59 }
  0x32   :  { %1206 = vmatmul.mubr.msk.bf16.vlgmr.msra.gmra.mrb[0].mxu1 %vm98_vm0, %v238_v60 }
  0x33   :  { %1210 = vmatpush3.bf16.msra.mxu1 %v1337_v54  ;;  %1254 = vmatmul.mubr.msk.bf16.vlgmr.msra.gmra.mrb[0].mxu0 %vm98_vm0, %v630_v63 }
  0x34   :  { %1258 = vmatpush3.bf16.msra.mxu0 %v1338_v59  ;;  %1211 = vmatprep.subr.bf16.mxu1 %v1339_v2 }
  0x35   :  { %1259 = vmatprep.subr.bf16.mxu0 %v1340_v3  ;;  %1217 = vmatprep.mubr.msk.bf16.mxu1 %vm98_vm0, %v335_v4 }
  0x36   :  { %1265 = vmatprep.mubr.msk.bf16.mxu0 %vm98_vm0, %v727_v5 }
  0x37   :  { %1212 = vmatpush3.bf16.msra.mxu1 %v1339_v2 }
  0x38   :  { %1260 = vmatpush3.bf16.msra.mxu0 %v1340_v3  ;;  %1213 = vmatprep.subr.bf16.mxu1 %v1341_v6 }
  0x39   :  { %1261 = vmatprep.subr.bf16.mxu0 %v1342_v7 }
  0x3b   :  { %1214 = vmatpush3.bf16.msra.mxu1 %v1341_v6 }
  0x3c   :  { %1262 = vmatpush3.bf16.msra.mxu0 %v1342_v7  ;;  %1215 = vmatprep.subr.bf16.mxu1 %v1343_v8 }
  0x3d   :  { %1263 = vmatprep.subr.bf16.mxu0 %v1344_v9 }
  0x3f   :  { %1216 = vmatpush3.bf16.msra.mxu1 %v1343_v8 }
  0x40   :  { %1264 = vmatpush3.bf16.msra.mxu0 %v1344_v9 }
  0x41   :  { %1269 = vmatprep.subr.bf16.mxu0 %v1345_v14 }
  0x42   :  { %1218 = vmatmul.mubr.msk.bf16.vlgmr.msra.gmra.mrb[0].mxu1 %vm98_vm0, %v336_v17 }
  0x43   :  { %1266 = vmatmul.mubr.msk.bf16.vlgmr.msra.gmra.mrb[0].mxu0 %vm98_vm0, %v728_v18  ;;  %v1118_v18 = vld [vmem:[%s1708_s11] ss:$0 sm:$0xff] }
  0x44   :  { %1270 = vmatpush3.bf16.msra.mxu0 %v1345_v14  ;;  %1277 = vmatprep.mubr.msk.bf16.mxu0 %vm98_vm0, %v825_v19  ;;  %v962_v14 = vsub.s32 0, %v961_v12 }
  0x45   :  { %1271 = vmatprep.subr.bf16.mxu0 %v1346_v20 }
  0x48   :  { %1272 = vmatpush3.bf16.msra.mxu0 %v1346_v20 }
  0x49   :  { %1273 = vmatprep.subr.bf16.mxu0 %v1347_v21 }
  0x4c   :  { %1274 = vmatpush3.bf16.msra.mxu0 %v1347_v21 }
  0x4d   :  { %1275 = vmatprep.subr.bf16.mxu0 %v1348_v22 }
  0x50   :  { %1276 = vmatpush3.bf16.msra.mxu0 %v1348_v22 }
  0x53   :  { %1278 = vmatmul.mubr.msk.bf16.vlgmr.msra.gmra.mrb[0].mxu0 %vm98_vm0, %v826_v25  ;;  %v982_v25 = vld [vmem:[%s1709_s12 + $0x10] sm:$0xff] }
 0x115   :  { %v1219_v26 = vpop.f32.mrb[0].mxu1 }
 0x116   :  { %v410_v27 = vpop.f32.mrb[1].mxu1 }
 0x117   :  { %v1220_v28 = vpop.f32.mrb[2].mxu1 }
 0x118   :  { %v413_v29 = vpop.f32.mrb[3].mxu1 }
 0x126   :  { %v1279_v30 = vpop.f32.mrb[0].mxu0 }
 0x127   :  { %v1281_v31 = vadd.f32 %v1279_v30, %v1219_v26  ;;  %v900_v32 = vpop.f32.mrb[1].mxu0  ;;  %v983_v26 = vld [vmem:[%s1709_s12 + $0x18] sm:$0xff] }
 0x128   :  { %v1282_v33 = vadd.f32 %v900_v32, %v410_v27  ;;  %v1280_v34 = vpop.f32.mrb[2].mxu0 }
 0x129   :  { %v1283_v35 = vadd.f32 %v1280_v34, %v1220_v28  ;;  %v903_v36 = vpop.f32.mrb[3].mxu0  ;;  %v922_v41 = vsel %vm98_vm0, %v1281_v31, 0.0 }
 0x12a   :  { %v1284_v37 = vadd.f32 %v903_v36, %v413_v29  ;;  %v919_v38 = vsel %vm98_vm0, %v1282_v33, 0.0 }
 0x12b   :  { %v924_v43 = vsel %vm98_vm0, %v1283_v35, 0.0 }
 0x12c   :  { %v920_v39 = vsel %vm98_vm0, %v1284_v37, 0.0 }
 0x12d   :  { %v921_v40 = vadd.f32 %v920_v39, %v919_v38 }
 0x12f   :  { %v923_v42 = vadd.f32 %v922_v41, %v921_v40 }
 0x131   :  { %v925_v44 = vadd.f32 %v924_v43, %v923_v42 }
 0x133   :  { %v926_v45 = vrot.slane %v925_v44, 4 }
 0x135   :  { %v927_v46 = vadd.f32 %v926_v45, %v925_v44 }
 0x137   :  { %v928_v47 = vrot.slane %v927_v46, 2 }
 0x139   :  { %v929_v48 = vadd.f32 %v928_v47, %v927_v46 }
 0x13b   :  { %v930_v49 = vrot.slane %v929_v48, 1 }
 0x13d   :  { %v931_v50 = vadd.f32 %v930_v49, %v929_v48 }
 0x13f   :  { %v932_v51 = vmul.f32 0.03125, %v931_v50 }
 0x141   :  { %v933_v52 = vsub.f32 %v1282_v33, %v932_v51  ;;  %v934_v53 = vsub.f32 %v1284_v37, %v932_v51  ;;  %v935_v54 = vsub.f32 %v1281_v31, %v932_v51  ;;  %v936_v55 = vsub.f32 %v1283_v35, %v932_v51 }
 0x143   :  { %v937_v56 = vmul.f32 %v933_v52, %v933_v52  ;;  %v938_v57 = vmul.f32 %v934_v53, %v934_v53  ;;  %v939_v58 = vmul.f32 %v935_v54, %v935_v54  ;;  %v940_v59 = vmul.f32 %v936_v55, %v936_v55 }
 0x145   :  { %v941_v60 = vsel %vm98_vm0, %v937_v56, 0.0  ;;  %v942_v61 = vsel %vm98_vm0, %v938_v57, 0.0  ;;  %v944_v63 = vsel %vm98_vm0, %v939_v58, 0.0  ;;  %v946_v1 = vsel %vm98_vm0, %v940_v59, 0.0 }
 0x146   :  { %v943_v62 = vadd.f32 %v942_v61, %v941_v60 }
 0x148   :  { %v945_v0 = vadd.f32 %v944_v63, %v943_v62 }
 0x14a   :  { %v947_v2 = vadd.f32 %v946_v1, %v945_v0 }
 0x14c   :  { %v948_v3 = vrot.slane %v947_v2, 4 }
 0x14e   :  { %v949_v4 = vadd.f32 %v948_v3, %v947_v2 }
 0x150   :  { %v950_v5 = vrot.slane %v949_v4, 2 }
 0x152   :  { %v951_v6 = vadd.f32 %v950_v5, %v949_v4 }
 0x154   :  { %v952_v7 = vrot.slane %v951_v6, 1 }
 0x156   :  { %v953_v8 = vadd.f32 %v952_v7, %v951_v6 }
 0x158   :  { %v954_v9 = vmul.f32 0.03125, %v953_v8 }
 0x15a   :  { %v956_v10 = vadd.f32 1e-05, %v954_v9 }
 0x15c   :  { %1349 = vrsqrt.f32 %v956_v10 }
 0x166   :  { %v1350_v15 = vpop.eup %1349 }
 0x167   :  { %v958_v16 = vmul.f32 %v1350_v15, %v955_v13 }
 0x169   :  { %v963_v17 = vrot.slane %v958_v16, %v962_v14 }
 0x16b   :  { %v965_v19 = vmul.f32 %v963_v17, %v933_v52  ;;  %v966_v20 = vmul.f32 %v963_v17, %v934_v53  ;;  %v967_v21 = vmul.f32 %v963_v17, %v935_v54  ;;  %v968_v22 = vmul.f32 %v963_v17, %v936_v55 }
 0x16d   :  { %v976_v27 = vadd.f32 %v1118_v18, %v965_v19  ;;  %v977_v28 = vadd.f32 %v1118_v18, %v966_v20  ;;  %v978_v29 = vadd.f32 %v1118_v18, %v967_v21  ;;  %v979_v30 = vadd.f32 %v1118_v18, %v968_v22 }
 0x16f   :  { %v984_v31 = vadd.f32 %v980_v23, %v976_v27  ;;  %v985_v32 = vadd.f32 %v981_v24, %v977_v28  ;;  %v986_v33 = vadd.f32 %v982_v25, %v978_v29  ;;  %v987_v34 = vadd.f32 %v983_v26, %v979_v30 }
 0x171   :  { %v988_v35 = vmax.f32 %v984_v31, 0.0  ;;  %v989_v36 = vmax.f32 %v985_v32, 0.0  ;;  %v990_v37 = vmax.f32 %v986_v33, 0.0  ;;  %v991_v38 = vmax.f32 %v987_v34, 0.0 }
 0x173   :  { %992 = vst.msk [vmem:[%s1710_s13] sm:$0xff] %vm98_vm0, %v988_v35  ;;  %993 = vst.msk [vmem:[%s1710_s13 + $0x8] sm:$0xff] %vm98_vm0, %v989_v36 }
 0x174   :  { %994 = vst.msk [vmem:[%s1710_s13 + $0x10] sm:$0xff] %vm98_vm0, %v990_v37  ;;  %995 = vst.msk [vmem:[%s1710_s13 + $0x18] sm:$0xff] %vm98_vm0, %v991_v38 }

// kernel: encoder_forward.16
= control target key start
LH: loop header
LB: loop body
LE: loop exit
PB: predicated region body
PF: predicated region fallthrough
CT: control target
= control target key end

     0   :  { %v1296_v1 = vmov 0   ;;  %vm105_vm0 = vcmask 523264   ;;  %s1641_s9 = inlined_call_operand.vmem [shape: bf16[9,64,256], index: 9, kind: input, shape index: {}]   ;;  %s1642_s1 = inlined_call_operand.vmem [shape: f32[8,64], index: 1, kind: input, shape index: {}]   ;;  %s1643_s4 = inlined_call_operand.vmem [shape: f32[8,64], index: 4, kind: input, shape index: {}]   ;;  %s1644_s0 = inlined_call_operand.vmem [shape: f32[8,64], index: 0, kind: input, shape index: {}]   ;;  %s1645_s5 = inlined_call_operand.vmem [shape: f32[8,64], index: 5, kind: input, shape index: {}]   ;;  %s1646_s2 = inlined_call_operand.vmem [shape: f32[8,64], index: 2, kind: input, shape index: {}]   ;;  %s1647_s6 = inlined_call_operand.vmem [shape: f32[8,64], index: 6, kind: input, shape index: {}]   ;;  %s1648_s3 = inlined_call_operand.vmem [shape: f32[8,64], index: 3, kind: input, shape index: {}]   ;;  %s1649_s7 = inlined_call_operand.vmem [shape: f32[8,64], index: 7, kind: input, shape index: {}]   ;;  %s1650_s8 = inlined_call_operand.vmem [shape: f32[8,64], index: 8, kind: input, shape index: {}]   ;;  %s1651_s10 = inlined_call_operand.vmem [shape: f32[1,256], index: 10, kind: input, shape index: {}]   ;;  %s1652_s11 = inlined_call_operand.vmem [shape: f32[1,256], index: 11, kind: input, shape index: {}]   ;;  %s1653_s13 = inlined_call_operand.vmem [shape: f32[8,128], index: 13, kind: output, shape index: {1}]   ;;  %s1654_s12 = inlined_call_operand.vmem [shape: f32[8,128], index: 12, kind: output, shape index: {0}]  }
   0x1   :  { %v1184_v0 = vld [vmem:[%s1641_s9 + $0x44] ss:$8 sps:$4 sm:$0xff]   ;;  %141 = vmatprep.mubr.bf16.mxu1 %v1296_v1  ;;  %514 = vmatprep.mubr.bf16.mxu0 %v1296_v1  ;;  %v1188_v3 = vld [vmem:[%s1641_s9 + $0x40] ss:$8 sps:$4 sm:$0xff]   ;;  %v1190_v5 = vld [vmem:[%s1641_s9 + $0x54] ss:$8 sps:$4 sm:$0xff]  }
   0x2   :  { %v1186_v2 = vld [vmem:[%s1641_s9 + $0x104] ss:$8 sps:$4 sm:$0xff]   ;;  %109 = vmatprep.subr.bf16.mxu1 %v1184_v0  ;;  %v1189_v4 = vld [vmem:[%s1641_s9 + $0x100] ss:$8 sps:$4 sm:$0xff]   ;;  %v1192_v6 = vld [vmem:[%s1641_s9 + $0x114] ss:$8 sps:$4 sm:$0xff]  }
   0x3   :  { %482 = vmatprep.subr.bf16.mxu0 %v1186_v2  ;;  %110 = vmatpush1.bf16.msra.mxu1 %v1188_v3  ;;  %v1194_v7 = vld [vmem:[%s1641_s9 + $0x50] ss:$8 sps:$4 sm:$0xff]   ;;  %v1196_v9 = vld [vmem:[%s1641_s9 + $0x64] ss:$8 sps:$4 sm:$0xff]   ;;  %v1200_v11 = vld [vmem:[%s1641_s9 + $0x60] ss:$8 sps:$4 sm:$0xff]  }
   0x4   :  { %483 = vmatpush1.bf16.msra.mxu0 %v1189_v4  ;;  %111 = vmatprep.subr.bf16.mxu1 %v1190_v5  ;;  %v1195_v8 = vld [vmem:[%s1641_s9 + $0x110] ss:$8 sps:$4 sm:$0xff]   ;;  %v1198_v10 = vld [vmem:[%s1641_s9 + $0x124] ss:$8 sps:$4 sm:$0xff]   ;;  %v1201_v12 = vld [vmem:[%s1641_s9 + $0x120] ss:$8 sps:$4 sm:$0xff]  }
   0x5   :  { %484 = vmatprep.subr.bf16.mxu0 %v1192_v6  ;;  %v1202_v13 = vld [vmem:[%s1641_s9 + $0x74] ss:$8 sps:$4 sm:$0xff]   ;;  %v1206_v15 = vld [vmem:[%s1641_s9 + $0x70] ss:$8 sps:$4 sm:$0xff]   ;;  %v1210_v17 = vld [vmem:[%s1641_s9 + $0x4] ss:$8 sps:$4 sm:$0xff]  }
   0x6   :  { %v1204_v14 = vld [vmem:[%s1641_s9 + $0x134] ss:$8 sps:$4 sm:$0xff]   ;;  %v1207_v16 = vld [vmem:[%s1641_s9 + $0x130] ss:$8 sps:$4 sm:$0xff]   ;;  %v1213_v18 = vld [vmem:[%s1641_s9 + $0x144] ss:$8 sps:$4 sm:$0xff]  }
   0x7   :  { %112 = vmatpush1.bf16.msra.mxu1 %v1194_v7  ;;  %v54_v19 = vld [vmem:[%s1642_s1] sm:$0xff]  ;;  %v1216_v25 = vld [vmem:[%s1641_s9 + $0x14] ss:$8 sps:$4 sm:$0xff]   ;;  %v1214_v27 = vld [vmem:[%s1641_s9 + $0x10] ss:$8 sps:$4 sm:$0xff]  }
   0x8   :  { %485 = vmatpush1.bf16.msra.mxu0 %v1195_v8  ;;  %113 = vmatprep.subr.bf16.mxu1 %v1196_v9  ;;  %v428_v20 = vld [vmem:[%s1643_s4] sm:$0xff]  ;;  %v55_v21 = vpack.c.bf16 %v54_v19, %v54_v19  ;;  %v1219_v26 = vld [vmem:[%s1641_s9 + $0x154] ss:$8 sps:$4 sm:$0xff]   ;;  %v1217_v28 = vld [vmem:[%s1641_s9 + $0x150] ss:$8 sps:$4 sm:$0xff]  }
   0x9   :  { %486 = vmatprep.subr.bf16.mxu0 %v1198_v10  ;;  %v429_v22 = vpack.c.bf16 %v428_v20, %v428_v20  ;;  %v1208_v23 = vld [vmem:[%s1641_s9] ss:$8 sps:$4 sm:$0xff]   ;;  %v1222_v29 = vld [vmem:[%s1641_s9 + $0x24] ss:$8 sps:$4 sm:$0xff]   ;;  %v1228_v33 = vld [vmem:[%s1641_s9 + $0x34] ss:$8 sps:$4 sm:$0xff]  }
   0xa   :  { %v1211_v24 = vld [vmem:[%s1641_s9 + $0x140] ss:$8 sps:$4 sm:$0xff]   ;;  %v1225_v30 = vld [vmem:[%s1641_s9 + $0x164] ss:$8 sps:$4 sm:$0xff]   ;;  %v1231_v34 = vld [vmem:[%s1641_s9 + $0x174] ss:$8 sps:$4 sm:$0xff]  }
   0xb   :  { %114 = vmatpush1.bf16.msra.mxu1 %v1200_v11  ;;  %v1220_v31 = vld [vmem:[%s1641_s9 + $0x20] ss:$8 sps:$4 sm:$0xff]   ;;  %v1226_v35 = vld [vmem:[%s1641_s9 + $0x30] ss:$8 sps:$4 sm:$0xff]   ;;  %v1234_v37 = vld [vmem:[%s1641_s9 + $0x84] ss:$8 sps:$4 sm:$0xff]  }
   0xc   :  { %487 = vmatpush1.bf16.msra.mxu0 %v1201_v12  ;;  %115 = vmatprep.subr.bf16.mxu1 %v1202_v13  ;;  %v1223_v32 = vld [vmem:[%s1641_s9 + $0x160] ss:$8 sps:$4 sm:$0xff]   ;;  %v1229_v36 = vld [vmem:[%s1641_s9 + $0x170] ss:$8 sps:$4 sm:$0xff]   ;;  %v1237_v40 = vld [vmem:[%s1641_s9 + $0x184] ss:$8 sps:$4 sm:$0xff]  }
   0xd   :  { %488 = vmatprep.subr.bf16.mxu0 %v1204_v14  ;;  %v44_v38 = vld [vmem:[%s1644_s0] sm:$0xff]  ;;  %v1240_v45 = vld [vmem:[%s1641_s9 + $0x94] ss:$8 sps:$4 sm:$0xff]   ;;  %v1238_v47 = vld [vmem:[%s1641_s9 + $0x90] ss:$8 sps:$4 sm:$0xff]  }
   0xe   :  { %v525_v39 = vld [vmem:[%s1645_s5] sm:$0xff]  ;;  %v45_v43 = vpack.c.bf16 %v44_v38, %v44_v38  ;;  %v1243_v46 = vld [vmem:[%s1641_s9 + $0x194] ss:$8 sps:$4 sm:$0xff]   ;;  %v1241_v48 = vld [vmem:[%s1641_s9 + $0x190] ss:$8 sps:$4 sm:$0xff]  }
   0xf   :  { %116 = vmatpush1.bf16.msra.mxu1 %v1206_v15  ;;  %v1232_v41 = vld [vmem:[%s1641_s9 + $0x80] ss:$8 sps:$4 sm:$0xff]   ;;  %v526_v44 = vpack.c.bf16 %v525_v39, %v525_v39  ;;  %v1246_v49 = vld [vmem:[%s1641_s9 + $0xa4] ss:$8 sps:$4 sm:$0xff]   ;;  %v1252_v53 = vld [vmem:[%s1641_s9 + $0xb4] ss:$8 sps:$4 sm:$0xff]  }
  0x10   :  { %489 = vmatpush1.bf16.msra.mxu0 %v1207_v16  ;;  %193 = vmatprep.subr.bf16.mxu1 %v1210_v17  ;;  %v1235_v42 = vld [vmem:[%s1641_s9 + $0x180] ss:$8 sps:$4 sm:$0xff]   ;;  %v1249_v50 = vld [vmem:[%s1641_s9 + $0x1a4] ss:$8 sps:$4 sm:$0xff]   ;;  %v1255_v54 = vld [vmem:[%s1641_s9 + $0x1b4] ss:$8 sps:$4 sm:$0xff]  }
  0x11   :  { %579 = vmatprep.subr.bf16.mxu0 %v1213_v18  ;;  %v1244_v51 = vld [vmem:[%s1641_s9 + $0xa0] ss:$8 sps:$4 sm:$0xff]   ;;  %v1250_v55 = vld [vmem:[%s1641_s9 + $0xb0] ss:$8 sps:$4 sm:$0xff]   ;;  %v1258_v57 = vld [vmem:[%s1641_s9 + $0xc4] ss:$8 sps:$4 sm:$0xff]  }
  0x12   :  { %1023 = vmatmul.mubr.msk.bf16.vlgmr.msra.gmra.mrb[0].mxu1 %vm105_vm0, %v55_v21  ;;  %v1247_v52 = vld [vmem:[%s1641_s9 + $0x1a0] ss:$8 sps:$4 sm:$0xff]   ;;  %v1253_v56 = vld [vmem:[%s1641_s9 + $0x1b0] ss:$8 sps:$4 sm:$0xff]   ;;  %v1261_v60 = vld [vmem:[%s1641_s9 + $0x1c4] ss:$8 sps:$4 sm:$0xff]  }
  0x13   :  { %1083 = vmatmul.mubr.msk.bf16.vlgmr.msra.gmra.mrb[0].mxu0 %vm105_vm0, %v429_v22  ;;  %194 = vmatpush1.bf16.msra.mxu1 %v1208_v23  ;;  %v234_v58 = vld [vmem:[%s1646_s2] sm:$0xff]  ;;  %v1264_v2 = vld [vmem:[%s1641_s9 + $0xd4] ss:$8 sps:$4 sm:$0xff]   ;;  %v1262_v4 = vld [vmem:[%s1641_s9 + $0xd0] ss:$8 sps:$4 sm:$0xff]  }
  0x14   :  { %580 = vmatpush1.bf16.msra.mxu0 %v1211_v24  ;;  %195 = vmatprep.subr.bf16.mxu1 %v1216_v25  ;;  %v622_v59 = vld [vmem:[%s1647_s6] sm:$0xff]  ;;  %v235_v63 = vpack.c.bf16 %v234_v58, %v234_v58  ;;  %v1267_v3 = vld [vmem:[%s1641_s9 + $0x1d4] ss:$8 sps:$4 sm:$0xff]   ;;  %v1265_v5 = vld [vmem:[%s1641_s9 + $0x1d0] ss:$8 sps:$4 sm:$0xff]  }
  0x15   :  { %581 = vmatprep.subr.bf16.mxu0 %v1219_v26  ;;  %225 = vmatprep.mubr.bf16.mxu1 %v1296_v1  ;;  %v1256_v61 = vld [vmem:[%s1641_s9 + $0xc0] ss:$8 sps:$4 sm:$0xff]   ;;  %v623_v0 = vpack.c.bf16 %v622_v59, %v622_v59  ;;  %v1270_v6 = vld [vmem:[%s1641_s9 + $0xe4] ss:$8 sps:$4 sm:$0xff]   ;;  %v1276_v10 = vld [vmem:[%s1641_s9 + $0xf4] ss:$8 sps:$4 sm:$0xff]  }
  0x16   :  { %611 = vmatprep.mubr.bf16.mxu0 %v1296_v1  ;;  %v1259_v62 = vld [vmem:[%s1641_s9 + $0x1c0] ss:$8 sps:$4 sm:$0xff]   ;;  %v1273_v7 = vld [vmem:[%s1641_s9 + $0x1e4] ss:$8 sps:$4 sm:$0xff]   ;;  %v1279_v11 = vld [vmem:[%s1641_s9 + $0x1f4] ss:$8 sps:$4 sm:$0xff]  }
  0x17   :  { %196 = vmatpush1.bf16.msra.mxu1 %v1214_v27  ;;  %v1268_v8 = vld [vmem:[%s1641_s9 + $0xe0] ss:$8 sps:$4 sm:$0xff]   ;;  %v1274_v12 = vld [vmem:[%s1641_s9 + $0xf0] ss:$8 sps:$4 sm:$0xff]   ;;  %v1282_v16 = vld [vmem:[%s1641_s9 + $0x204] ss:$8 sps:$4 sm:$0xff]  }
  0x18   :  { %582 = vmatpush1.bf16.msra.mxu0 %v1217_v28  ;;  %197 = vmatprep.subr.bf16.mxu1 %v1222_v29  ;;  %v1271_v9 = vld [vmem:[%s1641_s9 + $0x1e0] ss:$8 sps:$4 sm:$0xff]   ;;  %v1277_v13 = vld [vmem:[%s1641_s9 + $0x1f0] ss:$8 sps:$4 sm:$0xff]   ;;  %v1285_v20 = vld [vmem:[%s1641_s9 + $0x214] ss:$8 sps:$4 sm:$0xff]  }
  0x19   :  { %583 = vmatprep.subr.bf16.mxu0 %v1225_v30  ;;  %v331_v14 = vld [vmem:[%s1648_s3] sm:$0xff]  ;;  %v1283_v21 = vld [vmem:[%s1641_s9 + $0x210] ss:$8 sps:$4 sm:$0xff]   ;;  %v1291_v24 = vld [vmem:[%s1641_s9 + $0x234] ss:$8 sps:$4 sm:$0xff]  }
  0x1a   :  { %v719_v15 = vld [vmem:[%s1649_s7] sm:$0xff]  ;;  %v332_v17 = vpack.c.bf16 %v331_v14, %v331_v14 }
  0x1b   :  { %198 = vmatpush1.bf16.msra.mxu1 %v1220_v31  ;;  %v720_v18 = vpack.c.bf16 %v719_v15, %v719_v15  ;;  %v1280_v19 = vld [vmem:[%s1641_s9 + $0x200] ss:$8 sps:$4 sm:$0xff]   ;;  %v1288_v22 = vld [vmem:[%s1641_s9 + $0x224] ss:$8 sps:$4 sm:$0xff]  }
  0x1c   :  { %584 = vmatpush1.bf16.msra.mxu0 %v1223_v32  ;;  %199 = vmatprep.subr.bf16.mxu1 %v1228_v33  ;;  %v1286_v23 = vld [vmem:[%s1641_s9 + $0x220] ss:$8 sps:$4 sm:$0xff]  }
  0x1d   :  { %585 = vmatprep.subr.bf16.mxu0 %v1231_v34  ;;  %v816_v25 = vld [vmem:[%s1650_s8] sm:$0xff] }
  0x1e   :  { %v817_v26 = vpack.c.bf16 %v816_v25, %v816_v25 }
  0x1f   :  { %200 = vmatpush1.bf16.msra.mxu1 %v1226_v35 }
  0x20   :  { %586 = vmatpush1.bf16.msra.mxu0 %v1229_v36  ;;  %288 = vmatprep.subr.bf16.mxu1 %v1234_v37 }
  0x21   :  { %676 = vmatprep.subr.bf16.mxu0 %v1237_v40 }
  0x22   :  { %1032 = vmatmul.mubr.msk.bf16.vlgmr.msra.gmra.mrb[0].mxu1 %vm105_vm0, %v45_v43 }
  0x23   :  { %1100 = vmatmul.mubr.msk.bf16.vlgmr.msra.gmra.mrb[0].mxu0 %vm105_vm0, %v526_v44  ;;  %289 = vmatpush1.bf16.msra.mxu1 %v1232_v41 }
  0x24   :  { %677 = vmatpush1.bf16.msra.mxu0 %v1235_v42  ;;  %290 = vmatprep.subr.bf16.mxu1 %v1240_v45 }
  0x25   :  { %678 = vmatprep.subr.bf16.mxu0 %v1243_v46  ;;  %320 = vmatprep.mubr.bf16.mxu1 %v1296_v1 }
  0x26   :  { %708 = vmatprep.mubr.bf16.mxu0 %v1296_v1 }
  0x27   :  { %291 = vmatpush1.bf16.msra.mxu1 %v1238_v47 }
  0x28   :  { %679 = vmatpush1.bf16.msra.mxu0 %v1241_v48  ;;  %292 = vmatprep.subr.bf16.mxu1 %v1246_v49 }
  0x29   :  { %680 = vmatprep.subr.bf16.mxu0 %v1249_v50 }
  0x2b   :  { %293 = vmatpush1.bf16.msra.mxu1 %v1244_v51 }
  0x2c   :  { %681 = vmatpush1.bf16.msra.mxu0 %v1247_v52  ;;  %294 = vmatprep.subr.bf16.mxu1 %v1252_v53 }
  0x2d   :  { %682 = vmatprep.subr.bf16.mxu0 %v1255_v54 }
  0x2f   :  { %295 = vmatpush1.bf16.msra.mxu1 %v1250_v55 }
  0x30   :  { %683 = vmatpush1.bf16.msra.mxu0 %v1253_v56  ;;  %385 = vmatprep.subr.bf16.mxu1 %v1258_v57 }
  0x31   :  { %773 = vmatprep.subr.bf16.mxu0 %v1261_v60 }
  0x32   :  { %1049 = vmatmul.mubr.msk.bf16.vlgmr.msra.gmra.mrb[0].mxu1 %vm105_vm0, %v235_v63 }
  0x33   :  { %1117 = vmatmul.mubr.msk.bf16.vlgmr.msra.gmra.mrb[0].mxu0 %vm105_vm0, %v623_v0  ;;  %386 = vmatpush1.bf16.msra.mxu1 %v1256_v61 }
  0x34   :  { %774 = vmatpush1.bf16.msra.mxu0 %v1259_v62  ;;  %387 = vmatprep.subr.bf16.mxu1 %v1264_v2 }
  0x35   :  { %775 = vmatprep.subr.bf16.mxu0 %v1267_v3  ;;  %417 = vmatprep.mubr.bf16.mxu1 %v1296_v1 }
  0x36   :  { %805 = vmatprep.mubr.bf16.mxu0 %v1296_v1 }
  0x37   :  { %388 = vmatpush1.bf16.msra.mxu1 %v1262_v4 }
  0x38   :  { %776 = vmatpush1.bf16.msra.mxu0 %v1265_v5  ;;  %389 = vmatprep.subr.bf16.mxu1 %v1270_v6 }
  0x39   :  { %777 = vmatprep.subr.bf16.mxu0 %v1273_v7 }
  0x3b   :  { %390 = vmatpush1.bf16.msra.mxu1 %v1268_v8  ;;  %v1297_v8 = vmov 1966171168  }
  0x3c   :  { %778 = vmatpush1.bf16.msra.mxu0 %v1271_v9  ;;  %391 = vmatprep.subr.bf16.mxu1 %v1276_v10  ;;  %v954_v9 = vunpack.c.l.s4 %v1297_v8  ;;  %v956_v10 = vlaneseq }
  0x3d   :  { %779 = vmatprep.subr.bf16.mxu0 %v1279_v11 }
  0x3e   :  { %v955_v11 = vunpack.c.0.s8 %v954_v9 }
  0x3f   :  { %392 = vmatpush1.bf16.msra.mxu1 %v1274_v12  ;;  %v957_v12 = vshrl.u32 %v956_v10, 7 }
  0x40   :  { %780 = vmatpush1.bf16.msra.mxu0 %v1277_v13 }
  0x41   :  { %870 = vmatprep.subr.bf16.mxu0 %v1282_v16  ;;  %v958_v14 = vsub.s32 %v955_v11, %v957_v12 }
  0x42   :  { %1066 = vmatmul.mubr.msk.bf16.vlgmr.msra.gmra.mrb[0].mxu1 %vm105_vm0, %v332_v17 }
  0x43   :  { %1134 = vmatmul.mubr.msk.bf16.vlgmr.msra.gmra.mrb[0].mxu0 %vm105_vm0, %v720_v18  ;;  %v945_v18 = vld [vmem:[%s1651_s10] sm:$0x3] }
  0x44   :  { %871 = vmatpush1.bf16.msra.mxu0 %v1280_v19  ;;  %902 = vmatprep.mubr.bf16.mxu0 %v1296_v1  ;;  %v1289_v1 = vld [vmem:[%s1641_s9 + $0x230] ss:$8 sps:$4 sm:$0xff]  }
  0x45   :  { %872 = vmatprep.subr.bf16.mxu0 %v1285_v20  ;;  %v972_v20 = vsub.s32 0, %v957_v12 }
  0x48   :  { %873 = vmatpush1.bf16.msra.mxu0 %v1283_v21  ;;  %v976_v21 = vsub.s32 1, %v957_v12 }
  0x49   :  { %874 = vmatprep.subr.bf16.mxu0 %v1288_v22  ;;  %v982_v22 = vld [vmem:[%s1652_s11] sm:$0x3] }
  0x4a   :  { %v987_v25 = vrot.slane %v982_v22, %v972_v20 }
  0x4c   :  { %875 = vmatpush1.bf16.msra.mxu0 %v1286_v23 }
  0x4d   :  { %876 = vmatprep.subr.bf16.mxu0 %v1291_v24 }
  0x50   :  { %877 = vmatpush1.bf16.msra.mxu0 %v1289_v1 }
  0x53   :  { %1151 = vmatmul.mubr.msk.bf16.vlgmr.msra.gmra.mrb[0].mxu0 %vm105_vm0, %v817_v26  ;;  %v991_v26 = vrot.slane %v982_v22, %v976_v21 }
 0x115   :  { %v419_v27 = vpop.f32.mrb[0].mxu1 }
 0x116   :  { %v421_v28 = vpop.f32.mrb[1].mxu1 }
 0x117   :  { %v423_v29 = vpop.f32.mrb[2].mxu1 }
 0x118   :  { %v424_v30 = vpop.f32.mrb[3].mxu1 }
 0x126   :  { %v904_v31 = vpop.f32.mrb[0].mxu0 }
 0x127   :  { %v1152_v32 = vadd.f32 %v904_v31, %v419_v27  ;;  %v906_v33 = vpop.f32.mrb[1].mxu0 }
 0x128   :  { %v1153_v34 = vadd.f32 %v906_v33, %v421_v28  ;;  %v908_v35 = vpop.f32.mrb[2].mxu0 }
 0x129   :  { %v913_v36 = vrot.slane %v1152_v32, 4  ;;  %v909_v37 = vpop.f32.mrb[3].mxu0 }
 0x12a   :  { %v919_v38 = vrot.slane %v1153_v34, 4 }
 0x12b   :  { %v914_v39 = vadd.f32 %v1152_v32, %v913_v36 }
 0x12c   :  { %v920_v40 = vadd.f32 %v1153_v34, %v919_v38 }
 0x12d   :  { %v915_v41 = vrot.slane %v914_v39, 2 }
 0x12e   :  { %v921_v42 = vrot.slane %v920_v40, 2 }
 0x12f   :  { %v916_v43 = vadd.f32 %v915_v41, %v914_v39 }
 0x130   :  { %v922_v44 = vadd.f32 %v921_v42, %v920_v40 }
 0x131   :  { %v917_v45 = vrot.slane %v916_v43, 1 }
 0x132   :  { %v923_v46 = vrot.slane %v922_v44, 1 }
 0x133   :  { %v918_v47 = vadd.f32 %v917_v45, %v916_v43 }
 0x134   :  { %v924_v48 = vadd.f32 %v923_v46, %v922_v44 }
 0x135   :  { %v925_v49 = vmul.f32 0.125, %v918_v47 }
 0x136   :  { %v926_v50 = vmul.f32 0.125, %v924_v48 }
 0x137   :  { %v927_v51 = vsub.f32 %v1152_v32, %v925_v49 }
 0x138   :  { %v928_v52 = vsub.f32 %v1153_v34, %v926_v50 }
 0x139   :  { %v929_v53 = vmul.f32 %v927_v51, %v927_v51 }
 0x13a   :  { %v930_v54 = vmul.f32 %v928_v52, %v928_v52 }
 0x13b   :  { %v931_v55 = vrot.slane %v929_v53, 4 }
 0x13c   :  { %v937_v56 = vrot.slane %v930_v54, 4 }
 0x13d   :  { %v932_v57 = vadd.f32 %v931_v55, %v929_v53 }
 0x13e   :  { %v938_v58 = vadd.f32 %v937_v56, %v930_v54 }
 0x13f   :  { %v933_v59 = vrot.slane %v932_v57, 2 }
 0x140   :  { %v939_v60 = vrot.slane %v938_v58, 2 }
 0x141   :  { %v934_v61 = vadd.f32 %v933_v59, %v932_v57 }
 0x142   :  { %v940_v62 = vadd.f32 %v939_v60, %v938_v58 }
 0x143   :  { %v935_v63 = vrot.slane %v934_v61, 1 }
 0x144   :  { %v941_v0 = vrot.slane %v940_v62, 1 }
 0x145   :  { %v936_v2 = vadd.f32 %v935_v63, %v934_v61 }
 0x146   :  { %v942_v3 = vadd.f32 %v941_v0, %v940_v62 }
 0x147   :  { %v943_v4 = vmul.f32 0.125, %v936_v2 }
 0x148   :  { %v944_v5 = vmul.f32 0.125, %v942_v3 }
 0x149   :  { %v946_v6 = vadd.f32 1e-05, %v943_v4 }
 0x14a   :  { %v947_v7 = vadd.f32 1e-05, %v944_v5 }
 0x14b   :  { %1292 = vrsqrt.f32 %v946_v6 }
 0x14c   :  { %1294 = vrsqrt.f32 %v947_v7 }
 0x155   :  { %v1293_v13 = vpop.eup %1292 }
 0x156   :  { %v1295_v15 = vpop.eup %1294 }
 0x157   :  { %v952_v16 = vcombine.low %v1293_v13, %v1295_v15 }
 0x159   :  { %v959_v17 = vrot.slane %v952_v16, %v958_v14 }
 0x15b   :  { %v966_v19 = vrot.slane %v959_v17, %v958_v14 }
 0x15d   :  { %v968_v23 = vmul.f32 %v966_v19, %v945_v18 }
 0x15f   :  { %v973_v24 = vrot.slane %v968_v23, %v972_v20  ;;  %v977_v1 = vrot.slane %v968_v23, %v976_v21 }
 0x161   :  { %v980_v27 = vmul.f32 %v973_v24, %v927_v51  ;;  %v981_v28 = vmul.f32 %v977_v1, %v928_v52 }
 0x163   :  { %v994_v29 = vadd.f32 %v987_v25, %v980_v27  ;;  %v995_v30 = vadd.f32 %v991_v26, %v981_v28 }
 0x165   :  { %v996_v31 = vmax.f32 %v994_v29, 0.0  ;;  %998 = vst [vmem:[%s1653_s13] sm:$0xff] %v995_v30 }
 0x167   :  { %997 = vst [vmem:[%s1654_s12] sm:$0xff] %v996_v31 }

// kernel: encoder_forward.17
= control target key start
LH: loop header
LB: loop body
LE: loop exit
PB: predicated region body
PF: predicated region fallthrough
CT: control target
= control target key end

     0   :  { %v1624_v0 = vmov 0.0   ;;  %vm1625_vm0 = vmmov 0   ;;  %s2041_s9 = inlined_call_operand.vmem [shape: bf16[9,128,128], index: 9, kind: input, shape index: {}]   ;;  %s2042_s1 = inlined_call_operand.vmem [shape: f32[8,128], index: 1, kind: input, shape index: {}]   ;;  %s2043_s4 = inlined_call_operand.vmem [shape: f32[8,128], index: 4, kind: input, shape index: {}]   ;;  %s2044_s0 = inlined_call_operand.vmem [shape: f32[8,128], index: 0, kind: input, shape index: {}]   ;;  %s2045_s5 = inlined_call_operand.vmem [shape: f32[8,128], index: 5, kind: input, shape index: {}]   ;;  %s2046_s2 = inlined_call_operand.vmem [shape: f32[8,128], index: 2, kind: input, shape index: {}]   ;;  %s2047_s6 = inlined_call_operand.vmem [shape: f32[8,128], index: 6, kind: input, shape index: {}]   ;;  %s2048_s3 = inlined_call_operand.vmem [shape: f32[8,128], index: 3, kind: input, shape index: {}]   ;;  %s2049_s7 = inlined_call_operand.vmem [shape: f32[8,128], index: 7, kind: input, shape index: {}]   ;;  %s2050_s8 = inlined_call_operand.vmem [shape: f32[8,128], index: 8, kind: input, shape index: {}]   ;;  %s2051_s10 = inlined_call_operand.vmem [shape: f32[1,128], index: 10, kind: input, shape index: {}]   ;;  %s2052_s11 = inlined_call_operand.vmem [shape: f32[1,128], index: 11, kind: input, shape index: {}]   ;;  %s2053_s12 = inlined_call_operand.vmem [shape: f32[8,128], index: 12, kind: input, shape index: {}]   ;;  %s2054_s13 = inlined_call_operand.vmem [shape: f32[8,128], index: 13, kind: output, shape index: {}]  }
   0x1   :  { %1339 = vmatprep.subr.bf16.mxu1 %v1624_v0  ;;  %1419 = vmatprep.subr.bf16.mxu0 %v1624_v0  ;;  %v1550_v1 = vld [vmem:[%s2041_s9 + $0x40] sm:$0xff]   ;;  %v1552_v3 = vld [vmem:[%s2041_s9 + $0x48] sm:$0xff]   ;;  %v1554_v5 = vld [vmem:[%s2041_s9 + $0x50] sm:$0xff]  }
   0x2   :  { %v1551_v2 = vld [vmem:[%s2041_s9 + $0x100] sm:$0xff]   ;;  %1355 = vmatprep.mubr.msk.bf16.mxu1 %vm1625_vm0, %v1624_v0  ;;  %1435 = vmatprep.mubr.msk.bf16.mxu0 %vm1625_vm0, %v1624_v0  ;;  %v1553_v4 = vld [vmem:[%s2041_s9 + $0x108] sm:$0xff]   ;;  %v1555_v6 = vld [vmem:[%s2041_s9 + $0x110] sm:$0xff]  }
   0x3   :  { %1340 = vmatpush3.bf16.msra.mxu1 %v1550_v1  ;;  %1420 = vmatpush3.bf16.msra.mxu0 %v1551_v2  ;;  %v1556_v7 = vld [vmem:[%s2041_s9 + $0x58] sm:$0xff]   ;;  %v1558_v9 = vld [vmem:[%s2041_s9 + $0x60] sm:$0xff]   ;;  %v1560_v11 = vld [vmem:[%s2041_s9 + $0x68] sm:$0xff]  }
   0x4   :  { %1341 = vmatprep.subr.bf16.mxu1 %v1624_v0  ;;  %1421 = vmatprep.subr.bf16.mxu0 %v1624_v0  ;;  %v1557_v8 = vld [vmem:[%s2041_s9 + $0x118] sm:$0xff]   ;;  %v1559_v10 = vld [vmem:[%s2041_s9 + $0x120] sm:$0xff]   ;;  %v1561_v12 = vld [vmem:[%s2041_s9 + $0x128] sm:$0xff]  }
   0x5   :  { %v1562_v13 = vld [vmem:[%s2041_s9 + $0x70] sm:$0xff]   ;;  %v1564_v15 = vld [vmem:[%s2041_s9 + $0x78] sm:$0xff]   ;;  %v63_v17 = vld [vmem:[%s2042_s1] sm:$0xff] }
   0x6   :  { %v1563_v14 = vld [vmem:[%s2041_s9 + $0x130] sm:$0xff]   ;;  %v1565_v16 = vld [vmem:[%s2041_s9 + $0x138] sm:$0xff]   ;;  %v474_v18 = vld [vmem:[%s2043_s4] sm:$0xff]  ;;  %v64_v19 = vpack.c.bf16 %v63_v17, %v63_v17 }
   0x7   :  { %1342 = vmatpush3.bf16.msra.mxu1 %v1552_v3  ;;  %1422 = vmatpush3.bf16.msra.mxu0 %v1553_v4  ;;  %v1566_v20 = vld [vmem:[%s2041_s9] sm:$0xff]   ;;  %v475_v21 = vpack.c.bf16 %v474_v18, %v474_v18  ;;  %v1568_v23 = vld [vmem:[%s2041_s9 + $0x8] sm:$0xff]   ;;  %v1570_v25 = vld [vmem:[%s2041_s9 + $0x10] sm:$0xff]  }
   0x8   :  { %1343 = vmatprep.subr.bf16.mxu1 %v1624_v0  ;;  %1423 = vmatprep.subr.bf16.mxu0 %v1624_v0  ;;  %v1567_v22 = vld [vmem:[%s2041_s9 + $0x140] sm:$0xff]   ;;  %v1569_v24 = vld [vmem:[%s2041_s9 + $0x148] sm:$0xff]   ;;  %v1571_v26 = vld [vmem:[%s2041_s9 + $0x150] sm:$0xff]  }
   0x9   :  { %v1572_v27 = vld [vmem:[%s2041_s9 + $0x18] sm:$0xff]   ;;  %v1574_v29 = vld [vmem:[%s2041_s9 + $0x20] sm:$0xff]   ;;  %v1576_v31 = vld [vmem:[%s2041_s9 + $0x28] sm:$0xff]  }
   0xa   :  { %v1573_v28 = vld [vmem:[%s2041_s9 + $0x158] sm:$0xff]   ;;  %v1575_v30 = vld [vmem:[%s2041_s9 + $0x160] sm:$0xff]   ;;  %v1577_v32 = vld [vmem:[%s2041_s9 + $0x168] sm:$0xff]  }
   0xb   :  { %1344 = vmatpush3.bf16.msra.mxu1 %v1554_v5  ;;  %1424 = vmatpush3.bf16.msra.mxu0 %v1555_v6  ;;  %v1578_v33 = vld [vmem:[%s2041_s9 + $0x30] sm:$0xff]   ;;  %v1580_v35 = vld [vmem:[%s2041_s9 + $0x38] sm:$0xff]   ;;  %v45_v37 = vld [vmem:[%s2044_s0] sm:$0xff] }
   0xc   :  { %1345 = vmatprep.subr.bf16.mxu1 %v1624_v0  ;;  %1425 = vmatprep.subr.bf16.mxu0 %v1624_v0  ;;  %v1579_v34 = vld [vmem:[%s2041_s9 + $0x170] sm:$0xff]   ;;  %v1581_v36 = vld [vmem:[%s2041_s9 + $0x178] sm:$0xff]   ;;  %v582_v38 = vld [vmem:[%s2045_s5] sm:$0xff]  ;;  %v46_v39 = vpack.c.bf16 %v45_v37, %v45_v37 }
   0xd   :  { %v1582_v40 = vld [vmem:[%s2041_s9 + $0x80] sm:$0xff]   ;;  %v583_v41 = vpack.c.bf16 %v582_v38, %v582_v38  ;;  %v1584_v43 = vld [vmem:[%s2041_s9 + $0x88] sm:$0xff]   ;;  %v1586_v45 = vld [vmem:[%s2041_s9 + $0x90] sm:$0xff]  }
   0xe   :  { %v1583_v42 = vld [vmem:[%s2041_s9 + $0x180] sm:$0xff]   ;;  %v1585_v44 = vld [vmem:[%s2041_s9 + $0x188] sm:$0xff]   ;;  %v1587_v46 = vld [vmem:[%s2041_s9 + $0x190] sm:$0xff]  }
   0xf   :  { %1346 = vmatpush3.bf16.msra.mxu1 %v1556_v7  ;;  %1426 = vmatpush3.bf16.msra.mxu0 %v1557_v8  ;;  %v1588_v47 = vld [vmem:[%s2041_s9 + $0x98] sm:$0xff]   ;;  %v1590_v49 = vld [vmem:[%s2041_s9 + $0xa0] sm:$0xff]   ;;  %v1592_v51 = vld [vmem:[%s2041_s9 + $0xa8] sm:$0xff]  }
  0x10   :  { %1347 = vmatprep.subr.bf16.mxu1 %v1624_v0  ;;  %1427 = vmatprep.subr.bf16.mxu0 %v1624_v0  ;;  %v1589_v48 = vld [vmem:[%s2041_s9 + $0x198] sm:$0xff]   ;;  %v1591_v50 = vld [vmem:[%s2041_s9 + $0x1a0] sm:$0xff]   ;;  %v1593_v52 = vld [vmem:[%s2041_s9 + $0x1a8] sm:$0xff]  }
  0x11   :  { %v1594_v53 = vld [vmem:[%s2041_s9 + $0xb0] sm:$0xff]   ;;  %v1596_v55 = vld [vmem:[%s2041_s9 + $0xb8] sm:$0xff]   ;;  %v258_v56 = vld [vmem:[%s2046_s2] sm:$0xff] }
  0x12   :  { %v1595_v54 = vld [vmem:[%s2041_s9 + $0x1b0] sm:$0xff]   ;;  %v1597_v57 = vld [vmem:[%s2041_s9 + $0x1b8] sm:$0xff]   ;;  %v690_v58 = vld [vmem:[%s2047_s6] sm:$0xff]  ;;  %v259_v59 = vpack.c.bf16 %v258_v56, %v258_v56 }
  0x13   :  { %1348 = vmatpush3.bf16.msra.mxu1 %v1558_v9  ;;  %1428 = vmatpush3.bf16.msra.mxu0 %v1559_v10  ;;  %v1598_v60 = vld [vmem:[%s2041_s9 + $0xc0] sm:$0xff]   ;;  %v691_v61 = vpack.c.bf16 %v690_v58, %v690_v58  ;;  %v1600_v63 = vld [vmem:[%s2041_s9 + $0xc8] sm:$0xff]   ;;  %v1602_v2 = vld [vmem:[%s2041_s9 + $0xd0] sm:$0xff]  }
  0x14   :  { %1349 = vmatprep.subr.bf16.mxu1 %v1624_v0  ;;  %1429 = vmatprep.subr.bf16.mxu0 %v1624_v0  ;;  %v1599_v62 = vld [vmem:[%s2041_s9 + $0x1c0] sm:$0xff]   ;;  %v1601_v1 = vld [vmem:[%s2041_s9 + $0x1c8] sm:$0xff]   ;;  %v1603_v3 = vld [vmem:[%s2041_s9 + $0x1d0] sm:$0xff]  }
  0x15   :  { %v1604_v4 = vld [vmem:[%s2041_s9 + $0xd8] sm:$0xff]   ;;  %v1606_v6 = vld [vmem:[%s2041_s9 + $0xe0] sm:$0xff]   ;;  %v1608_v8 = vld [vmem:[%s2041_s9 + $0xe8] sm:$0xff]  }
  0x16   :  { %v1605_v5 = vld [vmem:[%s2041_s9 + $0x1d8] sm:$0xff]   ;;  %v1607_v7 = vld [vmem:[%s2041_s9 + $0x1e0] sm:$0xff]   ;;  %v1609_v9 = vld [vmem:[%s2041_s9 + $0x1e8] sm:$0xff]  }
  0x17   :  { %1350 = vmatpush3.bf16.msra.mxu1 %v1560_v11  ;;  %1430 = vmatpush3.bf16.msra.mxu0 %v1561_v12  ;;  %v1610_v10 = vld [vmem:[%s2041_s9 + $0xf0] sm:$0xff]   ;;  %v1612_v12 = vld [vmem:[%s2041_s9 + $0xf8] sm:$0xff]   ;;  %v1614_v18 = vld [vmem:[%s2041_s9 + $0x200] sm:$0xff]  }
  0x18   :  { %1351 = vmatprep.subr.bf16.mxu1 %v1624_v0  ;;  %1431 = vmatprep.subr.bf16.mxu0 %v1624_v0  ;;  %v1611_v11 = vld [vmem:[%s2041_s9 + $0x1f0] sm:$0xff]  }
  0x1b   :  { %1352 = vmatpush3.bf16.msra.mxu1 %v1562_v13  ;;  %1432 = vmatpush3.bf16.msra.mxu0 %v1563_v14  ;;  %v366_v13 = vld [vmem:[%s2048_s3] sm:$0xff]  ;;  %v1613_v14 = vld [vmem:[%s2041_s9 + $0x1f8] sm:$0xff]  }
  0x1c   :  { %1353 = vmatprep.subr.bf16.mxu1 %v1624_v0  ;;  %1433 = vmatprep.subr.bf16.mxu0 %v1624_v0 }
  0x1f   :  { %1354 = vmatpush3.bf16.msra.mxu1 %v1564_v15  ;;  %1434 = vmatpush3.bf16.msra.mxu0 %v1565_v16  ;;  %v798_v15 = vld [vmem:[%s2049_s7] sm:$0xff]  ;;  %v367_v16 = vpack.c.bf16 %v366_v13, %v366_v13 }
  0x20   :  { %1359 = vmatprep.subr.bf16.mxu1 %v1624_v0  ;;  %1439 = vmatprep.subr.bf16.mxu0 %v1624_v0  ;;  %v799_v17 = vpack.c.bf16 %v798_v15, %v798_v15 }
  0x22   :  { %1356 = vmatmul.mubr.bf16.vlgmr.msra.gmra.mrb[0].mxu1 %v64_v19  ;;  %1436 = vmatmul.mubr.bf16.vlgmr.msra.gmra.mrb[0].mxu0 %v475_v21  ;;  %v1615_v19 = vld [vmem:[%s2041_s9 + $0x208] sm:$0xff]   ;;  %v1617_v21 = vld [vmem:[%s2041_s9 + $0x218] sm:$0xff]  }
  0x23   :  { %1360 = vmatpush3.bf16.msra.mxu1 %v1566_v20  ;;  %1440 = vmatpush3.bf16.msra.mxu0 %v1567_v22  ;;  %v1616_v20 = vld [vmem:[%s2041_s9 + $0x210] sm:$0xff]   ;;  %v1618_v22 = vld [vmem:[%s2041_s9 + $0x220] sm:$0xff]  }
  0x24   :  { %1361 = vmatprep.subr.bf16.mxu1 %v1624_v0  ;;  %1441 = vmatprep.subr.bf16.mxu0 %v1624_v0 }
  0x25   :  { %1375 = vmatprep.mubr.msk.bf16.mxu1 %vm1625_vm0, %v1624_v0  ;;  %1455 = vmatprep.mubr.msk.bf16.mxu0 %vm1625_vm0, %v1624_v0 }
  0x27   :  { %1362 = vmatpush3.bf16.msra.mxu1 %v1568_v23  ;;  %1442 = vmatpush3.bf16.msra.mxu0 %v1569_v24  ;;  %v1619_v23 = vld [vmem:[%s2041_s9 + $0x228] sm:$0xff]   ;;  %v1620_v24 = vld [vmem:[%s2041_s9 + $0x230] sm:$0xff]  }
  0x28   :  { %1363 = vmatprep.subr.bf16.mxu1 %v1624_v0  ;;  %1443 = vmatprep.subr.bf16.mxu0 %v1624_v0 }
  0x2b   :  { %1364 = vmatpush3.bf16.msra.mxu1 %v1570_v25  ;;  %1444 = vmatpush3.bf16.msra.mxu0 %v1571_v26  ;;  %v1621_v25 = vld [vmem:[%s2041_s9 + $0x238] sm:$0xff]   ;;  %v906_v26 = vld [vmem:[%s2050_s8] sm:$0xff] }
  0x2c   :  { %1365 = vmatprep.subr.bf16.mxu1 %v1624_v0  ;;  %1445 = vmatprep.subr.bf16.mxu0 %v1624_v0 }
  0x2f   :  { %1366 = vmatpush3.bf16.msra.mxu1 %v1572_v27  ;;  %1446 = vmatpush3.bf16.msra.mxu0 %v1573_v28  ;;  %v907_v27 = vpack.c.bf16 %v906_v26, %v906_v26 }
  0x30   :  { %1367 = vmatprep.subr.bf16.mxu1 %v1624_v0  ;;  %1447 = vmatprep.subr.bf16.mxu0 %v1624_v0 }
  0x33   :  { %1368 = vmatpush3.bf16.msra.mxu1 %v1574_v29  ;;  %1448 = vmatpush3.bf16.msra.mxu0 %v1575_v30 }
  0x34   :  { %1369 = vmatprep.subr.bf16.mxu1 %v1624_v0  ;;  %1449 = vmatprep.subr.bf16.mxu0 %v1624_v0 }
  0x37   :  { %1370 = vmatpush3.bf16.msra.mxu1 %v1576_v31  ;;  %1450 = vmatpush3.bf16.msra.mxu0 %v1577_v32 }
  0x38   :  { %1371 = vmatprep.subr.bf16.mxu1 %v1624_v0  ;;  %1451 = vmatprep.subr.bf16.mxu0 %v1624_v0 }
  0x3b   :  { %1372 = vmatpush3.bf16.msra.mxu1 %v1578_v33  ;;  %1452 = vmatpush3.bf16.msra.mxu0 %v1579_v34 }
  0x3c   :  { %1373 = vmatprep.subr.bf16.mxu1 %v1624_v0  ;;  %1453 = vmatprep.subr.bf16.mxu0 %v1624_v0 }
  0x3f   :  { %1374 = vmatpush3.bf16.msra.mxu1 %v1580_v35  ;;  %1454 = vmatpush3.bf16.msra.mxu0 %v1581_v36 }
  0x40   :  { %1379 = vmatprep.subr.bf16.mxu1 %v1624_v0  ;;  %1459 = vmatprep.subr.bf16.mxu0 %v1624_v0 }
  0x42   :  { %1376 = vmatmul.mubr.bf16.vlgmr.msra.gmra.mrb[0].mxu1 %v46_v39  ;;  %1456 = vmatmul.mubr.bf16.vlgmr.msra.gmra.mrb[0].mxu0 %v583_v41 }
  0x43   :  { %1380 = vmatpush3.bf16.msra.mxu1 %v1582_v40  ;;  %1460 = vmatpush3.bf16.msra.mxu0 %v1583_v42 }
  0x44   :  { %1381 = vmatprep.subr.bf16.mxu1 %v1624_v0  ;;  %1461 = vmatprep.subr.bf16.mxu0 %v1624_v0 }
  0x45   :  { %1395 = vmatprep.mubr.msk.bf16.mxu1 %vm1625_vm0, %v1624_v0  ;;  %1475 = vmatprep.mubr.msk.bf16.mxu0 %vm1625_vm0, %v1624_v0 }
  0x47   :  { %1382 = vmatpush3.bf16.msra.mxu1 %v1584_v43  ;;  %1462 = vmatpush3.bf16.msra.mxu0 %v1585_v44 }
  0x48   :  { %1383 = vmatprep.subr.bf16.mxu1 %v1624_v0  ;;  %1463 = vmatprep.subr.bf16.mxu0 %v1624_v0 }
  0x4b   :  { %1384 = vmatpush3.bf16.msra.mxu1 %v1586_v45  ;;  %1464 = vmatpush3.bf16.msra.mxu0 %v1587_v46 }
  0x4c   :  { %1385 = vmatprep.subr.bf16.mxu1 %v1624_v0  ;;  %1465 = vmatprep.subr.bf16.mxu0 %v1624_v0 }
  0x4f   :  { %1386 = vmatpush3.bf16.msra.mxu1 %v1588_v47  ;;  %1466 = vmatpush3.bf16.msra.mxu0 %v1589_v48 }
  0x50   :  { %1387 = vmatprep.subr.bf16.mxu1 %v1624_v0  ;;  %1467 = vmatprep.subr.bf16.mxu0 %v1624_v0 }
  0x53   :  { %1388 = vmatpush3.bf16.msra.mxu1 %v1590_v49  ;;  %1468 = vmatpush3.bf16.msra.mxu0 %v1591_v50 }
  0x54   :  { %1389 = vmatprep.subr.bf16.mxu1 %v1624_v0  ;;  %1469 = vmatprep.subr.bf16.mxu0 %v1624_v0 }
  0x57   :  { %1390 = vmatpush3.bf16.msra.mxu1 %v1592_v51  ;;  %1470 = vmatpush3.bf16.msra.mxu0 %v1593_v52 }
  0x58   :  { %1391 = vmatprep.subr.bf16.mxu1 %v1624_v0  ;;  %1471 = vmatprep.subr.bf16.mxu0 %v1624_v0 }
  0x5b   :  { %1392 = vmatpush3.bf16.msra.mxu1 %v1594_v53  ;;  %1472 = vmatpush3.bf16.msra.mxu0 %v1595_v54  ;;  %v1035_v53 = vlaneseq }
  0x5c   :  { %1393 = vmatprep.subr.bf16.mxu1 %v1624_v0  ;;  %1473 = vmatprep.subr.bf16.mxu0 %v1624_v0 }
  0x5d   :  { %v1036_v54 = vshrl.u32 %v1035_v53, 7 }
  0x5f   :  { %1394 = vmatpush3.bf16.msra.mxu1 %v1596_v55  ;;  %1474 = vmatpush3.bf16.msra.mxu0 %v1597_v57  ;;  %v1030_v55 = vld [vmem:[%s2051_s10] sm:$0x1]  ;;  %v1037_v56 = vsub.s32 0, %v1036_v54 }
  0x60   :  { %1399 = vmatprep.subr.bf16.mxu1 %v1624_v0  ;;  %1479 = vmatprep.subr.bf16.mxu0 %v1624_v0 }
  0x62   :  { %1396 = vmatmul.mubr.bf16.vlgmr.msra.gmra.mrb[0].mxu1 %v259_v59  ;;  %1476 = vmatmul.mubr.bf16.vlgmr.msra.gmra.mrb[0].mxu0 %v691_v61 }
  0x63   :  { %1400 = vmatpush3.bf16.msra.mxu1 %v1598_v60  ;;  %1480 = vmatpush3.bf16.msra.mxu0 %v1599_v62  ;;  %v1257_v60 = vld [vmem:[%s2052_s11] ss:$0 sm:$0xff] }
  0x64   :  { %1401 = vmatprep.subr.bf16.mxu1 %v1624_v0  ;;  %1481 = vmatprep.subr.bf16.mxu0 %v1624_v0  ;;  %v1049_v62 = vld [vmem:[%s2053_s12] sm:$0xff] }
  0x65   :  { %1415 = vmatprep.mubr.msk.bf16.mxu1 %vm1625_vm0, %v1624_v0  ;;  %1495 = vmatprep.mubr.msk.bf16.mxu0 %vm1625_vm0, %v1624_v0 }
  0x67   :  { %1402 = vmatpush3.bf16.msra.mxu1 %v1600_v63  ;;  %1482 = vmatpush3.bf16.msra.mxu0 %v1601_v1 }
  0x68   :  { %1403 = vmatprep.subr.bf16.mxu1 %v1624_v0  ;;  %1483 = vmatprep.subr.bf16.mxu0 %v1624_v0 }
  0x6b   :  { %1404 = vmatpush3.bf16.msra.mxu1 %v1602_v2  ;;  %1484 = vmatpush3.bf16.msra.mxu0 %v1603_v3 }
  0x6c   :  { %1405 = vmatprep.subr.bf16.mxu1 %v1624_v0  ;;  %1485 = vmatprep.subr.bf16.mxu0 %v1624_v0 }
  0x6f   :  { %1406 = vmatpush3.bf16.msra.mxu1 %v1604_v4  ;;  %1486 = vmatpush3.bf16.msra.mxu0 %v1605_v5 }
  0x70   :  { %1407 = vmatprep.subr.bf16.mxu1 %v1624_v0  ;;  %1487 = vmatprep.subr.bf16.mxu0 %v1624_v0 }
  0x73   :  { %1408 = vmatpush3.bf16.msra.mxu1 %v1606_v6  ;;  %1488 = vmatpush3.bf16.msra.mxu0 %v1607_v7 }
  0x74   :  { %1409 = vmatprep.subr.bf16.mxu1 %v1624_v0  ;;  %1489 = vmatprep.subr.bf16.mxu0 %v1624_v0 }
  0x77   :  { %1410 = vmatpush3.bf16.msra.mxu1 %v1608_v8  ;;  %1490 = vmatpush3.bf16.msra.mxu0 %v1609_v9 }
  0x78   :  { %1411 = vmatprep.subr.bf16.mxu1 %v1624_v0  ;;  %1491 = vmatprep.subr.bf16.mxu0 %v1624_v0 }
  0x7b   :  { %1412 = vmatpush3.bf16.msra.mxu1 %v1610_v10  ;;  %1492 = vmatpush3.bf16.msra.mxu0 %v1611_v11 }
  0x7c   :  { %1413 = vmatprep.subr.bf16.mxu1 %v1624_v0  ;;  %1493 = vmatprep.subr.bf16.mxu0 %v1624_v0 }
  0x7f   :  { %1414 = vmatpush3.bf16.msra.mxu1 %v1612_v12  ;;  %1494 = vmatpush3.bf16.msra.mxu0 %v1613_v14 }
  0x80   :  { %1499 = vmatprep.subr.bf16.mxu0 %v1624_v0 }
  0x82   :  { %1416 = vmatmul.mubr.bf16.vlgmr.msra.gmra.mrb[0].mxu1 %v367_v16  ;;  %1496 = vmatmul.mubr.bf16.vlgmr.msra.gmra.mrb[0].mxu0 %v799_v17 }
  0x83   :  { %1500 = vmatpush3.bf16.msra.mxu0 %v1614_v18  ;;  %1515 = vmatprep.mubr.msk.bf16.mxu0 %vm1625_vm0, %v1624_v0 }
  0x84   :  { %1501 = vmatprep.subr.bf16.mxu0 %v1624_v0 }
  0x87   :  { %1502 = vmatpush3.bf16.msra.mxu0 %v1615_v19 }
  0x88   :  { %1503 = vmatprep.subr.bf16.mxu0 %v1624_v0 }
  0x8b   :  { %1504 = vmatpush3.bf16.msra.mxu0 %v1616_v20 }
  0x8c   :  { %1505 = vmatprep.subr.bf16.mxu0 %v1624_v0 }
  0x8f   :  { %1506 = vmatpush3.bf16.msra.mxu0 %v1617_v21 }
  0x90   :  { %1507 = vmatprep.subr.bf16.mxu0 %v1624_v0 }
  0x93   :  { %1508 = vmatpush3.bf16.msra.mxu0 %v1618_v22 }
  0x94   :  { %1509 = vmatprep.subr.bf16.mxu0 %v1624_v0 }
  0x97   :  { %1510 = vmatpush3.bf16.msra.mxu0 %v1619_v23 }
  0x98   :  { %1511 = vmatprep.subr.bf16.mxu0 %v1624_v0 }
  0x9b   :  { %1512 = vmatpush3.bf16.msra.mxu0 %v1620_v24 }
  0x9c   :  { %1513 = vmatprep.subr.bf16.mxu0 %v1624_v0 }
  0x9f   :  { %1514 = vmatpush3.bf16.msra.mxu0 %v1621_v25 }
  0xa2   :  { %1516 = vmatmul.mubr.bf16.vlgmr.msra.gmra.mrb[0].mxu0 %v907_v27 }
 0x155   :  { %v467_v28 = vpop.f32.mrb[0].mxu1 }
 0x156   :  { %v1417_v29 = vpop.f32.mrb[1].mxu1 }
 0x157   :  { %v470_v30 = vpop.f32.mrb[2].mxu1 }
 0x158   :  { %v1418_v31 = vpop.f32.mrb[3].mxu1 }
 0x175   :  { %v1007_v32 = vpop.f32.mrb[0].mxu0 }
 0x176   :  { %v1519_v33 = vadd.f32 %v1007_v32, %v467_v28  ;;  %v1517_v34 = vpop.f32.mrb[1].mxu0 }
 0x177   :  { %v1010_v35 = vpop.f32.mrb[2].mxu0 }
 0x178   :  { %v1014_v36 = vrot.slane %v1519_v33, 4  ;;  %v1518_v37 = vpop.f32.mrb[3].mxu0 }
 0x17a   :  { %v1015_v38 = vadd.f32 %v1519_v33, %v1014_v36 }
 0x17c   :  { %v1016_v39 = vrot.slane %v1015_v38, 2 }
 0x17e   :  { %v1017_v40 = vadd.f32 %v1016_v39, %v1015_v38 }
 0x180   :  { %v1018_v41 = vrot.slane %v1017_v40, 1 }
 0x182   :  { %v1019_v42 = vadd.f32 %v1018_v41, %v1017_v40 }
 0x184   :  { %v1020_v43 = vmul.f32 0.125, %v1019_v42 }
 0x186   :  { %v1021_v0 = vsub.f32 %v1519_v33, %v1020_v43 }
 0x188   :  { %v1022_v44 = vmul.f32 %v1021_v0, %v1021_v0 }
 0x18a   :  { %v1023_v45 = vrot.slane %v1022_v44, 4 }
 0x18c   :  { %v1024_v46 = vadd.f32 %v1023_v45, %v1022_v44 }
 0x18e   :  { %v1025_v47 = vrot.slane %v1024_v46, 2 }
 0x190   :  { %v1026_v48 = vadd.f32 %v1025_v47, %v1024_v46 }
 0x192   :  { %v1027_v49 = vrot.slane %v1026_v48, 1 }
 0x194   :  { %v1028_v50 = vadd.f32 %v1027_v49, %v1026_v48 }
 0x196   :  { %v1029_v51 = vmul.f32 0.125, %v1028_v50 }
 0x198   :  { %v1031_v52 = vadd.f32 1e-05, %v1029_v51 }
 0x19a   :  { %1622 = vrsqrt.f32 %v1031_v52 }
 0x1a4   :  { %v1623_v57 = vpop.eup %1622 }
 0x1a5   :  { %v1033_v58 = vmul.f32 %v1623_v57, %v1030_v55 }
 0x1a7   :  { %v1038_v59 = vrot.slane %v1033_v58, %v1037_v56 }
 0x1a9   :  { %v1040_v61 = vmul.f32 %v1038_v59, %v1021_v0 }
 0x1ab   :  { %v1048_v63 = vadd.f32 %v1257_v60, %v1040_v61 }
 0x1ad   :  { %v1050_v1 = vadd.f32 %v1049_v62, %v1048_v63 }
 0x1af   :  { %v1051_v2 = vmax.f32 %v1050_v1, 0.0 }
 0x1b1   :  { %1052 = vst [vmem:[%s2054_s13] sm:$0xff] %v1051_v2 }

// kernel: encoder_forward.18
= control target key start
LH: loop header
LB: loop body
LE: loop exit
PB: predicated region body
PF: predicated region fallthrough
CT: control target
= control target key end

     0   :  { %v1619_v0 = vmov 0.0   ;;  %vm1620_vm0 = vmmov 0   ;;  %s2028_s9 = inlined_call_operand.vmem [shape: bf16[9,128,128], index: 9, kind: input, shape index: {}]   ;;  %s2029_s1 = inlined_call_operand.vmem [shape: f32[8,128], index: 1, kind: input, shape index: {}]   ;;  %s2030_s4 = inlined_call_operand.vmem [shape: f32[8,128], index: 4, kind: input, shape index: {}]   ;;  %s2031_s0 = inlined_call_operand.vmem [shape: f32[8,128], index: 0, kind: input, shape index: {}]   ;;  %s2032_s5 = inlined_call_operand.vmem [shape: f32[8,128], index: 5, kind: input, shape index: {}]   ;;  %s2033_s2 = inlined_call_operand.vmem [shape: f32[8,128], index: 2, kind: input, shape index: {}]   ;;  %s2034_s6 = inlined_call_operand.vmem [shape: f32[8,128], index: 6, kind: input, shape index: {}]   ;;  %s2035_s3 = inlined_call_operand.vmem [shape: f32[8,128], index: 3, kind: input, shape index: {}]   ;;  %s2036_s7 = inlined_call_operand.vmem [shape: f32[8,128], index: 7, kind: input, shape index: {}]   ;;  %s2037_s8 = inlined_call_operand.vmem [shape: f32[8,128], index: 8, kind: input, shape index: {}]   ;;  %s2038_s10 = inlined_call_operand.vmem [shape: f32[1,128], index: 10, kind: input, shape index: {}]   ;;  %s2039_s11 = inlined_call_operand.vmem [shape: f32[1,128], index: 11, kind: input, shape index: {}]   ;;  %s2040_s12 = inlined_call_operand.vmem [shape: f32[8,128], index: 12, kind: output, shape index: {}]  }
   0x1   :  { %1334 = vmatprep.subr.bf16.mxu1 %v1619_v0  ;;  %1414 = vmatprep.subr.bf16.mxu0 %v1619_v0  ;;  %v1545_v1 = vld [vmem:[%s2028_s9 + $0x40] sm:$0xff]   ;;  %v1547_v3 = vld [vmem:[%s2028_s9 + $0x48] sm:$0xff]   ;;  %v1549_v5 = vld [vmem:[%s2028_s9 + $0x50] sm:$0xff]  }
   0x2   :  { %v1546_v2 = vld [vmem:[%s2028_s9 + $0x100] sm:$0xff]   ;;  %1350 = vmatprep.mubr.msk.bf16.mxu1 %vm1620_vm0, %v1619_v0  ;;  %1430 = vmatprep.mubr.msk.bf16.mxu0 %vm1620_vm0, %v1619_v0  ;;  %v1548_v4 = vld [vmem:[%s2028_s9 + $0x108] sm:$0xff]   ;;  %v1550_v6 = vld [vmem:[%s2028_s9 + $0x110] sm:$0xff]  }
   0x3   :  { %1335 = vmatpush3.bf16.msra.mxu1 %v1545_v1  ;;  %1415 = vmatpush3.bf16.msra.mxu0 %v1546_v2  ;;  %v1551_v7 = vld [vmem:[%s2028_s9 + $0x58] sm:$0xff]   ;;  %v1553_v9 = vld [vmem:[%s2028_s9 + $0x60] sm:$0xff]   ;;  %v1555_v11 = vld [vmem:[%s2028_s9 + $0x68] sm:$0xff]  }
   0x4   :  { %1336 = vmatprep.subr.bf16.mxu1 %v1619_v0  ;;  %1416 = vmatprep.subr.bf16.mxu0 %v1619_v0  ;;  %v1552_v8 = vld [vmem:[%s2028_s9 + $0x118] sm:$0xff]   ;;  %v1554_v10 = vld [vmem:[%s2028_s9 + $0x120] sm:$0xff]   ;;  %v1556_v12 = vld [vmem:[%s2028_s9 + $0x128] sm:$0xff]  }
   0x5   :  { %v1557_v13 = vld [vmem:[%s2028_s9 + $0x70] sm:$0xff]   ;;  %v1559_v15 = vld [vmem:[%s2028_s9 + $0x78] sm:$0xff]   ;;  %v60_v17 = vld [vmem:[%s2029_s1] sm:$0xff] }
   0x6   :  { %v1558_v14 = vld [vmem:[%s2028_s9 + $0x130] sm:$0xff]   ;;  %v1560_v16 = vld [vmem:[%s2028_s9 + $0x138] sm:$0xff]   ;;  %v471_v18 = vld [vmem:[%s2030_s4] sm:$0xff]  ;;  %v61_v19 = vpack.c.bf16 %v60_v17, %v60_v17 }
   0x7   :  { %1337 = vmatpush3.bf16.msra.mxu1 %v1547_v3  ;;  %1417 = vmatpush3.bf16.msra.mxu0 %v1548_v4  ;;  %v1561_v20 = vld [vmem:[%s2028_s9] sm:$0xff]   ;;  %v472_v21 = vpack.c.bf16 %v471_v18, %v471_v18  ;;  %v1563_v23 = vld [vmem:[%s2028_s9 + $0x8] sm:$0xff]   ;;  %v1565_v25 = vld [vmem:[%s2028_s9 + $0x10] sm:$0xff]  }
   0x8   :  { %1338 = vmatprep.subr.bf16.mxu1 %v1619_v0  ;;  %1418 = vmatprep.subr.bf16.mxu0 %v1619_v0  ;;  %v1562_v22 = vld [vmem:[%s2028_s9 + $0x140] sm:$0xff]   ;;  %v1564_v24 = vld [vmem:[%s2028_s9 + $0x148] sm:$0xff]   ;;  %v1566_v26 = vld [vmem:[%s2028_s9 + $0x150] sm:$0xff]  }
   0x9   :  { %v1567_v27 = vld [vmem:[%s2028_s9 + $0x18] sm:$0xff]   ;;  %v1569_v29 = vld [vmem:[%s2028_s9 + $0x20] sm:$0xff]   ;;  %v1571_v31 = vld [vmem:[%s2028_s9 + $0x28] sm:$0xff]  }
   0xa   :  { %v1568_v28 = vld [vmem:[%s2028_s9 + $0x158] sm:$0xff]   ;;  %v1570_v30 = vld [vmem:[%s2028_s9 + $0x160] sm:$0xff]   ;;  %v1572_v32 = vld [vmem:[%s2028_s9 + $0x168] sm:$0xff]  }
   0xb   :  { %1339 = vmatpush3.bf16.msra.mxu1 %v1549_v5  ;;  %1419 = vmatpush3.bf16.msra.mxu0 %v1550_v6  ;;  %v1573_v33 = vld [vmem:[%s2028_s9 + $0x30] sm:$0xff]   ;;  %v1575_v35 = vld [vmem:[%s2028_s9 + $0x38] sm:$0xff]   ;;  %v42_v37 = vld [vmem:[%s2031_s0] sm:$0xff] }
   0xc   :  { %1340 = vmatprep.subr.bf16.mxu1 %v1619_v0  ;;  %1420 = vmatprep.subr.bf16.mxu0 %v1619_v0  ;;  %v1574_v34 = vld [vmem:[%s2028_s9 + $0x170] sm:$0xff]   ;;  %v1576_v36 = vld [vmem:[%s2028_s9 + $0x178] sm:$0xff]   ;;  %v579_v38 = vld [vmem:[%s2032_s5] sm:$0xff]  ;;  %v43_v39 = vpack.c.bf16 %v42_v37, %v42_v37 }
   0xd   :  { %v1577_v40 = vld [vmem:[%s2028_s9 + $0x80] sm:$0xff]   ;;  %v580_v41 = vpack.c.bf16 %v579_v38, %v579_v38  ;;  %v1579_v43 = vld [vmem:[%s2028_s9 + $0x88] sm:$0xff]   ;;  %v1581_v45 = vld [vmem:[%s2028_s9 + $0x90] sm:$0xff]  }
   0xe   :  { %v1578_v42 = vld [vmem:[%s2028_s9 + $0x180] sm:$0xff]   ;;  %v1580_v44 = vld [vmem:[%s2028_s9 + $0x188] sm:$0xff]   ;;  %v1582_v46 = vld [vmem:[%s2028_s9 + $0x190] sm:$0xff]  }
   0xf   :  { %1341 = vmatpush3.bf16.msra.mxu1 %v1551_v7  ;;  %1421 = vmatpush3.bf16.msra.mxu0 %v1552_v8  ;;  %v1583_v47 = vld [vmem:[%s2028_s9 + $0x98] sm:$0xff]   ;;  %v1585_v49 = vld [vmem:[%s2028_s9 + $0xa0] sm:$0xff]   ;;  %v1587_v51 = vld [vmem:[%s2028_s9 + $0xa8] sm:$0xff]  }
  0x10   :  { %1342 = vmatprep.subr.bf16.mxu1 %v1619_v0  ;;  %1422 = vmatprep.subr.bf16.mxu0 %v1619_v0  ;;  %v1584_v48 = vld [vmem:[%s2028_s9 + $0x198] sm:$0xff]   ;;  %v1586_v50 = vld [vmem:[%s2028_s9 + $0x1a0] sm:$0xff]   ;;  %v1588_v52 = vld [vmem:[%s2028_s9 + $0x1a8] sm:$0xff]  }
  0x11   :  { %v1589_v53 = vld [vmem:[%s2028_s9 + $0xb0] sm:$0xff]   ;;  %v1591_v55 = vld [vmem:[%s2028_s9 + $0xb8] sm:$0xff]   ;;  %v255_v56 = vld [vmem:[%s2033_s2] sm:$0xff] }
  0x12   :  { %v1590_v54 = vld [vmem:[%s2028_s9 + $0x1b0] sm:$0xff]   ;;  %v1592_v57 = vld [vmem:[%s2028_s9 + $0x1b8] sm:$0xff]   ;;  %v687_v58 = vld [vmem:[%s2034_s6] sm:$0xff]  ;;  %v256_v59 = vpack.c.bf16 %v255_v56, %v255_v56 }
  0x13   :  { %1343 = vmatpush3.bf16.msra.mxu1 %v1553_v9  ;;  %1423 = vmatpush3.bf16.msra.mxu0 %v1554_v10  ;;  %v1593_v60 = vld [vmem:[%s2028_s9 + $0xc0] sm:$0xff]   ;;  %v688_v61 = vpack.c.bf16 %v687_v58, %v687_v58  ;;  %v1595_v63 = vld [vmem:[%s2028_s9 + $0xc8] sm:$0xff]   ;;  %v1597_v2 = vld [vmem:[%s2028_s9 + $0xd0] sm:$0xff]  }
  0x14   :  { %1344 = vmatprep.subr.bf16.mxu1 %v1619_v0  ;;  %1424 = vmatprep.subr.bf16.mxu0 %v1619_v0  ;;  %v1594_v62 = vld [vmem:[%s2028_s9 + $0x1c0] sm:$0xff]   ;;  %v1596_v1 = vld [vmem:[%s2028_s9 + $0x1c8] sm:$0xff]   ;;  %v1598_v3 = vld [vmem:[%s2028_s9 + $0x1d0] sm:$0xff]  }
  0x15   :  { %v1599_v4 = vld [vmem:[%s2028_s9 + $0xd8] sm:$0xff]   ;;  %v1601_v6 = vld [vmem:[%s2028_s9 + $0xe0] sm:$0xff]   ;;  %v1603_v8 = vld [vmem:[%s2028_s9 + $0xe8] sm:$0xff]  }
  0x16   :  { %v1600_v5 = vld [vmem:[%s2028_s9 + $0x1d8] sm:$0xff]   ;;  %v1602_v7 = vld [vmem:[%s2028_s9 + $0x1e0] sm:$0xff]   ;;  %v1604_v9 = vld [vmem:[%s2028_s9 + $0x1e8] sm:$0xff]  }
  0x17   :  { %1345 = vmatpush3.bf16.msra.mxu1 %v1555_v11  ;;  %1425 = vmatpush3.bf16.msra.mxu0 %v1556_v12  ;;  %v1605_v10 = vld [vmem:[%s2028_s9 + $0xf0] sm:$0xff]   ;;  %v1607_v12 = vld [vmem:[%s2028_s9 + $0xf8] sm:$0xff]   ;;  %v1609_v18 = vld [vmem:[%s2028_s9 + $0x200] sm:$0xff]  }
  0x18   :  { %1346 = vmatprep.subr.bf16.mxu1 %v1619_v0  ;;  %1426 = vmatprep.subr.bf16.mxu0 %v1619_v0  ;;  %v1606_v11 = vld [vmem:[%s2028_s9 + $0x1f0] sm:$0xff]  }
  0x1b   :  { %1347 = vmatpush3.bf16.msra.mxu1 %v1557_v13  ;;  %1427 = vmatpush3.bf16.msra.mxu0 %v1558_v14  ;;  %v363_v13 = vld [vmem:[%s2035_s3] sm:$0xff]  ;;  %v1608_v14 = vld [vmem:[%s2028_s9 + $0x1f8] sm:$0xff]  }
  0x1c   :  { %1348 = vmatprep.subr.bf16.mxu1 %v1619_v0  ;;  %1428 = vmatprep.subr.bf16.mxu0 %v1619_v0 }
  0x1f   :  { %1349 = vmatpush3.bf16.msra.mxu1 %v1559_v15  ;;  %1429 = vmatpush3.bf16.msra.mxu0 %v1560_v16  ;;  %v795_v15 = vld [vmem:[%s2036_s7] sm:$0xff]  ;;  %v364_v16 = vpack.c.bf16 %v363_v13, %v363_v13 }
  0x20   :  { %1354 = vmatprep.subr.bf16.mxu1 %v1619_v0  ;;  %1434 = vmatprep.subr.bf16.mxu0 %v1619_v0  ;;  %v796_v17 = vpack.c.bf16 %v795_v15, %v795_v15 }
  0x22   :  { %1351 = vmatmul.mubr.bf16.vlgmr.msra.gmra.mrb[0].mxu1 %v61_v19  ;;  %1431 = vmatmul.mubr.bf16.vlgmr.msra.gmra.mrb[0].mxu0 %v472_v21  ;;  %v1610_v19 = vld [vmem:[%s2028_s9 + $0x208] sm:$0xff]   ;;  %v1612_v21 = vld [vmem:[%s2028_s9 + $0x218] sm:$0xff]  }
  0x23   :  { %1355 = vmatpush3.bf16.msra.mxu1 %v1561_v20  ;;  %1435 = vmatpush3.bf16.msra.mxu0 %v1562_v22  ;;  %v1611_v20 = vld [vmem:[%s2028_s9 + $0x210] sm:$0xff]   ;;  %v1613_v22 = vld [vmem:[%s2028_s9 + $0x220] sm:$0xff]  }
  0x24   :  { %1356 = vmatprep.subr.bf16.mxu1 %v1619_v0  ;;  %1436 = vmatprep.subr.bf16.mxu0 %v1619_v0 }
  0x25   :  { %1370 = vmatprep.mubr.msk.bf16.mxu1 %vm1620_vm0, %v1619_v0  ;;  %1450 = vmatprep.mubr.msk.bf16.mxu0 %vm1620_vm0, %v1619_v0 }
  0x27   :  { %1357 = vmatpush3.bf16.msra.mxu1 %v1563_v23  ;;  %1437 = vmatpush3.bf16.msra.mxu0 %v1564_v24  ;;  %v1614_v23 = vld [vmem:[%s2028_s9 + $0x228] sm:$0xff]   ;;  %v1615_v24 = vld [vmem:[%s2028_s9 + $0x230] sm:$0xff]  }
  0x28   :  { %1358 = vmatprep.subr.bf16.mxu1 %v1619_v0  ;;  %1438 = vmatprep.subr.bf16.mxu0 %v1619_v0 }
  0x2b   :  { %1359 = vmatpush3.bf16.msra.mxu1 %v1565_v25  ;;  %1439 = vmatpush3.bf16.msra.mxu0 %v1566_v26  ;;  %v1616_v25 = vld [vmem:[%s2028_s9 + $0x238] sm:$0xff]   ;;  %v903_v26 = vld [vmem:[%s2037_s8] sm:$0xff] }
  0x2c   :  { %1360 = vmatprep.subr.bf16.mxu1 %v1619_v0  ;;  %1440 = vmatprep.subr.bf16.mxu0 %v1619_v0 }
  0x2f   :  { %1361 = vmatpush3.bf16.msra.mxu1 %v1567_v27  ;;  %1441 = vmatpush3.bf16.msra.mxu0 %v1568_v28  ;;  %v904_v27 = vpack.c.bf16 %v903_v26, %v903_v26 }
  0x30   :  { %1362 = vmatprep.subr.bf16.mxu1 %v1619_v0  ;;  %1442 = vmatprep.subr.bf16.mxu0 %v1619_v0 }
  0x33   :  { %1363 = vmatpush3.bf16.msra.mxu1 %v1569_v29  ;;  %1443 = vmatpush3.bf16.msra.mxu0 %v1570_v30 }
  0x34   :  { %1364 = vmatprep.subr.bf16.mxu1 %v1619_v0  ;;  %1444 = vmatprep.subr.bf16.mxu0 %v1619_v0 }
  0x37   :  { %1365 = vmatpush3.bf16.msra.mxu1 %v1571_v31  ;;  %1445 = vmatpush3.bf16.msra.mxu0 %v1572_v32 }
  0x38   :  { %1366 = vmatprep.subr.bf16.mxu1 %v1619_v0  ;;  %1446 = vmatprep.subr.bf16.mxu0 %v1619_v0 }
  0x3b   :  { %1367 = vmatpush3.bf16.msra.mxu1 %v1573_v33  ;;  %1447 = vmatpush3.bf16.msra.mxu0 %v1574_v34 }
  0x3c   :  { %1368 = vmatprep.subr.bf16.mxu1 %v1619_v0  ;;  %1448 = vmatprep.subr.bf16.mxu0 %v1619_v0 }
  0x3f   :  { %1369 = vmatpush3.bf16.msra.mxu1 %v1575_v35  ;;  %1449 = vmatpush3.bf16.msra.mxu0 %v1576_v36 }
  0x40   :  { %1374 = vmatprep.subr.bf16.mxu1 %v1619_v0  ;;  %1454 = vmatprep.subr.bf16.mxu0 %v1619_v0 }
  0x42   :  { %1371 = vmatmul.mubr.bf16.vlgmr.msra.gmra.mrb[0].mxu1 %v43_v39  ;;  %1451 = vmatmul.mubr.bf16.vlgmr.msra.gmra.mrb[0].mxu0 %v580_v41 }
  0x43   :  { %1375 = vmatpush3.bf16.msra.mxu1 %v1577_v40  ;;  %1455 = vmatpush3.bf16.msra.mxu0 %v1578_v42 }
  0x44   :  { %1376 = vmatprep.subr.bf16.mxu1 %v1619_v0  ;;  %1456 = vmatprep.subr.bf16.mxu0 %v1619_v0 }
  0x45   :  { %1390 = vmatprep.mubr.msk.bf16.mxu1 %vm1620_vm0, %v1619_v0  ;;  %1470 = vmatprep.mubr.msk.bf16.mxu0 %vm1620_vm0, %v1619_v0 }
  0x47   :  { %1377 = vmatpush3.bf16.msra.mxu1 %v1579_v43  ;;  %1457 = vmatpush3.bf16.msra.mxu0 %v1580_v44 }
  0x48   :  { %1378 = vmatprep.subr.bf16.mxu1 %v1619_v0  ;;  %1458 = vmatprep.subr.bf16.mxu0 %v1619_v0 }
  0x4b   :  { %1379 = vmatpush3.bf16.msra.mxu1 %v1581_v45  ;;  %1459 = vmatpush3.bf16.msra.mxu0 %v1582_v46 }
  0x4c   :  { %1380 = vmatprep.subr.bf16.mxu1 %v1619_v0  ;;  %1460 = vmatprep.subr.bf16.mxu0 %v1619_v0 }
  0x4f   :  { %1381 = vmatpush3.bf16.msra.mxu1 %v1583_v47  ;;  %1461 = vmatpush3.bf16.msra.mxu0 %v1584_v48 }
  0x50   :  { %1382 = vmatprep.subr.bf16.mxu1 %v1619_v0  ;;  %1462 = vmatprep.subr.bf16.mxu0 %v1619_v0 }
  0x53   :  { %1383 = vmatpush3.bf16.msra.mxu1 %v1585_v49  ;;  %1463 = vmatpush3.bf16.msra.mxu0 %v1586_v50 }
  0x54   :  { %1384 = vmatprep.subr.bf16.mxu1 %v1619_v0  ;;  %1464 = vmatprep.subr.bf16.mxu0 %v1619_v0 }
  0x57   :  { %1385 = vmatpush3.bf16.msra.mxu1 %v1587_v51  ;;  %1465 = vmatpush3.bf16.msra.mxu0 %v1588_v52 }
  0x58   :  { %1386 = vmatprep.subr.bf16.mxu1 %v1619_v0  ;;  %1466 = vmatprep.subr.bf16.mxu0 %v1619_v0 }
  0x5b   :  { %1387 = vmatpush3.bf16.msra.mxu1 %v1589_v53  ;;  %1467 = vmatpush3.bf16.msra.mxu0 %v1590_v54  ;;  %v1032_v53 = vlaneseq }
  0x5c   :  { %1388 = vmatprep.subr.bf16.mxu1 %v1619_v0  ;;  %1468 = vmatprep.subr.bf16.mxu0 %v1619_v0 }
  0x5d   :  { %v1033_v54 = vshrl.u32 %v1032_v53, 7 }
  0x5f   :  { %1389 = vmatpush3.bf16.msra.mxu1 %v1591_v55  ;;  %1469 = vmatpush3.bf16.msra.mxu0 %v1592_v57  ;;  %v1027_v55 = vld [vmem:[%s2038_s10] sm:$0x1]  ;;  %v1034_v56 = vsub.s32 0, %v1033_v54 }
  0x60   :  { %1394 = vmatprep.subr.bf16.mxu1 %v1619_v0  ;;  %1474 = vmatprep.subr.bf16.mxu0 %v1619_v0 }
  0x62   :  { %1391 = vmatmul.mubr.bf16.vlgmr.msra.gmra.mrb[0].mxu1 %v256_v59  ;;  %1471 = vmatmul.mubr.bf16.vlgmr.msra.gmra.mrb[0].mxu0 %v688_v61 }
  0x63   :  { %1395 = vmatpush3.bf16.msra.mxu1 %v1593_v60  ;;  %1475 = vmatpush3.bf16.msra.mxu0 %v1594_v62  ;;  %v1252_v60 = vld [vmem:[%s2039_s11] ss:$0 sm:$0xff] }
  0x64   :  { %1396 = vmatprep.subr.bf16.mxu1 %v1619_v0  ;;  %1476 = vmatprep.subr.bf16.mxu0 %v1619_v0 }
  0x65   :  { %1410 = vmatprep.mubr.msk.bf16.mxu1 %vm1620_vm0, %v1619_v0  ;;  %1490 = vmatprep.mubr.msk.bf16.mxu0 %vm1620_vm0, %v1619_v0 }
  0x67   :  { %1397 = vmatpush3.bf16.msra.mxu1 %v1595_v63  ;;  %1477 = vmatpush3.bf16.msra.mxu0 %v1596_v1 }
  0x68   :  { %1398 = vmatprep.subr.bf16.mxu1 %v1619_v0  ;;  %1478 = vmatprep.subr.bf16.mxu0 %v1619_v0 }
  0x6b   :  { %1399 = vmatpush3.bf16.msra.mxu1 %v1597_v2  ;;  %1479 = vmatpush3.bf16.msra.mxu0 %v1598_v3 }
  0x6c   :  { %1400 = vmatprep.subr.bf16.mxu1 %v1619_v0  ;;  %1480 = vmatprep.subr.bf16.mxu0 %v1619_v0 }
  0x6f   :  { %1401 = vmatpush3.bf16.msra.mxu1 %v1599_v4  ;;  %1481 = vmatpush3.bf16.msra.mxu0 %v1600_v5 }
  0x70   :  { %1402 = vmatprep.subr.bf16.mxu1 %v1619_v0  ;;  %1482 = vmatprep.subr.bf16.mxu0 %v1619_v0 }
  0x73   :  { %1403 = vmatpush3.bf16.msra.mxu1 %v1601_v6  ;;  %1483 = vmatpush3.bf16.msra.mxu0 %v1602_v7 }
  0x74   :  { %1404 = vmatprep.subr.bf16.mxu1 %v1619_v0  ;;  %1484 = vmatprep.subr.bf16.mxu0 %v1619_v0 }
  0x77   :  { %1405 = vmatpush3.bf16.msra.mxu1 %v1603_v8  ;;  %1485 = vmatpush3.bf16.msra.mxu0 %v1604_v9 }
  0x78   :  { %1406 = vmatprep.subr.bf16.mxu1 %v1619_v0  ;;  %1486 = vmatprep.subr.bf16.mxu0 %v1619_v0 }
  0x7b   :  { %1407 = vmatpush3.bf16.msra.mxu1 %v1605_v10  ;;  %1487 = vmatpush3.bf16.msra.mxu0 %v1606_v11 }
  0x7c   :  { %1408 = vmatprep.subr.bf16.mxu1 %v1619_v0  ;;  %1488 = vmatprep.subr.bf16.mxu0 %v1619_v0 }
  0x7f   :  { %1409 = vmatpush3.bf16.msra.mxu1 %v1607_v12  ;;  %1489 = vmatpush3.bf16.msra.mxu0 %v1608_v14 }
  0x80   :  { %1494 = vmatprep.subr.bf16.mxu0 %v1619_v0 }
  0x82   :  { %1411 = vmatmul.mubr.bf16.vlgmr.msra.gmra.mrb[0].mxu1 %v364_v16  ;;  %1491 = vmatmul.mubr.bf16.vlgmr.msra.gmra.mrb[0].mxu0 %v796_v17 }
  0x83   :  { %1495 = vmatpush3.bf16.msra.mxu0 %v1609_v18  ;;  %1510 = vmatprep.mubr.msk.bf16.mxu0 %vm1620_vm0, %v1619_v0 }
  0x84   :  { %1496 = vmatprep.subr.bf16.mxu0 %v1619_v0 }
  0x87   :  { %1497 = vmatpush3.bf16.msra.mxu0 %v1610_v19 }
  0x88   :  { %1498 = vmatprep.subr.bf16.mxu0 %v1619_v0 }
  0x8b   :  { %1499 = vmatpush3.bf16.msra.mxu0 %v1611_v20 }
  0x8c   :  { %1500 = vmatprep.subr.bf16.mxu0 %v1619_v0 }
  0x8f   :  { %1501 = vmatpush3.bf16.msra.mxu0 %v1612_v21 }
  0x90   :  { %1502 = vmatprep.subr.bf16.mxu0 %v1619_v0 }
  0x93   :  { %1503 = vmatpush3.bf16.msra.mxu0 %v1613_v22 }
  0x94   :  { %1504 = vmatprep.subr.bf16.mxu0 %v1619_v0 }
  0x97   :  { %1505 = vmatpush3.bf16.msra.mxu0 %v1614_v23 }
  0x98   :  { %1506 = vmatprep.subr.bf16.mxu0 %v1619_v0 }
  0x9b   :  { %1507 = vmatpush3.bf16.msra.mxu0 %v1615_v24 }
  0x9c   :  { %1508 = vmatprep.subr.bf16.mxu0 %v1619_v0 }
  0x9f   :  { %1509 = vmatpush3.bf16.msra.mxu0 %v1616_v25 }
  0xa2   :  { %1511 = vmatmul.mubr.bf16.vlgmr.msra.gmra.mrb[0].mxu0 %v904_v27 }
 0x155   :  { %v464_v28 = vpop.f32.mrb[0].mxu1 }
 0x156   :  { %v1412_v29 = vpop.f32.mrb[1].mxu1 }
 0x157   :  { %v467_v30 = vpop.f32.mrb[2].mxu1 }
 0x158   :  { %v1413_v31 = vpop.f32.mrb[3].mxu1 }
 0x175   :  { %v1004_v32 = vpop.f32.mrb[0].mxu0 }
 0x176   :  { %v1514_v33 = vadd.f32 %v1004_v32, %v464_v28  ;;  %v1512_v34 = vpop.f32.mrb[1].mxu0 }
 0x177   :  { %v1007_v35 = vpop.f32.mrb[2].mxu0 }
 0x178   :  { %v1011_v36 = vrot.slane %v1514_v33, 4  ;;  %v1513_v37 = vpop.f32.mrb[3].mxu0 }
 0x17a   :  { %v1012_v38 = vadd.f32 %v1514_v33, %v1011_v36 }
 0x17c   :  { %v1013_v39 = vrot.slane %v1012_v38, 2 }
 0x17e   :  { %v1014_v40 = vadd.f32 %v1013_v39, %v1012_v38 }
 0x180   :  { %v1015_v41 = vrot.slane %v1014_v40, 1 }
 0x182   :  { %v1016_v42 = vadd.f32 %v1015_v41, %v1014_v40 }
 0x184   :  { %v1017_v43 = vmul.f32 0.125, %v1016_v42 }
 0x186   :  { %v1018_v0 = vsub.f32 %v1514_v33, %v1017_v43 }
 0x188   :  { %v1019_v44 = vmul.f32 %v1018_v0, %v1018_v0 }
 0x18a   :  { %v1020_v45 = vrot.slane %v1019_v44, 4 }
 0x18c   :  { %v1021_v46 = vadd.f32 %v1020_v45, %v1019_v44 }
 0x18e   :  { %v1022_v47 = vrot.slane %v1021_v46, 2 }
 0x190   :  { %v1023_v48 = vadd.f32 %v1022_v47, %v1021_v46 }
 0x192   :  { %v1024_v49 = vrot.slane %v1023_v48, 1 }
 0x194   :  { %v1025_v50 = vadd.f32 %v1024_v49, %v1023_v48 }
 0x196   :  { %v1026_v51 = vmul.f32 0.125, %v1025_v50 }
 0x198   :  { %v1028_v52 = vadd.f32 1e-05, %v1026_v51 }
 0x19a   :  { %1617 = vrsqrt.f32 %v1028_v52 }
 0x1a4   :  { %v1618_v57 = vpop.eup %1617 }
 0x1a5   :  { %v1030_v58 = vmul.f32 %v1618_v57, %v1027_v55 }
 0x1a7   :  { %v1035_v59 = vrot.slane %v1030_v58, %v1034_v56 }
 0x1a9   :  { %v1037_v61 = vmul.f32 %v1035_v59, %v1018_v0 }
 0x1ab   :  { %v1045_v62 = vadd.f32 %v1252_v60, %v1037_v61 }
 0x1ad   :  { %v1046_v63 = vmax.f32 %v1045_v62, 0.0 }
 0x1af   :  { %1047 = vst [vmem:[%s2040_s12] sm:$0xff] %v1046_v63 }

// kernel: encoder_forward.19
= control target key start
LH: loop header
LB: loop body
LE: loop exit
PB: predicated region body
PF: predicated region fallthrough
CT: control target
= control target key end

     0   :  { %v1660_v1 = vmov 0.0   ;;  %vm1661_vm0 = vmmov 0   ;;  %s2087_s0 = inlined_call_operand.vmem [shape: f32[8,128], index: 0, kind: input, shape index: {}]   ;;  %s2088_s1 = inlined_call_operand.vmem [shape: f32[8,128], index: 1, kind: input, shape index: {}]   ;;  %s2089_s2 = inlined_call_operand.vmem [shape: f32[8,128], index: 2, kind: input, shape index: {}]   ;;  %s2090_s3 = inlined_call_operand.vmem [shape: f32[8,128], index: 3, kind: input, shape index: {}]   ;;  %s2091_s4 = inlined_call_operand.vmem [shape: f32[8,128], index: 4, kind: input, shape index: {}]   ;;  %s2092_s5 = inlined_call_operand.vmem [shape: f32[8,128], index: 5, kind: input, shape index: {}]   ;;  %s2093_s6 = inlined_call_operand.vmem [shape: f32[8,128], index: 6, kind: input, shape index: {}]   ;;  %s2094_s7 = inlined_call_operand.vmem [shape: f32[8,128], index: 7, kind: input, shape index: {}]   ;;  %s2095_s8 = inlined_call_operand.vmem [shape: f32[8,128], index: 8, kind: input, shape index: {}]   ;;  %s2096_s9 = inlined_call_operand.vmem [shape: bf16[9,128,128], index: 9, kind: input, shape index: {}]   ;;  %s2097_s10 = inlined_call_operand.vmem [shape: f32[1,128], index: 10, kind: input, shape index: {}]   ;;  %s2098_s11 = inlined_call_operand.vmem [shape: f32[1,128], index: 11, kind: input, shape index: {}]   ;;  %s2099_s12 = inlined_call_operand.vmem [shape: f32[8,128], index: 12, kind: input, shape index: {}]   ;;  %s2100_s13 = inlined_call_operand.hbm [shape: f32[8,128], index: 13, kind: output, shape index: {}]  }
   0x1   :  { %v1562_v0 = vld [vmem:[%s2096_s9 + $0x40] sm:$0xff]   ;;  %1350 = vmatprep.subr.bf16.mxu1 %v1660_v1  ;;  %1430 = vmatprep.subr.bf16.mxu0 %v1660_v1  ;;  %v1564_v3 = vld [vmem:[%s2096_s9 + $0x48] sm:$0xff]   ;;  %v1566_v5 = vld [vmem:[%s2096_s9 + $0x50] sm:$0xff]  }
   0x2   :  { %v1563_v2 = vld [vmem:[%s2096_s9 + $0x100] sm:$0xff]   ;;  %1351 = vmatpush3.bf16.msra.mxu1 %v1562_v0  ;;  %1366 = vmatprep.mubr.msk.bf16.mxu1 %vm1661_vm0, %v1660_v1  ;;  %v1565_v4 = vld [vmem:[%s2096_s9 + $0x108] sm:$0xff]   ;;  %v1567_v6 = vld [vmem:[%s2096_s9 + $0x110] sm:$0xff]  }
   0x3   :  { %1431 = vmatpush3.bf16.msra.mxu0 %v1563_v2  ;;  %1352 = vmatprep.subr.bf16.mxu1 %v1660_v1  ;;  %v1568_v7 = vld [vmem:[%s2096_s9 + $0x58] sm:$0xff]   ;;  %v1570_v9 = vld [vmem:[%s2096_s9 + $0x60] sm:$0xff]   ;;  %v1572_v11 = vld [vmem:[%s2096_s9 + $0x68] sm:$0xff]  }
   0x4   :  { %1432 = vmatprep.subr.bf16.mxu0 %v1660_v1  ;;  %1446 = vmatprep.mubr.msk.bf16.mxu0 %vm1661_vm0, %v1660_v1  ;;  %v1569_v8 = vld [vmem:[%s2096_s9 + $0x118] sm:$0xff]   ;;  %v1571_v10 = vld [vmem:[%s2096_s9 + $0x120] sm:$0xff]   ;;  %v1573_v12 = vld [vmem:[%s2096_s9 + $0x128] sm:$0xff]  }
   0x5   :  { %v1574_v13 = vld [vmem:[%s2096_s9 + $0x70] sm:$0xff]   ;;  %v1576_v15 = vld [vmem:[%s2096_s9 + $0x78] sm:$0xff]   ;;  %v64_v17 = vld [vmem:[%s2088_s1] sm:$0xff] }
   0x6   :  { %1353 = vmatpush3.bf16.msra.mxu1 %v1564_v3  ;;  %v1575_v14 = vld [vmem:[%s2096_s9 + $0x130] sm:$0xff]   ;;  %v1577_v16 = vld [vmem:[%s2096_s9 + $0x138] sm:$0xff]   ;;  %v475_v18 = vld [vmem:[%s2091_s4] sm:$0xff]  ;;  %v65_v19 = vpack.c.bf16 %v64_v17, %v64_v17 }
   0x7   :  { %1433 = vmatpush3.bf16.msra.mxu0 %v1565_v4  ;;  %1354 = vmatprep.subr.bf16.mxu1 %v1660_v1  ;;  %v1578_v20 = vld [vmem:[%s2096_s9] sm:$0xff]   ;;  %v476_v21 = vpack.c.bf16 %v475_v18, %v475_v18  ;;  %v1580_v23 = vld [vmem:[%s2096_s9 + $0x8] sm:$0xff]   ;;  %v1582_v25 = vld [vmem:[%s2096_s9 + $0x10] sm:$0xff]  }
   0x8   :  { %1434 = vmatprep.subr.bf16.mxu0 %v1660_v1  ;;  %v1579_v22 = vld [vmem:[%s2096_s9 + $0x140] sm:$0xff]   ;;  %v1581_v24 = vld [vmem:[%s2096_s9 + $0x148] sm:$0xff]   ;;  %v1583_v26 = vld [vmem:[%s2096_s9 + $0x150] sm:$0xff]  }
   0x9   :  { %v1584_v27 = vld [vmem:[%s2096_s9 + $0x18] sm:$0xff]   ;;  %v1586_v29 = vld [vmem:[%s2096_s9 + $0x20] sm:$0xff]   ;;  %v1588_v31 = vld [vmem:[%s2096_s9 + $0x28] sm:$0xff]  }
   0xa   :  { %1355 = vmatpush3.bf16.msra.mxu1 %v1566_v5  ;;  %v1585_v28 = vld [vmem:[%s2096_s9 + $0x158] sm:$0xff]   ;;  %v1587_v30 = vld [vmem:[%s2096_s9 + $0x160] sm:$0xff]   ;;  %v1589_v32 = vld [vmem:[%s2096_s9 + $0x168] sm:$0xff]  }
   0xb   :  { %1435 = vmatpush3.bf16.msra.mxu0 %v1567_v6  ;;  %1356 = vmatprep.subr.bf16.mxu1 %v1660_v1  ;;  %v1590_v33 = vld [vmem:[%s2096_s9 + $0x30] sm:$0xff]   ;;  %v1592_v35 = vld [vmem:[%s2096_s9 + $0x38] sm:$0xff]   ;;  %v46_v37 = vld [vmem:[%s2087_s0] sm:$0xff] }
   0xc   :  { %1436 = vmatprep.subr.bf16.mxu0 %v1660_v1  ;;  %v1591_v34 = vld [vmem:[%s2096_s9 + $0x170] sm:$0xff]   ;;  %v1593_v36 = vld [vmem:[%s2096_s9 + $0x178] sm:$0xff]   ;;  %v583_v38 = vld [vmem:[%s2092_s5] sm:$0xff]  ;;  %v47_v39 = vpack.c.bf16 %v46_v37, %v46_v37 }
   0xd   :  { %v1594_v40 = vld [vmem:[%s2096_s9 + $0x80] sm:$0xff]   ;;  %v584_v41 = vpack.c.bf16 %v583_v38, %v583_v38  ;;  %v1596_v43 = vld [vmem:[%s2096_s9 + $0x88] sm:$0xff]   ;;  %v1598_v45 = vld [vmem:[%s2096_s9 + $0x90] sm:$0xff]  }
   0xe   :  { %1357 = vmatpush3.bf16.msra.mxu1 %v1568_v7  ;;  %v1595_v42 = vld [vmem:[%s2096_s9 + $0x180] sm:$0xff]   ;;  %v1597_v44 = vld [vmem:[%s2096_s9 + $0x188] sm:$0xff]   ;;  %v1599_v46 = vld [vmem:[%s2096_s9 + $0x190] sm:$0xff]  }
   0xf   :  { %1437 = vmatpush3.bf16.msra.mxu0 %v1569_v8  ;;  %1358 = vmatprep.subr.bf16.mxu1 %v1660_v1  ;;  %v1600_v47 = vld [vmem:[%s2096_s9 + $0x98] sm:$0xff]  }
  0x10   :  { %1438 = vmatprep.subr.bf16.mxu0 %v1660_v1  ;;  %v1601_v48 = vld [vmem:[%s2096_s9 + $0x198] sm:$0xff]  }
  0x12   :  { %1359 = vmatpush3.bf16.msra.mxu1 %v1570_v9 }
  0x13   :  { %1439 = vmatpush3.bf16.msra.mxu0 %v1571_v10  ;;  %1360 = vmatprep.subr.bf16.mxu1 %v1660_v1 }
  0x14   :  { %1440 = vmatprep.subr.bf16.mxu0 %v1660_v1 }
  0x16   :  { %1361 = vmatpush3.bf16.msra.mxu1 %v1572_v11 }
  0x17   :  { %1441 = vmatpush3.bf16.msra.mxu0 %v1573_v12  ;;  %1362 = vmatprep.subr.bf16.mxu1 %v1660_v1 }
  0x18   :  { %1442 = vmatprep.subr.bf16.mxu0 %v1660_v1 }
  0x1a   :  { %1363 = vmatpush3.bf16.msra.mxu1 %v1574_v13 }
  0x1b   :  { %1443 = vmatpush3.bf16.msra.mxu0 %v1575_v14  ;;  %1364 = vmatprep.subr.bf16.mxu1 %v1660_v1 }
  0x1c   :  { %1444 = vmatprep.subr.bf16.mxu0 %v1660_v1 }
  0x1e   :  { %1365 = vmatpush3.bf16.msra.mxu1 %v1576_v15 }
  0x1f   :  { %1445 = vmatpush3.bf16.msra.mxu0 %v1577_v16  ;;  %1370 = vmatprep.subr.bf16.mxu1 %v1660_v1 }
  0x20   :  { %1450 = vmatprep.subr.bf16.mxu0 %v1660_v1 }
  0x21   :  { %1367 = vmatmul.mubr.bf16.vlgmr.msra.gmra.mrb[0].mxu1 %v65_v19 }
  0x22   :  { %1371 = vmatpush3.bf16.msra.mxu1 %v1578_v20  ;;  %1447 = vmatmul.mubr.bf16.vlgmr.msra.gmra.mrb[0].mxu0 %v476_v21 }
  0x23   :  { %1451 = vmatpush3.bf16.msra.mxu0 %v1579_v22  ;;  %1372 = vmatprep.subr.bf16.mxu1 %v1660_v1 }
  0x24   :  { %1452 = vmatprep.subr.bf16.mxu0 %v1660_v1  ;;  %1386 = vmatprep.mubr.msk.bf16.mxu1 %vm1661_vm0, %v1660_v1 }
  0x25   :  { %1466 = vmatprep.mubr.msk.bf16.mxu0 %vm1661_vm0, %v1660_v1 }
  0x26   :  { %1373 = vmatpush3.bf16.msra.mxu1 %v1580_v23 }
  0x27   :  { %1453 = vmatpush3.bf16.msra.mxu0 %v1581_v24  ;;  %1374 = vmatprep.subr.bf16.mxu1 %v1660_v1 }
  0x28   :  { %1454 = vmatprep.subr.bf16.mxu0 %v1660_v1 }
  0x2a   :  { %1375 = vmatpush3.bf16.msra.mxu1 %v1582_v25 }
  0x2b   :  { %1455 = vmatpush3.bf16.msra.mxu0 %v1583_v26  ;;  %1376 = vmatprep.subr.bf16.mxu1 %v1660_v1 }
  0x2c   :  { %1456 = vmatprep.subr.bf16.mxu0 %v1660_v1 }
  0x2e   :  { %1377 = vmatpush3.bf16.msra.mxu1 %v1584_v27 }
  0x2f   :  { %1457 = vmatpush3.bf16.msra.mxu0 %v1585_v28  ;;  %1378 = vmatprep.subr.bf16.mxu1 %v1660_v1 }
  0x30   :  { %1458 = vmatprep.subr.bf16.mxu0 %v1660_v1 }
  0x32   :  { %1379 = vmatpush3.bf16.msra.mxu1 %v1586_v29 }
  0x33   :  { %1459 = vmatpush3.bf16.msra.mxu0 %v1587_v30  ;;  %1380 = vmatprep.subr.bf16.mxu1 %v1660_v1 }
  0x34   :  { %1460 = vmatprep.subr.bf16.mxu0 %v1660_v1 }
  0x36   :  { %1381 = vmatpush3.bf16.msra.mxu1 %v1588_v31 }
  0x37   :  { %1461 = vmatpush3.bf16.msra.mxu0 %v1589_v32  ;;  %1382 = vmatprep.subr.bf16.mxu1 %v1660_v1 }
  0x38   :  { %1462 = vmatprep.subr.bf16.mxu0 %v1660_v1 }
  0x3a   :  { %1383 = vmatpush3.bf16.msra.mxu1 %v1590_v33 }
  0x3b   :  { %1463 = vmatpush3.bf16.msra.mxu0 %v1591_v34  ;;  %1384 = vmatprep.subr.bf16.mxu1 %v1660_v1 }
  0x3c   :  { %1464 = vmatprep.subr.bf16.mxu0 %v1660_v1 }
  0x3e   :  { %1385 = vmatpush3.bf16.msra.mxu1 %v1592_v35 }
  0x3f   :  { %1465 = vmatpush3.bf16.msra.mxu0 %v1593_v36  ;;  %1390 = vmatprep.subr.bf16.mxu1 %v1660_v1 }
  0x40   :  { %1470 = vmatprep.subr.bf16.mxu0 %v1660_v1 }
  0x41   :  { %1387 = vmatmul.mubr.bf16.vlgmr.msra.gmra.mrb[0].mxu1 %v47_v39 }
  0x42   :  { %1391 = vmatpush3.bf16.msra.mxu1 %v1594_v40  ;;  %1467 = vmatmul.mubr.bf16.vlgmr.msra.gmra.mrb[0].mxu0 %v584_v41 }
  0x43   :  { %1471 = vmatpush3.bf16.msra.mxu0 %v1595_v42  ;;  %1392 = vmatprep.subr.bf16.mxu1 %v1660_v1 }
  0x44   :  { %1472 = vmatprep.subr.bf16.mxu0 %v1660_v1  ;;  %1406 = vmatprep.mubr.msk.bf16.mxu1 %vm1661_vm0, %v1660_v1 }
  0x45   :  { %1486 = vmatprep.mubr.msk.bf16.mxu0 %vm1661_vm0, %v1660_v1 }
  0x46   :  { %1393 = vmatpush3.bf16.msra.mxu1 %v1596_v43 }
  0x47   :  { %1473 = vmatpush3.bf16.msra.mxu0 %v1597_v44  ;;  %1394 = vmatprep.subr.bf16.mxu1 %v1660_v1 }
  0x48   :  { %1474 = vmatprep.subr.bf16.mxu0 %v1660_v1 }
  0x4a   :  { %1395 = vmatpush3.bf16.msra.mxu1 %v1598_v45 }
  0x4b   :  { %1475 = vmatpush3.bf16.msra.mxu0 %v1599_v46  ;;  %1396 = vmatprep.subr.bf16.mxu1 %v1660_v1 }
  0x4c   :  { %18 = vsyncpa [#allocation3], 0  ;;  %1476 = vmatprep.subr.bf16.mxu0 %v1660_v1  ;;  %v1602_v49 = vld [vmem:[%s2096_s9 + $0xa0] sm:$0xff]   ;;  %v1604_v51 = vld [vmem:[%s2096_s9 + $0xa8] sm:$0xff]   ;;  %s1662_s0 = smov [#allocation2]  }
  0x4d   :  { %v1603_v50 = vld [vmem:[%s2096_s9 + $0x1a0] sm:$0xff]   ;;  %v1605_v52 = vld [vmem:[%s2096_s9 + $0x1a8] sm:$0xff]   ;;  %v1606_v53 = vld [vmem:[%s2096_s9 + $0xb0] sm:$0xff]   ;;  %s1060_s27 = sshll.u32 %s1662_s0, 4  ;;  %s1061_s27 = int_to_ptr.vmem [resolvable:$true] %s1060_s27 }
  0x4e   :  { %1397 = vmatpush3.bf16.msra.mxu1 %v1600_v47  ;;  %v1607_v54 = vld [vmem:[%s2096_s9 + $0x1b0] sm:$0xff]   ;;  %v1608_v55 = vld [vmem:[%s2096_s9 + $0xb8] sm:$0xff]   ;;  %v259_v56 = vld [vmem:[%s2089_s2] sm:$0xff]  ;;  %p1641_p1 = scmp.lt.s32.totalorder %s1061_s27, %s1061_s27 }
  0x4f   :  { %1477 = vmatpush3.bf16.msra.mxu0 %v1601_v48  ;;  %1398 = vmatprep.subr.bf16.mxu1 %v1660_v1  ;;  %v1609_v57 = vld [vmem:[%s2096_s9 + $0x1b8] sm:$0xff]   ;;  %v691_v58 = vld [vmem:[%s2093_s6] sm:$0xff]  ;;  %v260_v59 = vpack.c.bf16 %v259_v56, %v259_v56  ;;  %v1612_v63 = vld [vmem:[%s2096_s9 + $0xc8] sm:$0xff]  }
  0x50   :  { %1478 = vmatprep.subr.bf16.mxu0 %v1660_v1  ;;  %v1610_v60 = vld [vmem:[%s2096_s9 + $0xc0] sm:$0xff]   ;;  %v692_v61 = vpack.c.bf16 %v691_v58, %v691_v58  ;;  %v1613_v0 = vld [vmem:[%s2096_s9 + $0x1c8] sm:$0xff]   ;;  %v1614_v2 = vld [vmem:[%s2096_s9 + $0xd0] sm:$0xff]  }
  0x51   :  { %v1611_v62 = vld [vmem:[%s2096_s9 + $0x1c0] sm:$0xff]   ;;  %v1615_v3 = vld [vmem:[%s2096_s9 + $0x1d0] sm:$0xff]   ;;  %v1616_v4 = vld [vmem:[%s2096_s9 + $0xd8] sm:$0xff]  }
  0x52   :  { %1399 = vmatpush3.bf16.msra.mxu1 %v1602_v49  ;;  %v1617_v5 = vld [vmem:[%s2096_s9 + $0x1d8] sm:$0xff]   ;;  %v1618_v6 = vld [vmem:[%s2096_s9 + $0xe0] sm:$0xff]   ;;  %v1620_v8 = vld [vmem:[%s2096_s9 + $0xe8] sm:$0xff]  }
  0x53   :  { %1479 = vmatpush3.bf16.msra.mxu0 %v1603_v50  ;;  %1400 = vmatprep.subr.bf16.mxu1 %v1660_v1  ;;  %v1619_v7 = vld [vmem:[%s2096_s9 + $0x1e0] sm:$0xff]   ;;  %v1621_v9 = vld [vmem:[%s2096_s9 + $0x1e8] sm:$0xff]   ;;  %v1622_v10 = vld [vmem:[%s2096_s9 + $0xf0] sm:$0xff]  }
  0x54   :  { %1480 = vmatprep.subr.bf16.mxu0 %v1660_v1  ;;  %v1623_v11 = vld [vmem:[%s2096_s9 + $0x1f0] sm:$0xff]   ;;  %v1624_v12 = vld [vmem:[%s2096_s9 + $0xf8] sm:$0xff]   ;;  %v367_v13 = vld [vmem:[%s2090_s3] sm:$0xff] }
  0x55   :  { %v1625_v14 = vld [vmem:[%s2096_s9 + $0x1f8] sm:$0xff]   ;;  %v799_v15 = vld [vmem:[%s2094_s7] sm:$0xff]  ;;  %v368_v16 = vpack.c.bf16 %v367_v13, %v367_v13  ;;  %v1627_v19 = vld [vmem:[%s2096_s9 + $0x208] sm:$0xff]  }
  0x56   :  { %1401 = vmatpush3.bf16.msra.mxu1 %v1604_v51  ;;  %v800_v17 = vpack.c.bf16 %v799_v15, %v799_v15  ;;  %v1626_v18 = vld [vmem:[%s2096_s9 + $0x200] sm:$0xff]   ;;  %v1628_v20 = vld [vmem:[%s2096_s9 + $0x210] sm:$0xff]   ;;  %v1629_v21 = vld [vmem:[%s2096_s9 + $0x218] sm:$0xff]  }
  0x57   :  { %1481 = vmatpush3.bf16.msra.mxu0 %v1605_v52  ;;  %1402 = vmatprep.subr.bf16.mxu1 %v1660_v1  ;;  %v1630_v22 = vld [vmem:[%s2096_s9 + $0x220] sm:$0xff]   ;;  %v1631_v23 = vld [vmem:[%s2096_s9 + $0x228] sm:$0xff]   ;;  %v1632_v24 = vld [vmem:[%s2096_s9 + $0x230] sm:$0xff]  }
  0x58   :  { %1482 = vmatprep.subr.bf16.mxu0 %v1660_v1  ;;  %v1633_v25 = vld [vmem:[%s2096_s9 + $0x238] sm:$0xff]   ;;  %v907_v26 = vld [vmem:[%s2095_s8] sm:$0xff] }
  0x59   :  { %v908_v27 = vpack.c.bf16 %v907_v26, %v907_v26 }
  0x5a   :  { %1403 = vmatpush3.bf16.msra.mxu1 %v1606_v53  ;;  %v1036_v53 = vlaneseq }
  0x5b   :  { %1483 = vmatpush3.bf16.msra.mxu0 %v1607_v54  ;;  %1404 = vmatprep.subr.bf16.mxu1 %v1660_v1 }
  0x5c   :  { %1484 = vmatprep.subr.bf16.mxu0 %v1660_v1  ;;  %v1037_v54 = vshrl.u32 %v1036_v53, 7 }
  0x5e   :  { %1405 = vmatpush3.bf16.msra.mxu1 %v1608_v55  ;;  %v1031_v55 = vld [vmem:[%s2097_s10] sm:$0x1]  ;;  %v1038_v56 = vsub.s32 0, %v1037_v54  ;;  %s1636_s10 = scalar_lea.vmem %s1061_s27, 128 }
  0x5f   :  { %1485 = vmatpush3.bf16.msra.mxu0 %v1609_v57  ;;  %1410 = vmatprep.subr.bf16.mxu1 %v1660_v1  ;;  %p1637_p0 = scmp.ne.s32.totalorder %s1061_s27, %s1636_s10  ;;  %p1642_p2 = scmp.lt.s32.totalorder %s1636_s10, %s1636_s10 }
  0x60   :  { %1490 = vmatprep.subr.bf16.mxu0 %v1660_v1 }
  0x61   :  { %1407 = vmatmul.mubr.bf16.vlgmr.msra.gmra.mrb[0].mxu1 %v260_v59  ;;  %p1643_p3 = por %p1642_p2, %p1641_p1 }
  0x62   :  { %1411 = vmatpush3.bf16.msra.mxu1 %v1610_v60  ;;  %1487 = vmatmul.mubr.bf16.vlgmr.msra.gmra.mrb[0].mxu0 %v692_v61  ;;  %v1268_v60 = vld [vmem:[%s2098_s11] ss:$0 sm:$0xff] }
  0x63   :  { %1491 = vmatpush3.bf16.msra.mxu0 %v1611_v62  ;;  %1412 = vmatprep.subr.bf16.mxu1 %v1660_v1  ;;  %v1050_v62 = vld [vmem:[%s2099_s12] sm:$0xff]  ;;  %p1644_p4 = pnand %p1643_p3, %p1637_p0 }
  0x64   :  { %1492 = vmatprep.subr.bf16.mxu0 %v1660_v1  ;;  %1426 = vmatprep.mubr.msk.bf16.mxu1 %vm1661_vm0, %v1660_v1 }
  0x65   :  { %1506 = vmatprep.mubr.msk.bf16.mxu0 %vm1661_vm0, %v1660_v1 }
  0x66   :  { %1413 = vmatpush3.bf16.msra.mxu1 %v1612_v63 }
  0x67   :  { %1493 = vmatpush3.bf16.msra.mxu0 %v1613_v0  ;;  %1414 = vmatprep.subr.bf16.mxu1 %v1660_v1 }
  0x68   :  { %1494 = vmatprep.subr.bf16.mxu0 %v1660_v1 }
  0x6a   :  { %1415 = vmatpush3.bf16.msra.mxu1 %v1614_v2 }
  0x6b   :  { %1495 = vmatpush3.bf16.msra.mxu0 %v1615_v3  ;;  %1416 = vmatprep.subr.bf16.mxu1 %v1660_v1 }
  0x6c   :  { %1496 = vmatprep.subr.bf16.mxu0 %v1660_v1 }
  0x6e   :  { %1417 = vmatpush3.bf16.msra.mxu1 %v1616_v4 }
  0x6f   :  { %1497 = vmatpush3.bf16.msra.mxu0 %v1617_v5  ;;  %1418 = vmatprep.subr.bf16.mxu1 %v1660_v1 }
  0x70   :  { %1498 = vmatprep.subr.bf16.mxu0 %v1660_v1 }
  0x72   :  { %1419 = vmatpush3.bf16.msra.mxu1 %v1618_v6 }
  0x73   :  { %1499 = vmatpush3.bf16.msra.mxu0 %v1619_v7  ;;  %1420 = vmatprep.subr.bf16.mxu1 %v1660_v1 }
  0x74   :  { %1500 = vmatprep.subr.bf16.mxu0 %v1660_v1 }
  0x76   :  { %1421 = vmatpush3.bf16.msra.mxu1 %v1620_v8 }
  0x77   :  { %1501 = vmatpush3.bf16.msra.mxu0 %v1621_v9  ;;  %1422 = vmatprep.subr.bf16.mxu1 %v1660_v1 }
  0x78   :  { %1502 = vmatprep.subr.bf16.mxu0 %v1660_v1 }
  0x7a   :  { %1423 = vmatpush3.bf16.msra.mxu1 %v1622_v10 }
  0x7b   :  { %1503 = vmatpush3.bf16.msra.mxu0 %v1623_v11  ;;  %1424 = vmatprep.subr.bf16.mxu1 %v1660_v1 }
  0x7c   :  { %1504 = vmatprep.subr.bf16.mxu0 %v1660_v1 }
  0x7e   :  { %1425 = vmatpush3.bf16.msra.mxu1 %v1624_v12 }
  0x7f   :  { %1505 = vmatpush3.bf16.msra.mxu0 %v1625_v14 }
  0x80   :  { %1510 = vmatprep.subr.bf16.mxu0 %v1660_v1 }
  0x81   :  { %1427 = vmatmul.mubr.bf16.vlgmr.msra.gmra.mrb[0].mxu1 %v368_v16 }
  0x82   :  { %1507 = vmatmul.mubr.bf16.vlgmr.msra.gmra.mrb[0].mxu0 %v800_v17 }
  0x83   :  { %1511 = vmatpush3.bf16.msra.mxu0 %v1626_v18  ;;  %1526 = vmatprep.mubr.msk.bf16.mxu0 %vm1661_vm0, %v1660_v1 }
  0x84   :  { %1512 = vmatprep.subr.bf16.mxu0 %v1660_v1 }
  0x87   :  { %1513 = vmatpush3.bf16.msra.mxu0 %v1627_v19 }
  0x88   :  { %1514 = vmatprep.subr.bf16.mxu0 %v1660_v1 }
  0x8b   :  { %1515 = vmatpush3.bf16.msra.mxu0 %v1628_v20 }
  0x8c   :  { %1516 = vmatprep.subr.bf16.mxu0 %v1660_v1 }
  0x8f   :  { %1517 = vmatpush3.bf16.msra.mxu0 %v1629_v21 }
  0x90   :  { %1518 = vmatprep.subr.bf16.mxu0 %v1660_v1 }
  0x93   :  { %1519 = vmatpush3.bf16.msra.mxu0 %v1630_v22 }
  0x94   :  { %1520 = vmatprep.subr.bf16.mxu0 %v1660_v1 }
  0x97   :  { %1521 = vmatpush3.bf16.msra.mxu0 %v1631_v23 }
  0x98   :  { %1522 = vmatprep.subr.bf16.mxu0 %v1660_v1 }
  0x9b   :  { %1523 = vmatpush3.bf16.msra.mxu0 %v1632_v24 }
  0x9c   :  { %1524 = vmatprep.subr.bf16.mxu0 %v1660_v1 }
  0x9f   :  { %1525 = vmatpush3.bf16.msra.mxu0 %v1633_v25 }
  0xa2   :  { %1527 = vmatmul.mubr.bf16.vlgmr.msra.gmra.mrb[0].mxu0 %v908_v27 }
 0x154   :  { %v468_v28 = vpop.f32.mrb[0].mxu1 }
 0x155   :  { %v1428_v29 = vpop.f32.mrb[1].mxu1 }
 0x156   :  { %v471_v30 = vpop.f32.mrb[2].mxu1 }
 0x157   :  { %v1429_v31 = vpop.f32.mrb[3].mxu1 }
 0x175   :  { %v1008_v32 = vpop.f32.mrb[0].mxu0 }
 0x176   :  { %v1530_v33 = vadd.f32 %v1008_v32, %v468_v28  ;;  %v1528_v34 = vpop.f32.mrb[1].mxu0 }
 0x177   :  { %v1011_v35 = vpop.f32.mrb[2].mxu0 }
 0x178   :  { %v1015_v36 = vrot.slane %v1530_v33, 4  ;;  %v1529_v37 = vpop.f32.mrb[3].mxu0 }
 0x17a   :  { %v1016_v38 = vadd.f32 %v1530_v33, %v1015_v36 }
 0x17c   :  { %v1017_v39 = vrot.slane %v1016_v38, 2 }
 0x17e   :  { %v1018_v40 = vadd.f32 %v1017_v39, %v1016_v38 }
 0x180   :  { %v1019_v41 = vrot.slane %v1018_v40, 1 }
 0x182   :  { %v1020_v42 = vadd.f32 %v1019_v41, %v1018_v40 }
 0x184   :  { %v1021_v43 = vmul.f32 0.125, %v1020_v42 }
 0x186   :  { %v1022_v1 = vsub.f32 %v1530_v33, %v1021_v43 }
 0x188   :  { %v1023_v44 = vmul.f32 %v1022_v1, %v1022_v1 }
 0x18a   :  { %v1024_v45 = vrot.slane %v1023_v44, 4 }
 0x18c   :  { %v1025_v46 = vadd.f32 %v1024_v45, %v1023_v44 }
 0x18e   :  { %v1026_v47 = vrot.slane %v1025_v46, 2 }
 0x190   :  { %v1027_v48 = vadd.f32 %v1026_v47, %v1025_v46 }
 0x192   :  { %v1028_v49 = vrot.slane %v1027_v48, 1 }
 0x194   :  { %v1029_v50 = vadd.f32 %v1028_v49, %v1027_v48 }
 0x196   :  { %v1030_v51 = vmul.f32 0.125, %v1029_v50 }
 0x198   :  { %v1032_v52 = vadd.f32 1e-05, %v1030_v51 }
 0x19a   :  { %1634 = vrsqrt.f32 %v1032_v52 }
 0x1a4   :  { %v1635_v57 = vpop.eup %1634 }
 0x1a5   :  { %v1034_v58 = vmul.f32 %v1635_v57, %v1031_v55 }
 0x1a7   :  { %v1039_v59 = vrot.slane %v1034_v58, %v1038_v56 }
 0x1a9   :  { %v1041_v61 = vmul.f32 %v1039_v59, %v1022_v1 }
 0x1ab   :  { %v1049_v63 = vadd.f32 %v1268_v60, %v1041_v61 }
 0x1ad   :  { %v1051_v0 = vadd.f32 %v1050_v62, %v1049_v63 }
 0x1af   :  { %v1052_v2 = vmax.f32 %v1051_v0, 0.0 }
 0x1b1   :  { %1053 = vst [vmem:[#allocation2] sm:$0xff] %v1052_v2 }
 0x1b2   :  { %1647 = shalt.err (!%p1644_p4)
}
 0x1b3   :  { %s1648_s28 = scalar_lea.hbm %s2100_s13, 128 }
 0x1b4   :  { %p1649_p5 = scmp.ne.s32.totalorder %s2100_s13, %s1648_s28  ;;  %p1652_p6 = scmp.lt.u32.totalorder %s1648_s28, %s2100_s13 }
 0x1b6   :  { %p1654_p7 = pnand %p1652_p6, %p1649_p5 }
 0x1b8   :  { %1657 = shalt.err (!%p1654_p7)
}
 0x1b9   :  { %1063 = dma.vmem_to_hbm [thread:$0]  %s1061_s27, 128, %s2100_s13, [#allocation3]  }
 0x1ba   :  { %1658 = dma.done.wait [#allocation3], 128  }
 0x1bb   :  { %1659 = vsyncadd [#allocation3], 4294967168 }
 0x1bc   :  { %1067 = vsyncpa [#allocation3], 1 }

</bundles_post_ra>
